<compile_context>
chip_gen: v7x
topology: tpu7x:2x2x1
jax: 0.10.0
libtpu: 0.0.40
codegen_flags: <defaults>
</compile_context>

<pallas_src>
import jax
import jax.numpy as jnp
import numpy as np
from jax.experimental import pallas as pl
from jax.experimental.pallas import tpu as pltpu


# ------------------------------ Pallas kernel ------------------------------ #

def _downconv_fused_kernel(x_ref, wb_ref, wd_ref, bb_ref, bd_ref, e_ref, o_ref):
    """Whole DownConv for one batch element.

    x_ref  : (1, H, LANES)            input, padded-column layout (zero borders)
    wb_ref : (2*NB, 3, LANES, LANES)  banded weights of the 8 stride-1 convs
    wd_ref : (3, LANES, OUT_LANES)    banded weights of the stride-2 conv
    bb_ref : (2*NB, 1, LANES)         stride-1 biases in padded-column layout
    bd_ref : (1, OUT_LANES)           stride-2 bias (tiled over wo, zero-padded)
    e_ref  : (3, Ho, H+2)             row-selection matrices for the H stride
    o_ref  : (1, Ho, OUT_LANES)       output, lane-dense
    """
    H, LANES = x_ref.shape[1], x_ref.shape[2]
    n_convs = wb_ref.shape[0]
    Ho, OUT_LANES = o_ref.shape[1], o_ref.shape[2]

    zrow = jnp.zeros((1, LANES), jnp.float32)

    def repad(interior):                 # (H, LANES) -> (H+2, LANES), zero rows
        return jnp.concatenate([zrow, interior, zrow], axis=0)

    def conv3x3_s1(a_pad, idx, relu):
        # 3x3, stride 1, pad 1: three (H, LANES) x (LANES, LANES) MXU matmuls.
        acc = jnp.dot(a_pad[0:H, :], wb_ref[idx, 0],
                      preferred_element_type=jnp.float32)
        for dy in (1, 2):
            acc = acc + jnp.dot(a_pad[dy:dy + H, :], wb_ref[idx, dy],
                                preferred_element_type=jnp.float32)
        acc = acc + bb_ref[idx]          # bias already zero on border columns
        if relu:
            acc = jnp.maximum(acc, 0.0)
        return acc                       # (H, LANES), border columns stay zero

    x0 = x_ref[0].astype(jnp.float32)    # (H, LANES)
    y = repad(x0)

    # 4 x ResidualBlock_noBN: y <- y + conv2(relu(conv1(y)))
    for blk in range(n_convs // 2):
        t = repad(conv3x3_s1(y, 2 * blk, relu=True))
        y = repad(y[1:H + 1, :] + conv3x3_s1(t, 2 * blk + 1, relu=False))

    # DownConv's outer skip:  y = body(x) + x
    y = repad(y[1:H + 1, :] + x0)

    # Final conv: 3x3, stride 2, pad 1, then ReLU.  The W-stride is encoded in
    # wd_ref; the H-stride is the tiny row-selection matmul e_ref[dy] @ y.
    acc = jnp.zeros((Ho, OUT_LANES), jnp.float32)
    for dy in range(3):
        rows = jnp.dot(e_ref[dy], y, preferred_element_type=jnp.float32)
        acc = acc + jnp.dot(rows, wd_ref[dy], preferred_element_type=jnp.float32)
    acc = jnp.maximum(acc + bd_ref[...], 0.0)
    o_ref[0] = acc.astype(o_ref.dtype)


# ------------------------ weight repacking (one-time) ----------------------- #

def _round_up(v, m):
    return (v + m - 1) // m * m


def _banded_stride1(w_oihw, lanes, W):
    """(Cout,Cin,3,3) -> (3, lanes, lanes) banded matrices.

    Wband[dy][wp_in*Cin + ci, wp_out*Cout + co] = w[co, ci, dy, dx]
      where wp_in = wp_out - 1 + dx and 1 <= wp_out <= W (padded-col indices).
    """
    Cout, Cin = w_oihw.shape[0], w_oihw.shape[1]
    Wp = lanes // Cin
    wp = jnp.arange(Wp)
    valid_out = (wp >= 1) & (wp <= W)
    mats = []
    for dy in range(3):
        t = jnp.zeros((Wp, Cin, Wp, Cout), jnp.float32)
        for dx in range(3):
            sel = ((wp[:, None] == wp[None, :] + (dx - 1)) & valid_out[None, :])
            wt = jnp.transpose(w_oihw[:, :, dy, dx]).astype(jnp.float32)  # (Cin,Cout)
            t = t + sel.astype(jnp.float32)[:, None, :, None] * wt[None, :, None, :]
        mats.append(t.reshape(lanes, Wp * Cout))
    return jnp.stack(mats)


def _banded_stride2(w_oihw, lanes, Wo):
    """Stride-2 version: output columns wo*Cout+co read input wp_in = 2*wo + dx."""
    Cout, Cin = w_oihw.shape[0], w_oihw.shape[1]
    Wp = lanes // Cin
    wp = jnp.arange(Wp)
    wo = jnp.arange(Wo)
    mats = []
    for dy in range(3):
        t = jnp.zeros((Wp, Cin, Wo, Cout), jnp.float32)
        for dx in range(3):
            sel = (wp[:, None] == 2 * wo[None, :] + dx)
            wt = jnp.transpose(w_oihw[:, :, dy, dx]).astype(jnp.float32)
            t = t + sel.astype(jnp.float32)[:, None, :, None] * wt[None, :, None, :]
        mats.append(t.reshape(lanes, Wo * Cout))
    return jnp.stack(mats)


def _padded_bias(b, lanes, W):
    C = b.shape[0]
    Wp = lanes // C
    wp = jnp.arange(Wp)
    mask = ((wp >= 1) & (wp <= W)).astype(jnp.float32)
    return (mask[:, None] * b[None, :].astype(jnp.float32)).reshape(1, lanes)


def pack_downconv_params(params, H, W):
    """One-time repack of PyTorch-layout weights into the kernel's banded,
    lane-dense form.  Done outside the hot path (would be cached in deployment)."""
    inch = params["body"][0][0].shape[1]
    outch = params["down_w"].shape[0]
    lanes = _round_up((W + 2) * inch, 128)
    assert lanes % inch == 0, "channel count must divide the 128-lane tile"
    Ho, Wo = H // 2, W // 2
    out_lanes = _round_up(Wo * outch, 128)

    wb, bb = [], []
    for (w1, b1, w2, b2) in params["body"]:
        wb.append(_banded_stride1(w1, lanes, W))
        wb.append(_banded_stride1(w2, lanes, W))
        bb.append(_padded_bias(b1, lanes, W))
        bb.append(_padded_bias(b2, lanes, W))
    wb = jnp.stack(wb)                                    # (2*NB, 3, lanes, lanes)
    bb = jnp.stack(bb)                                    # (2*NB, 1, lanes)

    wd = _banded_stride2(params["down_w"], lanes, Wo)     # (3, lanes, Wo*outch)
    wd = jnp.pad(wd, ((0, 0), (0, 0), (0, out_lanes - Wo * outch)))
    bd = jnp.tile(params["down_b"].astype(jnp.float32), Wo).reshape(1, Wo * outch)

    hp = jnp.arange(H + 2)
    ho = jnp.arange(Ho)
    e = jnp.stack([(hp[None, :] == 2 * ho[:, None] + dy).astype(jnp.float32)
                   for dy in range(3)])                   # (3, Ho, H+2)

    return dict(wb=wb, bb=bb, wd=wd, bd=bd, e=e)


# --------------------------------- forward --------------------------------- #

def downconv_forward(x_nchw, packed):
    """Pallas-backed DownConv forward.  Input/output in NCHW (PyTorch layout)."""
    N, C, H, W = x_nchw.shape
    lanes = packed["wb"].shape[-1]
    Wp = lanes // C
    Ho, Wo = H // 2, W // 2
    outch = packed["bd"].shape[-1] // Wo
    out_lanes = packed["wd"].shape[-1]
    bd = jnp.pad(packed["bd"], ((0, 0), (0, out_lanes - Wo * outch)))

    # NCHW -> lane-dense padded-column layout (N, H, Wp*C); data at wp in [1, W].
    x_cols = jnp.transpose(x_nchw, (0, 2, 3, 1))                       # NHWC
    x_cols = jnp.pad(x_cols, ((0, 0), (0, 0), (1, Wp - W - 1), (0, 0)))
    x_cols = x_cols.reshape(N, H, lanes)

    out = pl.pallas_call(
        _downconv_fused_kernel,
        out_shape=jax.ShapeDtypeStruct((N, Ho, out_lanes), x_nchw.dtype),
        grid=(N,),
        in_specs=[
            pl.BlockSpec((1, H, lanes), lambda n: (n, 0, 0)),
            pl.BlockSpec(packed["wb"].shape, lambda n: (0, 0, 0, 0)),
            pl.BlockSpec(packed["wd"].shape, lambda n: (0, 0, 0)),
            pl.BlockSpec(packed["bb"].shape, lambda n: (0, 0, 0)),
            pl.BlockSpec((1, out_lanes), lambda n: (0, 0)),
            pl.BlockSpec(packed["e"].shape, lambda n: (0, 0, 0)),
        ],
        out_specs=pl.BlockSpec((1, Ho, out_lanes), lambda n: (n, 0, 0)),
        compiler_params=pltpu.CompilerParams(
            dimension_semantics=("parallel",),      # batch across v7x's 2 TCs
            vmem_limit_bytes=32 * 1024 * 1024),
    )(x_cols, packed["wb"], packed["wd"], packed["bb"], bd, packed["e"])

    out = out[:, :, :Wo * outch].reshape(N, Ho, Wo, outch)
    return jnp.transpose(out, (0, 3, 1, 2))                            # NCHW


# --------------------------- params / reference ---------------------------- #

def init_downconv_params(key, inch, outch, nb=5):
    """Deterministic parameter init; same shapes as the PyTorch module."""
    params = {"body": []}
    for _ in range(1, nb):                       # nb-1 residual blocks
        key, k1, k2, k3, k4 = jax.random.split(key, 5)
        w1 = 0.1 * jax.random.normal(k1, (inch, inch, 3, 3), jnp.float32)
        b1 = 0.01 * jax.random.normal(k2, (inch,), jnp.float32)
        w2 = 0.1 * jax.random.normal(k3, (inch, inch, 3, 3), jnp.float32)
        b2 = 0.01 * jax.random.normal(k4, (inch,), jnp.float32)
        params["body"].append((w1, b1, w2, b2))
    key, k5, k6 = jax.random.split(key, 3)
    params["down_w"] = 0.1 * jax.random.normal(k5, (outch, inch, 3, 3), jnp.float32)
    params["down_b"] = 0.01 * jax.random.normal(k6, (outch,), jnp.float32)
    return params


def _ref_conv2d(x, w, b, stride, padding):
    out = jax.lax.conv_general_dilated(
        x, w, (stride, stride), ((padding, padding), (padding, padding)),
        dimension_numbers=("NCHW", "OIHW", "NCHW"))
    return out + b[None, :, None, None]


def downconv_ref(x, params):
    x0 = x
    y = x
    for (w1, b1, w2, b2) in params["body"]:
        t = jax.nn.relu(_ref_conv2d(y, w1, b1, 1, 1))
        y = y + _ref_conv2d(t, w2, b2, 1, 1)
    y = y + x0
    return jax.nn.relu(_ref_conv2d(y, params["down_w"], params["down_b"], 2, 1))


# ----------------------------------- main ----------------------------------- #

if __name__ == "__main__":
    key = jax.random.PRNGKey(0)
    key, kx, kp = jax.random.split(key, 3)

    N, inch, outch, H, W = 2, 4, 8, 16, 16
    x = jax.random.normal(kx, (N, inch, H, W), jnp.float32)      # NCHW, like torch
    params = init_downconv_params(kp, inch, outch, nb=5)

    packed = pack_downconv_params(params, H, W)                  # one-time repack
    fwd = jax.jit(downconv_forward)
    out = jax.block_until_ready(fwd(x, packed))

    ref = jax.block_until_ready(downconv_ref(x, params))
    assert out.shape == (N, outch, H // 2, W // 2), out.shape
    err = float(np.max(np.abs(np.asarray(out) - np.asarray(ref))))
    assert np.allclose(np.asarray(out), np.asarray(ref), rtol=2e-3, atol=2e-3), err

    print("KERNEL_OK")
</pallas_src>

<mosaic_0001>
module attributes {stable_mosaic.version = 11 : i64} {
  func.func @_downconv_fused_kernel(%arg0: i32, %arg1: memref<1x16x128xf32, #tpu.memory_space<vmem>>, %arg2: memref<8x3x128x128xf32, #tpu.memory_space<vmem>>, %arg3: memref<3x128x128xf32, #tpu.memory_space<vmem>>, %arg4: memref<8x1x128xf32, #tpu.memory_space<vmem>>, %arg5: memref<1x128xf32, #tpu.memory_space<vmem>>, %arg6: memref<3x8x18xf32, #tpu.memory_space<vmem>>, %arg7: memref<1x8x128xf32, #tpu.memory_space<vmem>>) attributes {dimension_semantics = [#tpu.dimension_semantics<parallel>], iteration_bounds = array<i64: 2>, scalar_prefetch = 0 : i64, scratch_operands = 0 : i64, tpu.core_type = #tpu.core_type<tc>, window_params = [{transform_indices = @transform_0, window_bounds = array<i64: 1, 16, 128>}, {pipeline_mode = #tpu.pipeline_mode<synchronous>, transform_indices = @transform_1, window_bounds = array<i64: 8, 3, 128, 128>}, {pipeline_mode = #tpu.pipeline_mode<synchronous>, transform_indices = @transform_2, window_bounds = array<i64: 3, 128, 128>}, {pipeline_mode = #tpu.pipeline_mode<synchronous>, transform_indices = @transform_3, window_bounds = array<i64: 8, 1, 128>}, {pipeline_mode = #tpu.pipeline_mode<synchronous>, transform_indices = @transform_4, window_bounds = array<i64: 1, 128>}, {pipeline_mode = #tpu.pipeline_mode<synchronous>, transform_indices = @transform_5, window_bounds = array<i64: 3, 8, 18>}, {transform_indices = @transform_6, window_bounds = array<i64: 1, 8, 128>}]} {
    %cst = arith.constant 0.000000e+00 : f32
    %0 = vector.broadcast %cst : f32 to vector<1x128xf32>
    %c0 = arith.constant 0 : index
    %c0_0 = arith.constant 0 : index
    %c0_1 = arith.constant 0 : index
    %1 = vector.load %arg1[%c0, %c0_0, %c0_1] : memref<1x16x128xf32, #tpu.memory_space<vmem>>, vector<1x16x128xf32>
    %2 = vector.shape_cast %1 : vector<1x16x128xf32> to vector<16x128xf32>
    %3 = tpu.concatenate %0, %2, %0 in 0 : vector<1x128xf32>, vector<16x128xf32>, vector<1x128xf32> -> vector<18x128xf32>
    %4 = vector.extract_strided_slice %3 {offsets = [0, 0], sizes = [16, 128], strides = [1, 1]} : vector<18x128xf32> to vector<16x128xf32>
    %c0_2 = arith.constant 0 : index
    %c0_3 = arith.constant 0 : index
    %c0_4 = arith.constant 0 : index
    %c0_5 = arith.constant 0 : index
    %5 = vector.load %arg2[%c0_2, %c0_3, %c0_4, %c0_5] : memref<8x3x128x128xf32, #tpu.memory_space<vmem>>, vector<1x1x128x128xf32>
    %6 = vector.shape_cast %5 : vector<1x1x128x128xf32> to vector<128x128xf32>
    %cst_6 = arith.constant dense<0.000000e+00> : vector<16x128xf32>
    %7 = tpu.matmul %4, %6, %cst_6 {dimension_numbers = #tpu.dot_dimension_numbers<[1], [0], [0], [1], [0, 0, 1, 1], [], []>} : vector<16x128xf32>, vector<128x128xf32>, vector<16x128xf32> -> vector<16x128xf32>
    %8 = vector.extract_strided_slice %3 {offsets = [1, 0], sizes = [16, 128], strides = [1, 1]} : vector<18x128xf32> to vector<16x128xf32>
    %c0_7 = arith.constant 0 : index
    %c1 = arith.constant 1 : index
    %c0_8 = arith.constant 0 : index
    %c0_9 = arith.constant 0 : index
    %9 = vector.load %arg2[%c0_7, %c1, %c0_8, %c0_9] : memref<8x3x128x128xf32, #tpu.memory_space<vmem>>, vector<1x1x128x128xf32>
    %10 = vector.shape_cast %9 : vector<1x1x128x128xf32> to vector<128x128xf32>
    %cst_10 = arith.constant dense<0.000000e+00> : vector<16x128xf32>
    %11 = tpu.matmul %8, %10, %cst_10 {dimension_numbers = #tpu.dot_dimension_numbers<[1], [0], [0], [1], [0, 0, 1, 1], [], []>} : vector<16x128xf32>, vector<128x128xf32>, vector<16x128xf32> -> vector<16x128xf32>
    %12 = arith.addf %7, %11 : vector<16x128xf32>
    %13 = vector.extract_strided_slice %3 {offsets = [2, 0], sizes = [16, 128], strides = [1, 1]} : vector<18x128xf32> to vector<16x128xf32>
    %c0_11 = arith.constant 0 : index
    %c2 = arith.constant 2 : index
    %c0_12 = arith.constant 0 : index
    %c0_13 = arith.constant 0 : index
    %14 = vector.load %arg2[%c0_11, %c2, %c0_12, %c0_13] : memref<8x3x128x128xf32, #tpu.memory_space<vmem>>, vector<1x1x128x128xf32>
    %15 = vector.shape_cast %14 : vector<1x1x128x128xf32> to vector<128x128xf32>
    %cst_14 = arith.constant dense<0.000000e+00> : vector<16x128xf32>
    %16 = tpu.matmul %13, %15, %cst_14 {dimension_numbers = #tpu.dot_dimension_numbers<[1], [0], [0], [1], [0, 0, 1, 1], [], []>} : vector<16x128xf32>, vector<128x128xf32>, vector<16x128xf32> -> vector<16x128xf32>
    %17 = arith.addf %12, %16 : vector<16x128xf32>
    %c0_15 = arith.constant 0 : index
    %c0_16 = arith.constant 0 : index
    %c0_17 = arith.constant 0 : index
    %18 = vector.load %arg4[%c0_15, %c0_16, %c0_17] : memref<8x1x128xf32, #tpu.memory_space<vmem>>, vector<1x1x128xf32>
    %19 = vector.shape_cast %18 : vector<1x1x128xf32> to vector<1x128xf32>
    %20 = vector.broadcast %19 : vector<1x128xf32> to vector<16x128xf32>
    %21 = arith.addf %17, %20 : vector<16x128xf32>
    %cst_18 = arith.constant 0.000000e+00 : f32
    %22 = vector.broadcast %cst_18 : f32 to vector<16x128xf32>
    %23 = arith.maximumf %21, %22 : vector<16x128xf32>
    %24 = tpu.concatenate %0, %23, %0 in 0 : vector<1x128xf32>, vector<16x128xf32>, vector<1x128xf32> -> vector<18x128xf32>
    %25 = vector.extract_strided_slice %3 {offsets = [1, 0], sizes = [16, 128], strides = [1, 1]} : vector<18x128xf32> to vector<16x128xf32>
    %26 = vector.extract_strided_slice %24 {offsets = [0, 0], sizes = [16, 128], strides = [1, 1]} : vector<18x128xf32> to vector<16x128xf32>
    %c1_19 = arith.constant 1 : index
    %c0_20 = arith.constant 0 : index
    %c0_21 = arith.constant 0 : index
    %c0_22 = arith.constant 0 : index
    %27 = vector.load %arg2[%c1_19, %c0_20, %c0_21, %c0_22] : memref<8x3x128x128xf32, #tpu.memory_space<vmem>>, vector<1x1x128x128xf32>
    %28 = vector.shape_cast %27 : vector<1x1x128x128xf32> to vector<128x128xf32>
    %cst_23 = arith.constant dense<0.000000e+00> : vector<16x128xf32>
    %29 = tpu.matmul %26, %28, %cst_23 {dimension_numbers = #tpu.dot_dimension_numbers<[1], [0], [0], [1], [0, 0, 1, 1], [], []>} : vector<16x128xf32>, vector<128x128xf32>, vector<16x128xf32> -> vector<16x128xf32>
    %30 = vector.extract_strided_slice %24 {offsets = [1, 0], sizes = [16, 128], strides = [1, 1]} : vector<18x128xf32> to vector<16x128xf32>
    %c1_24 = arith.constant 1 : index
    %c1_25 = arith.constant 1 : index
    %c0_26 = arith.constant 0 : index
    %c0_27 = arith.constant 0 : index
    %31 = vector.load %arg2[%c1_24, %c1_25, %c0_26, %c0_27] : memref<8x3x128x128xf32, #tpu.memory_space<vmem>>, vector<1x1x128x128xf32>
    %32 = vector.shape_cast %31 : vector<1x1x128x128xf32> to vector<128x128xf32>
    %cst_28 = arith.constant dense<0.000000e+00> : vector<16x128xf32>
    %33 = tpu.matmul %30, %32, %cst_28 {dimension_numbers = #tpu.dot_dimension_numbers<[1], [0], [0], [1], [0, 0, 1, 1], [], []>} : vector<16x128xf32>, vector<128x128xf32>, vector<16x128xf32> -> vector<16x128xf32>
    %34 = arith.addf %29, %33 : vector<16x128xf32>
    %35 = vector.extract_strided_slice %24 {offsets = [2, 0], sizes = [16, 128], strides = [1, 1]} : vector<18x128xf32> to vector<16x128xf32>
    %c1_29 = arith.constant 1 : index
    %c2_30 = arith.constant 2 : index
    %c0_31 = arith.constant 0 : index
    %c0_32 = arith.constant 0 : index
    %36 = vector.load %arg2[%c1_29, %c2_30, %c0_31, %c0_32] : memref<8x3x128x128xf32, #tpu.memory_space<vmem>>, vector<1x1x128x128xf32>
    %37 = vector.shape_cast %36 : vector<1x1x128x128xf32> to vector<128x128xf32>
    %cst_33 = arith.constant dense<0.000000e+00> : vector<16x128xf32>
    %38 = tpu.matmul %35, %37, %cst_33 {dimension_numbers = #tpu.dot_dimension_numbers<[1], [0], [0], [1], [0, 0, 1, 1], [], []>} : vector<16x128xf32>, vector<128x128xf32>, vector<16x128xf32> -> vector<16x128xf32>
    %39 = arith.addf %34, %38 : vector<16x128xf32>
    %c1_34 = arith.constant 1 : index
    %c0_35 = arith.constant 0 : index
    %c0_36 = arith.constant 0 : index
    %40 = vector.load %arg4[%c1_34, %c0_35, %c0_36] : memref<8x1x128xf32, #tpu.memory_space<vmem>>, vector<1x1x128xf32>
    %41 = vector.shape_cast %40 : vector<1x1x128xf32> to vector<1x128xf32>
    %42 = vector.broadcast %41 : vector<1x128xf32> to vector<16x128xf32>
    %43 = arith.addf %39, %42 : vector<16x128xf32>
    %44 = arith.addf %25, %43 : vector<16x128xf32>
    %45 = tpu.concatenate %0, %44, %0 in 0 : vector<1x128xf32>, vector<16x128xf32>, vector<1x128xf32> -> vector<18x128xf32>
    %46 = vector.extract_strided_slice %45 {offsets = [0, 0], sizes = [16, 128], strides = [1, 1]} : vector<18x128xf32> to vector<16x128xf32>
    %c2_37 = arith.constant 2 : index
    %c0_38 = arith.constant 0 : index
    %c0_39 = arith.constant 0 : index
    %c0_40 = arith.constant 0 : index
    %47 = vector.load %arg2[%c2_37, %c0_38, %c0_39, %c0_40] : memref<8x3x128x128xf32, #tpu.memory_space<vmem>>, vector<1x1x128x128xf32>
    %48 = vector.shape_cast %47 : vector<1x1x128x128xf32> to vector<128x128xf32>
    %cst_41 = arith.constant dense<0.000000e+00> : vector<16x128xf32>
    %49 = tpu.matmul %46, %48, %cst_41 {dimension_numbers = #tpu.dot_dimension_numbers<[1], [0], [0], [1], [0, 0, 1, 1], [], []>} : vector<16x128xf32>, vector<128x128xf32>, vector<16x128xf32> -> vector<16x128xf32>
    %50 = vector.extract_strided_slice %45 {offsets = [1, 0], sizes = [16, 128], strides = [1, 1]} : vector<18x128xf32> to vector<16x128xf32>
    %c2_42 = arith.constant 2 : index
    %c1_43 = arith.constant 1 : index
    %c0_44 = arith.constant 0 : index
    %c0_45 = arith.constant 0 : index
    %51 = vector.load %arg2[%c2_42, %c1_43, %c0_44, %c0_45] : memref<8x3x128x128xf32, #tpu.memory_space<vmem>>, vector<1x1x128x128xf32>
    %52 = vector.shape_cast %51 : vector<1x1x128x128xf32> to vector<128x128xf32>
    %cst_46 = arith.constant dense<0.000000e+00> : vector<16x128xf32>
    %53 = tpu.matmul %50, %52, %cst_46 {dimension_numbers = #tpu.dot_dimension_numbers<[1], [0], [0], [1], [0, 0, 1, 1], [], []>} : vector<16x128xf32>, vector<128x128xf32>, vector<16x128xf32> -> vector<16x128xf32>
    %54 = arith.addf %49, %53 : vector<16x128xf32>
    %55 = vector.extract_strided_slice %45 {offsets = [2, 0], sizes = [16, 128], strides = [1, 1]} : vector<18x128xf32> to vector<16x128xf32>
    %c2_47 = arith.constant 2 : index
    %c2_48 = arith.constant 2 : index
    %c0_49 = arith.constant 0 : index
    %c0_50 = arith.constant 0 : index
    %56 = vector.load %arg2[%c2_47, %c2_48, %c0_49, %c0_50] : memref<8x3x128x128xf32, #tpu.memory_space<vmem>>, vector<1x1x128x128xf32>
    %57 = vector.shape_cast %56 : vector<1x1x128x128xf32> to vector<128x128xf32>
    %cst_51 = arith.constant dense<0.000000e+00> : vector<16x128xf32>
    %58 = tpu.matmul %55, %57, %cst_51 {dimension_numbers = #tpu.dot_dimension_numbers<[1], [0], [0], [1], [0, 0, 1, 1], [], []>} : vector<16x128xf32>, vector<128x128xf32>, vector<16x128xf32> -> vector<16x128xf32>
    %59 = arith.addf %54, %58 : vector<16x128xf32>
    %c2_52 = arith.constant 2 : index
    %c0_53 = arith.constant 0 : index
    %c0_54 = arith.constant 0 : index
    %60 = vector.load %arg4[%c2_52, %c0_53, %c0_54] : memref<8x1x128xf32, #tpu.memory_space<vmem>>, vector<1x1x128xf32>
    %61 = vector.shape_cast %60 : vector<1x1x128xf32> to vector<1x128xf32>
    %62 = vector.broadcast %61 : vector<1x128xf32> to vector<16x128xf32>
    %63 = arith.addf %59, %62 : vector<16x128xf32>
    %cst_55 = arith.constant 0.000000e+00 : f32
    %64 = vector.broadcast %cst_55 : f32 to vector<16x128xf32>
    %65 = arith.maximumf %63, %64 : vector<16x128xf32>
    %66 = tpu.concatenate %0, %65, %0 in 0 : vector<1x128xf32>, vector<16x128xf32>, vector<1x128xf32> -> vector<18x128xf32>
    %67 = vector.extract_strided_slice %45 {offsets = [1, 0], sizes = [16, 128], strides = [1, 1]} : vector<18x128xf32> to vector<16x128xf32>
    %68 = vector.extract_strided_slice %66 {offsets = [0, 0], sizes = [16, 128], strides = [1, 1]} : vector<18x128xf32> to vector<16x128xf32>
    %c3 = arith.constant 3 : index
    %c0_56 = arith.constant 0 : index
    %c0_57 = arith.constant 0 : index
    %c0_58 = arith.constant 0 : index
    %69 = vector.load %arg2[%c3, %c0_56, %c0_57, %c0_58] : memref<8x3x128x128xf32, #tpu.memory_space<vmem>>, vector<1x1x128x128xf32>
    %70 = vector.shape_cast %69 : vector<1x1x128x128xf32> to vector<128x128xf32>
    %cst_59 = arith.constant dense<0.000000e+00> : vector<16x128xf32>
    %71 = tpu.matmul %68, %70, %cst_59 {dimension_numbers = #tpu.dot_dimension_numbers<[1], [0], [0], [1], [0, 0, 1, 1], [], []>} : vector<16x128xf32>, vector<128x128xf32>, vector<16x128xf32> -> vector<16x128xf32>
    %72 = vector.extract_strided_slice %66 {offsets = [1, 0], sizes = [16, 128], strides = [1, 1]} : vector<18x128xf32> to vector<16x128xf32>
    %c3_60 = arith.constant 3 : index
    %c1_61 = arith.constant 1 : index
    %c0_62 = arith.constant 0 : index
    %c0_63 = arith.constant 0 : index
    %73 = vector.load %arg2[%c3_60, %c1_61, %c0_62, %c0_63] : memref<8x3x128x128xf32, #tpu.memory_space<vmem>>, vector<1x1x128x128xf32>
    %74 = vector.shape_cast %73 : vector<1x1x128x128xf32> to vector<128x128xf32>
    %cst_64 = arith.constant dense<0.000000e+00> : vector<16x128xf32>
    %75 = tpu.matmul %72, %74, %cst_64 {dimension_numbers = #tpu.dot_dimension_numbers<[1], [0], [0], [1], [0, 0, 1, 1], [], []>} : vector<16x128xf32>, vector<128x128xf32>, vector<16x128xf32> -> vector<16x128xf32>
    %76 = arith.addf %71, %75 : vector<16x128xf32>
    %77 = vector.extract_strided_slice %66 {offsets = [2, 0], sizes = [16, 128], strides = [1, 1]} : vector<18x128xf32> to vector<16x128xf32>
    %c3_65 = arith.constant 3 : index
    %c2_66 = arith.constant 2 : index
    %c0_67 = arith.constant 0 : index
    %c0_68 = arith.constant 0 : index
    %78 = vector.load %arg2[%c3_65, %c2_66, %c0_67, %c0_68] : memref<8x3x128x128xf32, #tpu.memory_space<vmem>>, vector<1x1x128x128xf32>
    %79 = vector.shape_cast %78 : vector<1x1x128x128xf32> to vector<128x128xf32>
    %cst_69 = arith.constant dense<0.000000e+00> : vector<16x128xf32>
    %80 = tpu.matmul %77, %79, %cst_69 {dimension_numbers = #tpu.dot_dimension_numbers<[1], [0], [0], [1], [0, 0, 1, 1], [], []>} : vector<16x128xf32>, vector<128x128xf32>, vector<16x128xf32> -> vector<16x128xf32>
    %81 = arith.addf %76, %80 : vector<16x128xf32>
    %c3_70 = arith.constant 3 : index
    %c0_71 = arith.constant 0 : index
    %c0_72 = arith.constant 0 : index
    %82 = vector.load %arg4[%c3_70, %c0_71, %c0_72] : memref<8x1x128xf32, #tpu.memory_space<vmem>>, vector<1x1x128xf32>
    %83 = vector.shape_cast %82 : vector<1x1x128xf32> to vector<1x128xf32>
    %84 = vector.broadcast %83 : vector<1x128xf32> to vector<16x128xf32>
    %85 = arith.addf %81, %84 : vector<16x128xf32>
    %86 = arith.addf %67, %85 : vector<16x128xf32>
    %87 = tpu.concatenate %0, %86, %0 in 0 : vector<1x128xf32>, vector<16x128xf32>, vector<1x128xf32> -> vector<18x128xf32>
    %88 = vector.extract_strided_slice %87 {offsets = [0, 0], sizes = [16, 128], strides = [1, 1]} : vector<18x128xf32> to vector<16x128xf32>
    %c4 = arith.constant 4 : index
    %c0_73 = arith.constant 0 : index
    %c0_74 = arith.constant 0 : index
    %c0_75 = arith.constant 0 : index
    %89 = vector.load %arg2[%c4, %c0_73, %c0_74, %c0_75] : memref<8x3x128x128xf32, #tpu.memory_space<vmem>>, vector<1x1x128x128xf32>
    %90 = vector.shape_cast %89 : vector<1x1x128x128xf32> to vector<128x128xf32>
    %cst_76 = arith.constant dense<0.000000e+00> : vector<16x128xf32>
    %91 = tpu.matmul %88, %90, %cst_76 {dimension_numbers = #tpu.dot_dimension_numbers<[1], [0], [0], [1], [0, 0, 1, 1], [], []>} : vector<16x128xf32>, vector<128x128xf32>, vector<16x128xf32> -> vector<16x128xf32>
    %92 = vector.extract_strided_slice %87 {offsets = [1, 0], sizes = [16, 128], strides = [1, 1]} : vector<18x128xf32> to vector<16x128xf32>
    %c4_77 = arith.constant 4 : index
    %c1_78 = arith.constant 1 : index
    %c0_79 = arith.constant 0 : index
    %c0_80 = arith.constant 0 : index
    %93 = vector.load %arg2[%c4_77, %c1_78, %c0_79, %c0_80] : memref<8x3x128x128xf32, #tpu.memory_space<vmem>>, vector<1x1x128x128xf32>
    %94 = vector.shape_cast %93 : vector<1x1x128x128xf32> to vector<128x128xf32>
    %cst_81 = arith.constant dense<0.000000e+00> : vector<16x128xf32>
    %95 = tpu.matmul %92, %94, %cst_81 {dimension_numbers = #tpu.dot_dimension_numbers<[1], [0], [0], [1], [0, 0, 1, 1], [], []>} : vector<16x128xf32>, vector<128x128xf32>, vector<16x128xf32> -> vector<16x128xf32>
    %96 = arith.addf %91, %95 : vector<16x128xf32>
    %97 = vector.extract_strided_slice %87 {offsets = [2, 0], sizes = [16, 128], strides = [1, 1]} : vector<18x128xf32> to vector<16x128xf32>
    %c4_82 = arith.constant 4 : index
    %c2_83 = arith.constant 2 : index
    %c0_84 = arith.constant 0 : index
    %c0_85 = arith.constant 0 : index
    %98 = vector.load %arg2[%c4_82, %c2_83, %c0_84, %c0_85] : memref<8x3x128x128xf32, #tpu.memory_space<vmem>>, vector<1x1x128x128xf32>
    %99 = vector.shape_cast %98 : vector<1x1x128x128xf32> to vector<128x128xf32>
    %cst_86 = arith.constant dense<0.000000e+00> : vector<16x128xf32>
    %100 = tpu.matmul %97, %99, %cst_86 {dimension_numbers = #tpu.dot_dimension_numbers<[1], [0], [0], [1], [0, 0, 1, 1], [], []>} : vector<16x128xf32>, vector<128x128xf32>, vector<16x128xf32> -> vector<16x128xf32>
    %101 = arith.addf %96, %100 : vector<16x128xf32>
    %c4_87 = arith.constant 4 : index
    %c0_88 = arith.constant 0 : index
    %c0_89 = arith.constant 0 : index
    %102 = vector.load %arg4[%c4_87, %c0_88, %c0_89] : memref<8x1x128xf32, #tpu.memory_space<vmem>>, vector<1x1x128xf32>
    %103 = vector.shape_cast %102 : vector<1x1x128xf32> to vector<1x128xf32>
    %104 = vector.broadcast %103 : vector<1x128xf32> to vector<16x128xf32>
    %105 = arith.addf %101, %104 : vector<16x128xf32>
    %cst_90 = arith.constant 0.000000e+00 : f32
    %106 = vector.broadcast %cst_90 : f32 to vector<16x128xf32>
    %107 = arith.maximumf %105, %106 : vector<16x128xf32>
    %108 = tpu.concatenate %0, %107, %0 in 0 : vector<1x128xf32>, vector<16x128xf32>, vector<1x128xf32> -> vector<18x128xf32>
    %109 = vector.extract_strided_slice %87 {offsets = [1, 0], sizes = [16, 128], strides = [1, 1]} : vector<18x128xf32> to vector<16x128xf32>
    %110 = vector.extract_strided_slice %108 {offsets = [0, 0], sizes = [16, 128], strides = [1, 1]} : vector<18x128xf32> to vector<16x128xf32>
    %c5 = arith.constant 5 : index
    %c0_91 = arith.constant 0 : index
    %c0_92 = arith.constant 0 : index
    %c0_93 = arith.constant 0 : index
    %111 = vector.load %arg2[%c5, %c0_91, %c0_92, %c0_93] : memref<8x3x128x128xf32, #tpu.memory_space<vmem>>, vector<1x1x128x128xf32>
    %112 = vector.shape_cast %111 : vector<1x1x128x128xf32> to vector<128x128xf32>
    %cst_94 = arith.constant dense<0.000000e+00> : vector<16x128xf32>
    %113 = tpu.matmul %110, %112, %cst_94 {dimension_numbers = #tpu.dot_dimension_numbers<[1], [0], [0], [1], [0, 0, 1, 1], [], []>} : vector<16x128xf32>, vector<128x128xf32>, vector<16x128xf32> -> vector<16x128xf32>
    %114 = vector.extract_strided_slice %108 {offsets = [1, 0], sizes = [16, 128], strides = [1, 1]} : vector<18x128xf32> to vector<16x128xf32>
    %c5_95 = arith.constant 5 : index
    %c1_96 = arith.constant 1 : index
    %c0_97 = arith.constant 0 : index
    %c0_98 = arith.constant 0 : index
    %115 = vector.load %arg2[%c5_95, %c1_96, %c0_97, %c0_98] : memref<8x3x128x128xf32, #tpu.memory_space<vmem>>, vector<1x1x128x128xf32>
    %116 = vector.shape_cast %115 : vector<1x1x128x128xf32> to vector<128x128xf32>
    %cst_99 = arith.constant dense<0.000000e+00> : vector<16x128xf32>
    %117 = tpu.matmul %114, %116, %cst_99 {dimension_numbers = #tpu.dot_dimension_numbers<[1], [0], [0], [1], [0, 0, 1, 1], [], []>} : vector<16x128xf32>, vector<128x128xf32>, vector<16x128xf32> -> vector<16x128xf32>
    %118 = arith.addf %113, %117 : vector<16x128xf32>
    %119 = vector.extract_strided_slice %108 {offsets = [2, 0], sizes = [16, 128], strides = [1, 1]} : vector<18x128xf32> to vector<16x128xf32>
    %c5_100 = arith.constant 5 : index
    %c2_101 = arith.constant 2 : index
    %c0_102 = arith.constant 0 : index
    %c0_103 = arith.constant 0 : index
    %120 = vector.load %arg2[%c5_100, %c2_101, %c0_102, %c0_103] : memref<8x3x128x128xf32, #tpu.memory_space<vmem>>, vector<1x1x128x128xf32>
    %121 = vector.shape_cast %120 : vector<1x1x128x128xf32> to vector<128x128xf32>
    %cst_104 = arith.constant dense<0.000000e+00> : vector<16x128xf32>
    %122 = tpu.matmul %119, %121, %cst_104 {dimension_numbers = #tpu.dot_dimension_numbers<[1], [0], [0], [1], [0, 0, 1, 1], [], []>} : vector<16x128xf32>, vector<128x128xf32>, vector<16x128xf32> -> vector<16x128xf32>
    %123 = arith.addf %118, %122 : vector<16x128xf32>
    %c5_105 = arith.constant 5 : index
    %c0_106 = arith.constant 0 : index
    %c0_107 = arith.constant 0 : index
    %124 = vector.load %arg4[%c5_105, %c0_106, %c0_107] : memref<8x1x128xf32, #tpu.memory_space<vmem>>, vector<1x1x128xf32>
    %125 = vector.shape_cast %124 : vector<1x1x128xf32> to vector<1x128xf32>
    %126 = vector.broadcast %125 : vector<1x128xf32> to vector<16x128xf32>
    %127 = arith.addf %123, %126 : vector<16x128xf32>
    %128 = arith.addf %109, %127 : vector<16x128xf32>
    %129 = tpu.concatenate %0, %128, %0 in 0 : vector<1x128xf32>, vector<16x128xf32>, vector<1x128xf32> -> vector<18x128xf32>
    %130 = vector.extract_strided_slice %129 {offsets = [0, 0], sizes = [16, 128], strides = [1, 1]} : vector<18x128xf32> to vector<16x128xf32>
    %c6 = arith.constant 6 : index
    %c0_108 = arith.constant 0 : index
    %c0_109 = arith.constant 0 : index
    %c0_110 = arith.constant 0 : index
    %131 = vector.load %arg2[%c6, %c0_108, %c0_109, %c0_110] : memref<8x3x128x128xf32, #tpu.memory_space<vmem>>, vector<1x1x128x128xf32>
    %132 = vector.shape_cast %131 : vector<1x1x128x128xf32> to vector<128x128xf32>
    %cst_111 = arith.constant dense<0.000000e+00> : vector<16x128xf32>
    %133 = tpu.matmul %130, %132, %cst_111 {dimension_numbers = #tpu.dot_dimension_numbers<[1], [0], [0], [1], [0, 0, 1, 1], [], []>} : vector<16x128xf32>, vector<128x128xf32>, vector<16x128xf32> -> vector<16x128xf32>
    %134 = vector.extract_strided_slice %129 {offsets = [1, 0], sizes = [16, 128], strides = [1, 1]} : vector<18x128xf32> to vector<16x128xf32>
    %c6_112 = arith.constant 6 : index
    %c1_113 = arith.constant 1 : index
    %c0_114 = arith.constant 0 : index
    %c0_115 = arith.constant 0 : index
    %135 = vector.load %arg2[%c6_112, %c1_113, %c0_114, %c0_115] : memref<8x3x128x128xf32, #tpu.memory_space<vmem>>, vector<1x1x128x128xf32>
    %136 = vector.shape_cast %135 : vector<1x1x128x128xf32> to vector<128x128xf32>
    %cst_116 = arith.constant dense<0.000000e+00> : vector<16x128xf32>
    %137 = tpu.matmul %134, %136, %cst_116 {dimension_numbers = #tpu.dot_dimension_numbers<[1], [0], [0], [1], [0, 0, 1, 1], [], []>} : vector<16x128xf32>, vector<128x128xf32>, vector<16x128xf32> -> vector<16x128xf32>
    %138 = arith.addf %133, %137 : vector<16x128xf32>
    %139 = vector.extract_strided_slice %129 {offsets = [2, 0], sizes = [16, 128], strides = [1, 1]} : vector<18x128xf32> to vector<16x128xf32>
    %c6_117 = arith.constant 6 : index
    %c2_118 = arith.constant 2 : index
    %c0_119 = arith.constant 0 : index
    %c0_120 = arith.constant 0 : index
    %140 = vector.load %arg2[%c6_117, %c2_118, %c0_119, %c0_120] : memref<8x3x128x128xf32, #tpu.memory_space<vmem>>, vector<1x1x128x128xf32>
    %141 = vector.shape_cast %140 : vector<1x1x128x128xf32> to vector<128x128xf32>
    %cst_121 = arith.constant dense<0.000000e+00> : vector<16x128xf32>
    %142 = tpu.matmul %139, %141, %cst_121 {dimension_numbers = #tpu.dot_dimension_numbers<[1], [0], [0], [1], [0, 0, 1, 1], [], []>} : vector<16x128xf32>, vector<128x128xf32>, vector<16x128xf32> -> vector<16x128xf32>
    %143 = arith.addf %138, %142 : vector<16x128xf32>
    %c6_122 = arith.constant 6 : index
    %c0_123 = arith.constant 0 : index
    %c0_124 = arith.constant 0 : index
    %144 = vector.load %arg4[%c6_122, %c0_123, %c0_124] : memref<8x1x128xf32, #tpu.memory_space<vmem>>, vector<1x1x128xf32>
    %145 = vector.shape_cast %144 : vector<1x1x128xf32> to vector<1x128xf32>
    %146 = vector.broadcast %145 : vector<1x128xf32> to vector<16x128xf32>
    %147 = arith.addf %143, %146 : vector<16x128xf32>
    %cst_125 = arith.constant 0.000000e+00 : f32
    %148 = vector.broadcast %cst_125 : f32 to vector<16x128xf32>
    %149 = arith.maximumf %147, %148 : vector<16x128xf32>
    %150 = tpu.concatenate %0, %149, %0 in 0 : vector<1x128xf32>, vector<16x128xf32>, vector<1x128xf32> -> vector<18x128xf32>
    %151 = vector.extract_strided_slice %129 {offsets = [1, 0], sizes = [16, 128], strides = [1, 1]} : vector<18x128xf32> to vector<16x128xf32>
    %152 = vector.extract_strided_slice %150 {offsets = [0, 0], sizes = [16, 128], strides = [1, 1]} : vector<18x128xf32> to vector<16x128xf32>
    %c7 = arith.constant 7 : index
    %c0_126 = arith.constant 0 : index
    %c0_127 = arith.constant 0 : index
    %c0_128 = arith.constant 0 : index
    %153 = vector.load %arg2[%c7, %c0_126, %c0_127, %c0_128] : memref<8x3x128x128xf32, #tpu.memory_space<vmem>>, vector<1x1x128x128xf32>
    %154 = vector.shape_cast %153 : vector<1x1x128x128xf32> to vector<128x128xf32>
    %cst_129 = arith.constant dense<0.000000e+00> : vector<16x128xf32>
    %155 = tpu.matmul %152, %154, %cst_129 {dimension_numbers = #tpu.dot_dimension_numbers<[1], [0], [0], [1], [0, 0, 1, 1], [], []>} : vector<16x128xf32>, vector<128x128xf32>, vector<16x128xf32> -> vector<16x128xf32>
    %156 = vector.extract_strided_slice %150 {offsets = [1, 0], sizes = [16, 128], strides = [1, 1]} : vector<18x128xf32> to vector<16x128xf32>
    %c7_130 = arith.constant 7 : index
    %c1_131 = arith.constant 1 : index
    %c0_132 = arith.constant 0 : index
    %c0_133 = arith.constant 0 : index
    %157 = vector.load %arg2[%c7_130, %c1_131, %c0_132, %c0_133] : memref<8x3x128x128xf32, #tpu.memory_space<vmem>>, vector<1x1x128x128xf32>
    %158 = vector.shape_cast %157 : vector<1x1x128x128xf32> to vector<128x128xf32>
    %cst_134 = arith.constant dense<0.000000e+00> : vector<16x128xf32>
    %159 = tpu.matmul %156, %158, %cst_134 {dimension_numbers = #tpu.dot_dimension_numbers<[1], [0], [0], [1], [0, 0, 1, 1], [], []>} : vector<16x128xf32>, vector<128x128xf32>, vector<16x128xf32> -> vector<16x128xf32>
    %160 = arith.addf %155, %159 : vector<16x128xf32>
    %161 = vector.extract_strided_slice %150 {offsets = [2, 0], sizes = [16, 128], strides = [1, 1]} : vector<18x128xf32> to vector<16x128xf32>
    %c7_135 = arith.constant 7 : index
    %c2_136 = arith.constant 2 : index
    %c0_137 = arith.constant 0 : index
    %c0_138 = arith.constant 0 : index
    %162 = vector.load %arg2[%c7_135, %c2_136, %c0_137, %c0_138] : memref<8x3x128x128xf32, #tpu.memory_space<vmem>>, vector<1x1x128x128xf32>
    %163 = vector.shape_cast %162 : vector<1x1x128x128xf32> to vector<128x128xf32>
    %cst_139 = arith.constant dense<0.000000e+00> : vector<16x128xf32>
    %164 = tpu.matmul %161, %163, %cst_139 {dimension_numbers = #tpu.dot_dimension_numbers<[1], [0], [0], [1], [0, 0, 1, 1], [], []>} : vector<16x128xf32>, vector<128x128xf32>, vector<16x128xf32> -> vector<16x128xf32>
    %165 = arith.addf %160, %164 : vector<16x128xf32>
    %c7_140 = arith.constant 7 : index
    %c0_141 = arith.constant 0 : index
    %c0_142 = arith.constant 0 : index
    %166 = vector.load %arg4[%c7_140, %c0_141, %c0_142] : memref<8x1x128xf32, #tpu.memory_space<vmem>>, vector<1x1x128xf32>
    %167 = vector.shape_cast %166 : vector<1x1x128xf32> to vector<1x128xf32>
    %168 = vector.broadcast %167 : vector<1x128xf32> to vector<16x128xf32>
    %169 = arith.addf %165, %168 : vector<16x128xf32>
    %170 = arith.addf %151, %169 : vector<16x128xf32>
    %171 = tpu.concatenate %0, %170, %0 in 0 : vector<1x128xf32>, vector<16x128xf32>, vector<1x128xf32> -> vector<18x128xf32>
    %172 = vector.extract_strided_slice %171 {offsets = [1, 0], sizes = [16, 128], strides = [1, 1]} : vector<18x128xf32> to vector<16x128xf32>
    %173 = arith.addf %172, %2 : vector<16x128xf32>
    %174 = tpu.concatenate %0, %173, %0 in 0 : vector<1x128xf32>, vector<16x128xf32>, vector<1x128xf32> -> vector<18x128xf32>
    %cst_143 = arith.constant 0.000000e+00 : f32
    %175 = vector.broadcast %cst_143 : f32 to vector<8x128xf32>
    %c0_144 = arith.constant 0 : index
    %c0_145 = arith.constant 0 : index
    %c0_146 = arith.constant 0 : index
    %176 = vector.load %arg6[%c0_144, %c0_145, %c0_146] : memref<3x8x18xf32, #tpu.memory_space<vmem>>, vector<1x8x18xf32>
    %177 = vector.shape_cast %176 : vector<1x8x18xf32> to vector<8x18xf32>
    %cst_147 = arith.constant dense<0.000000e+00> : vector<8x128xf32>
    %178 = tpu.matmul %177, %174, %cst_147 {dimension_numbers = #tpu.dot_dimension_numbers<[1], [0], [0], [1], [0, 0, 1, 1], [], []>} : vector<8x18xf32>, vector<18x128xf32>, vector<8x128xf32> -> vector<8x128xf32>
    %c0_148 = arith.constant 0 : index
    %c0_149 = arith.constant 0 : index
    %c0_150 = arith.constant 0 : index
    %179 = vector.load %arg3[%c0_148, %c0_149, %c0_150] : memref<3x128x128xf32, #tpu.memory_space<vmem>>, vector<1x128x128xf32>
    %180 = vector.shape_cast %179 : vector<1x128x128xf32> to vector<128x128xf32>
    %cst_151 = arith.constant dense<0.000000e+00> : vector<8x128xf32>
    %181 = tpu.matmul %178, %180, %cst_151 {dimension_numbers = #tpu.dot_dimension_numbers<[1], [0], [0], [1], [0, 0, 1, 1], [], []>} : vector<8x128xf32>, vector<128x128xf32>, vector<8x128xf32> -> vector<8x128xf32>
    %182 = arith.addf %175, %181 : vector<8x128xf32>
    %c1_152 = arith.constant 1 : index
    %c0_153 = arith.constant 0 : index
    %c0_154 = arith.constant 0 : index
    %183 = vector.load %arg6[%c1_152, %c0_153, %c0_154] : memref<3x8x18xf32, #tpu.memory_space<vmem>>, vector<1x8x18xf32>
    %184 = vector.shape_cast %183 : vector<1x8x18xf32> to vector<8x18xf32>
    %cst_155 = arith.constant dense<0.000000e+00> : vector<8x128xf32>
    %185 = tpu.matmul %184, %174, %cst_155 {dimension_numbers = #tpu.dot_dimension_numbers<[1], [0], [0], [1], [0, 0, 1, 1], [], []>} : vector<8x18xf32>, vector<18x128xf32>, vector<8x128xf32> -> vector<8x128xf32>
    %c1_156 = arith.constant 1 : index
    %c0_157 = arith.constant 0 : index
    %c0_158 = arith.constant 0 : index
    %186 = vector.load %arg3[%c1_156, %c0_157, %c0_158] : memref<3x128x128xf32, #tpu.memory_space<vmem>>, vector<1x128x128xf32>
    %187 = vector.shape_cast %186 : vector<1x128x128xf32> to vector<128x128xf32>
    %cst_159 = arith.constant dense<0.000000e+00> : vector<8x128xf32>
    %188 = tpu.matmul %185, %187, %cst_159 {dimension_numbers = #tpu.dot_dimension_numbers<[1], [0], [0], [1], [0, 0, 1, 1], [], []>} : vector<8x128xf32>, vector<128x128xf32>, vector<8x128xf32> -> vector<8x128xf32>
    %189 = arith.addf %182, %188 : vector<8x128xf32>
    %c2_160 = arith.constant 2 : index
    %c0_161 = arith.constant 0 : index
    %c0_162 = arith.constant 0 : index
    %190 = vector.load %arg6[%c2_160, %c0_161, %c0_162] : memref<3x8x18xf32, #tpu.memory_space<vmem>>, vector<1x8x18xf32>
    %191 = vector.shape_cast %190 : vector<1x8x18xf32> to vector<8x18xf32>
    %cst_163 = arith.constant dense<0.000000e+00> : vector<8x128xf32>
    %192 = tpu.matmul %191, %174, %cst_163 {dimension_numbers = #tpu.dot_dimension_numbers<[1], [0], [0], [1], [0, 0, 1, 1], [], []>} : vector<8x18xf32>, vector<18x128xf32>, vector<8x128xf32> -> vector<8x128xf32>
    %c2_164 = arith.constant 2 : index
    %c0_165 = arith.constant 0 : index
    %c0_166 = arith.constant 0 : index
    %193 = vector.load %arg3[%c2_164, %c0_165, %c0_166] : memref<3x128x128xf32, #tpu.memory_space<vmem>>, vector<1x128x128xf32>
    %194 = vector.shape_cast %193 : vector<1x128x128xf32> to vector<128x128xf32>
    %cst_167 = arith.constant dense<0.000000e+00> : vector<8x128xf32>
    %195 = tpu.matmul %192, %194, %cst_167 {dimension_numbers = #tpu.dot_dimension_numbers<[1], [0], [0], [1], [0, 0, 1, 1], [], []>} : vector<8x128xf32>, vector<128x128xf32>, vector<8x128xf32> -> vector<8x128xf32>
    %196 = arith.addf %189, %195 : vector<8x128xf32>
    %c0_168 = arith.constant 0 : index
    %c0_169 = arith.constant 0 : index
    %197 = vector.load %arg5[%c0_168, %c0_169] : memref<1x128xf32, #tpu.memory_space<vmem>>, vector<1x128xf32>
    %198 = vector.broadcast %197 : vector<1x128xf32> to vector<8x128xf32>
    %199 = arith.addf %196, %198 : vector<8x128xf32>
    %cst_170 = arith.constant 0.000000e+00 : f32
    %200 = vector.broadcast %cst_170 : f32 to vector<8x128xf32>
    %201 = arith.maximumf %199, %200 : vector<8x128xf32>
    %c0_171 = arith.constant 0 : index
    %c0_172 = arith.constant 0 : index
    %c0_173 = arith.constant 0 : index
    %202 = vector.load %arg7[%c0_171, %c0_172, %c0_173] : memref<1x8x128xf32, #tpu.memory_space<vmem>>, vector<1x8x128xf32>
    %203 = vector.shape_cast %202 : vector<1x8x128xf32> to vector<8x128xf32>
    %204 = vector.shape_cast %201 : vector<8x128xf32> to vector<1x8x128xf32>
    tpu.vector_store %arg7[%c0_171, %c0_172, %c0_173], %204 {strides = array<i32>} : memref<1x8x128xf32, #tpu.memory_space<vmem>>, vector<1x8x128xf32>,
    return
  }
  func.func @transform_0(%arg0: i32) -> (i32, i32, i32) {
    %c0_i32 = arith.constant 0 : i32
    %c0_i32_0 = arith.constant 0 : i32
    %c0_i32_1 = arith.constant 0 : i32
    return %arg0, %c0_i32, %c0_i32_0 : i32, i32, i32
  }
  func.func @transform_1(%arg0: i32) -> (i32, i32, i32, i32) {
    %c0_i32 = arith.constant 0 : i32
    %c0_i32_0 = arith.constant 0 : i32
    %c0_i32_1 = arith.constant 0 : i32
    %c0_i32_2 = arith.constant 0 : i32
    %c0_i32_3 = arith.constant 0 : i32
    return %c0_i32, %c0_i32_0, %c0_i32_1, %c0_i32_2 : i32, i32, i32, i32
  }
  func.func @transform_2(%arg0: i32) -> (i32, i32, i32) {
    %c0_i32 = arith.constant 0 : i32
    %c0_i32_0 = arith.constant 0 : i32
    %c0_i32_1 = arith.constant 0 : i32
    %c0_i32_2 = arith.constant 0 : i32
    return %c0_i32, %c0_i32_0, %c0_i32_1 : i32, i32, i32
  }
  func.func @transform_3(%arg0: i32) -> (i32, i32, i32) {
    %c0_i32 = arith.constant 0 : i32
    %c0_i32_0 = arith.constant 0 : i32
    %c0_i32_1 = arith.constant 0 : i32
    %c0_i32_2 = arith.constant 0 : i32
    return %c0_i32, %c0_i32_0, %c0_i32_1 : i32, i32, i32
  }
  func.func @transform_4(%arg0: i32) -> (i32, i32) {
    %c0_i32 = arith.constant 0 : i32
    %c0_i32_0 = arith.constant 0 : i32
    %c0_i32_1 = arith.constant 0 : i32
    return %c0_i32, %c0_i32_0 : i32, i32
  }
  func.func @transform_5(%arg0: i32) -> (i32, i32, i32) {
    %c0_i32 = arith.constant 0 : i32
    %c0_i32_0 = arith.constant 0 : i32
    %c0_i32_1 = arith.constant 0 : i32
    %c0_i32_2 = arith.constant 0 : i32
    return %c0_i32, %c0_i32_0, %c0_i32_1 : i32, i32, i32
  }
  func.func @transform_6(%arg0: i32) -> (i32, i32, i32) {
    %c0_i32 = arith.constant 0 : i32
    %c0_i32_0 = arith.constant 0 : i32
    %c0_i32_1 = arith.constant 0 : i32
    return %arg0, %c0_i32, %c0_i32_0 : i32, i32, i32
  }
}

</mosaic_0001>

<bundles_post_ra>
// kernel: downconv_forward.1
= control target key start
LH: loop header
LB: loop body
LE: loop exit
PB: predicated region body
PF: predicated region fallthrough
CT: control target
= control target key end

     0   :  { %11 = vsyncpa [#allocation3], 0  ;;  %s6501_s0 = inlined_call_operand.vmem [shape: f32[2,16,128], index: 0, kind: input, shape index: {}]   ;;  %s6502_s1 = inlined_call_operand.hbm [shape: f32[8,3,128,128], index: 1, kind: input, shape index: {}]   ;;  %s6503_s2 = inlined_call_operand.hbm [shape: f32[3,128,128], index: 2, kind: input, shape index: {}]   ;;  %s6504_s3 = inlined_call_operand.hbm [shape: f32[8,1,128], index: 3, kind: input, shape index: {}]   ;;  %s6505_s4 = inlined_call_operand.vmem [shape: f32[1,128], index: 4, kind: input, shape index: {}]   ;;  %s6506_s5 = inlined_call_operand.hbm [shape: f32[3,8,18], index: 5, kind: input, shape index: {}]   ;;  %s6507_s6 = inlined_call_operand.vmem [shape: f32[2,8,128], index: 6, kind: output, shape index: {}]  }
   0x1   :  { %12 = vsyncpa [#allocation5], 0 }
   0x2   :  { %13 = vsyncpa [#allocation8], 0  ;;  %s6099_s21 = smov 0  }
   0x3 LB: > { %s6105_s22 = sadd.s32 4294967295, %s6050_s21   ;;  %p3458_p0 = scmp.ge.s32.totalorder %s6050_s21, 1  ;;  %s6050_s21 = sphi %s6099_s21, %s19_s21  }
   0x4   : > { %p181_p1 = scmp.lt.s32.totalorder %s6050_s21, 3  ;;  %p6508_p2 = scmp.eq.s32.totalorder %s6105_s22, 0 }
   0x5   : > { %s6052_s24 = smov [#allocation4]   ;;  %s6053_s26 = smov [#allocation2]  }
   0x6   : > { %p6110_p3 = pnand %p3458_p0, %p181_p1  ;;  %s206_s25 = sshll.u32 %s6052_s24, 4  ;;  %s6114_s25 = int_to_ptr.vmem [resolvable:$true] %s206_s25 }
   0x7   : > { %s193_s27 = sshll.u32 %s6053_s26, 4  ;;  %s6054_s29 = smov [#allocation6]   ;;  %s6118_s27 = int_to_ptr.vmem [resolvable:$true] %s193_s27 }
   0x8   : > { %s6510_s23 = scalar_select %p6110_p3, 1, 0 }
   0x9   : > { %p5879_p4 = pneg %p6110_p3  ;;  %s219_s30 = sshll.u32 %s6054_s29, 4  ;;  %s6126_s30 = int_to_ptr.vmem [resolvable:$true] %s219_s30 }
   0xa   : > { %s5920_s9 = scalar_lea.hbm %s6503_s2, 6144 }
   0xb   : > { %p6122_p5 = pnand %p6508_p2, %p5879_p4  ;;  %p5921_p6 = scmp.ne.s32.totalorder %s6503_s2, %s5920_s9 }
   0xc   : > { %p5927_p10 = scmp.lt.u32.totalorder %s5920_s9, %s6503_s2 }
   0xd   : > { %p6136_p7 = pneg %p6122_p5 }
   0xf   : > { %p5923_p8 = pnand %p6136_p7, %p5921_p6 }
  0x11   : > { %p5924_p9 = pneg %p5923_p8 }
  0x13   : > { %p5929_p11 = pnand %p5927_p10, %p5924_p9 }
  0x15   : > { %5932 = shalt.err (!%p5929_p11)
}
  0x16   : > { %s5933_s15 = scalar_lea.vmem %s6114_s25, 6144  ;;  %p5941_p1 = scmp.lt.s32.totalorder %s6114_s25, %s6114_s25 }
  0x17   : > { %p5934_p12 = scmp.ne.s32.totalorder %s6114_s25, %s5933_s15  ;;  %p5942_p4 = scmp.lt.s32.totalorder %s5933_s15, %s5933_s15 }
  0x19   : > { %p5936_p13 = pnand %p5934_p12, %p6136_p7  ;;  %p5943_p6 = por %p5942_p4, %p5941_p1 }
  0x1b   : > { %p5937_p0 = pneg %p5936_p13 }
  0x1d   : > { %p5944_p8 = pnand %p5943_p6, %p5937_p0 }
  0x1f   : > { %5947 = shalt.err (!%p5944_p8)
}
  0x20   : > { %s6055_s16 = smov 128   ;;  %s6056_s17 = smov 8  }
  0x21   : > { %5885 = dma.hbm_to_vmem [thread:$0]  (!%p6122_p5), %s6503_s2, 6144, %s6114_s25, [#allocation5], %s6055_s16, %s6055_s16, %s6056_s17  }
  0x22   : > { %s5948_s26 = scalar_lea.hbm %s6502_s1, 49152 }
  0x23   : > { %p5949_p9 = scmp.ne.s32.totalorder %s6502_s1, %s5948_s26  ;;  %p5955_p12 = scmp.lt.u32.totalorder %s5948_s26, %s6502_s1 }
  0x25   : > { %p5951_p10 = pnand %p5949_p9, %p6136_p7 }
  0x27   : > { %p5952_p11 = pneg %p5951_p10 }
  0x29   : > { %p5957_p13 = pnand %p5955_p12, %p5952_p11 }
  0x2b   : > { %5960 = shalt.err (!%p5957_p13)
}
  0x2c   : > { %s5961_s25 = scalar_lea.vmem %s6118_s27, 49152  ;;  %p5969_p6 = scmp.lt.s32.totalorder %s6118_s27, %s6118_s27 }
  0x2d   : > { %p5962_p0 = scmp.ne.s32.totalorder %s6118_s27, %s5961_s25  ;;  %p5970_p8 = scmp.lt.s32.totalorder %s5961_s25, %s5961_s25 }
  0x2f   : > { %p5964_p1 = pnand %p5962_p0, %p6136_p7  ;;  %p5971_p9 = por %p5970_p8, %p5969_p6 }
  0x31   : > { %p5965_p4 = pneg %p5964_p1 }
  0x33   : > { %p5972_p10 = pnand %p5971_p9, %p5965_p4 }
  0x35   : > { %5975 = shalt.err (!%p5972_p10)
}
  0x36   : > { %5882 = dma.hbm_to_vmem [thread:$0]  (!%p6122_p5), %s6502_s1, 49152, %s6118_s27, [#allocation3], %s6055_s16, %s6055_s16, %s6056_s17  }
  0x37   : > { %s5976_s15 = scalar_lea.hbm %s6504_s3, 128 }
  0x38   : > { %p5977_p11 = scmp.ne.s32.totalorder %s6504_s3, %s5976_s15  ;;  %p5983_p0 = scmp.lt.u32.totalorder %s5976_s15, %s6504_s3 }
  0x3a   : > { %p5979_p12 = pnand %p5977_p11, %p6136_p7 }
  0x3c   : > { %p5980_p13 = pneg %p5979_p12 }
  0x3e   : > { %p5985_p1 = pnand %p5983_p0, %p5980_p13 }
  0x40   : > { %5988 = shalt.err (!%p5985_p1)
}
  0x41   : > { %s5989_s27 = scalar_lea.vmem %s6126_s30, 128  ;;  %p5997_p9 = scmp.lt.s32.totalorder %s6126_s30, %s6126_s30 }
  0x42   : > { %p5990_p4 = scmp.ne.s32.totalorder %s6126_s30, %s5989_s27  ;;  %p5998_p10 = scmp.lt.s32.totalorder %s5989_s27, %s5989_s27 }
  0x44   : > { %p5992_p6 = pnand %p5990_p4, %p6136_p7  ;;  %p5999_p11 = por %p5998_p10, %p5997_p9 }
  0x46   : > { %p5993_p8 = pneg %p5992_p6 }
  0x48   : > { %p6000_p12 = pnand %p5999_p11, %p5993_p8 }
  0x4a   : > { %6003 = shalt.err (!%p6000_p12)
}
  0x4b   : > { %s6057_s26 = smov 16   ;;  %s6058_s29 = smov 1  }
  0x4c   : > { %5888 = dma.hbm_to_vmem [thread:$0]  (!%p6122_p5), %s6504_s3, 128, %s6126_s30, [#allocation5], %s6057_s26, %s6057_s26, %s6058_s29  }
  0x4d   : > { %s6059_s9 = smov [#allocation7]   ;;  %s6004_s13 = scalar_lea.hbm %s6506_s5, 384 }
  0x4e   : > { %s235_s25 = sshll.u32 %s6059_s9, 4  ;;  %p6005_p13 = scmp.ne.s32.totalorder %s6506_s5, %s6004_s13  ;;  %s236_s25 = int_to_ptr.vmem [resolvable:$true] %s235_s25 }
  0x4f   : > { %p6011_p4 = scmp.lt.u32.totalorder %s6004_s13, %s6506_s5 }
  0x50   : > { %p6007_p0 = pnand %p6005_p13, %p6136_p7 }
  0x52   : > { %p6008_p1 = pneg %p6007_p0 }
  0x54   : > { %p6013_p6 = pnand %p6011_p4, %p6008_p1 }
  0x56   : > { %6016 = shalt.err (!%p6013_p6)
}
  0x57   : > { %s6017_s30 = scalar_lea.vmem %s236_s25, 384  ;;  %p6025_p11 = scmp.lt.s32.totalorder %s236_s25, %s236_s25 }
  0x58   : > { %p6018_p8 = scmp.ne.s32.totalorder %s236_s25, %s6017_s30  ;;  %p6026_p12 = scmp.lt.s32.totalorder %s6017_s30, %s6017_s30 }
  0x5a   : > { %p6020_p9 = pnand %p6018_p8, %p6136_p7  ;;  %p6027_p2 = por %p6026_p12, %p6025_p11 }
  0x5c   : > { %p6021_p10 = pneg %p6020_p9 }
  0x5e   : > { %p6028_p3 = pnand %p6027_p2, %p6021_p10 }
  0x60   : > { %6031 = shalt.err (!%p6028_p3)
}
  0x61   : > { %5891 = dma.hbm_to_vmem [thread:$0]  (!%p6122_p5), %s6506_s5, 384, %s236_s25, [#allocation8], %s6055_s16, %s6055_s16, %s6056_s17  }
  0x62   : > { %p6513_p13 = scmp.ne.s32.totalorder %s6510_s23, 0 }
  0x63   : > { %p6514_p7 = scmp.eq.s32.totalorder (!%p6513_p13), %s6105_s22, 0 }
  0x64   : > { %259 = sbr.rel (%p6513_p13) target bundleno = 3114 (0xc2a), region = 44 }
  0x6b   : > { %6037 = dma.done.wait (%p6514_p7), [#allocation3], 49152   ;;  %p6515_p0 = pmov %p6514_p7 }
  0x6d   : > { %6039 = vsyncadd (%p6515_p0), [#allocation3], 4294918144  ;;  %p6516_p2 = pmov %p6515_p0 }
  0x6e   : > { %p6517_p3 = pmov %p6515_p0 }
  0x6f   : > { %6041 = dma.done.wait (%p6516_p2), [#allocation5], 6272  }
  0x70   : > { %6043 = vsyncadd (%p6517_p3), [#allocation5], 4294961024  ;;  %p6518_p1 = pmov %p6515_p0 }
  0x71   : > { %p6519_p5 = pmov %p6515_p0 }
  0x72   : > { %6045 = dma.done.wait (%p6518_p1), [#allocation8], 384  }
  0x73   : > { %6047 = vsyncadd (%p6519_p5), [#allocation8], 4294966912  ;;  %p300_p4 = scmp.lt.s32.totalorder %s6105_s22, 1  ;;  %v339_v0 = vld [vmem:[#allocation2 + $0x80] sm:$0xff]  ;;  %v340_v1 = vld [vmem:[#allocation2 + $0x88] sm:$0xff]  ;;  %vm313_vm0 = vcmask 1040384  }
  0x74   : > { %v341_v2 = vld [vmem:[#allocation2 + $0x90] sm:$0xff]  ;;  %v4979_v3 = vpack.c.bf16 %v340_v1, %v339_v0  ;;  %v342_v4 = vld [vmem:[#allocation2 + $0x98] sm:$0xff]  ;;  %v343_v6 = vld [vmem:[#allocation2 + $0xa0] sm:$0xff]  ;;  %vm357_vm1 = vcmask 1046528   ;;  %vm532_vm3 = vcmask 1045504   ;;  %vm6061_vm4 = vmmov 0  }
  0x75   : > { %s6525_s22 = smov (!%p300_p4, %s6105_s22), 1  ;;  %v4983_v5 = vpack.c.bf16 %v342_v4, %v341_v2  ;;  %v344_v7 = vld [vmem:[#allocation2 + $0xa8] sm:$0xff]  ;;  %v345_v11 = vld [vmem:[#allocation2 + $0xb0] sm:$0xff]  ;;  %v346_v12 = vld [vmem:[#allocation2 + $0xb8] sm:$0xff]  ;;  %vm6063_vm5 = vmmov 1   ;;  %vm2867_vm7 = vcmask 1041408  }
  0x76   : > { %s3511_s23 = sshll.u32 %s6525_s22, 4  ;;  %4980 = vmatprep.subr.bf16.mxu0 %v4979_v3  ;;  %v4987_v8 = vpack.c.bf16 %v344_v7, %v343_v6  ;;  %v4991_v17 = vpack.c.bf16 %v346_v12, %v345_v11  ;;  %v347_v20 = vld [vmem:[#allocation2 + $0xc0] sm:$0xff]  ;;  %v348_v21 = vld [vmem:[#allocation2 + $0xc8] sm:$0xff]  ;;  %v349_v24 = vld [vmem:[#allocation2 + $0xd0] sm:$0xff]  ;;  %vm2863_vm8 = vcmask 146432   ;;  %s3471_s26 = sshll.u32 %s6525_s22, 3 }
  0x77   : > { %s304_s16 = scalar_lea.vmem %s6501_s0, %s3511_s23  ;;  %4982 = vmatpush3.bf16.msra.mxu0 %v4979_v3  ;;  %v4995_v23 = vpack.c.bf16 %v348_v21, %v347_v20  ;;  %v350_v25 = vld [vmem:[#allocation2 + $0xd8] sm:$0xff]  ;;  %v656_v26 = vld [vmem:[#allocation2 + $0x200] sm:$0xff]  ;;  %v657_v28 = vld [vmem:[#allocation2 + $0x208] sm:$0xff]  ;;  %s308_s8 = scalar_lea.vmem %s6507_s6, %s3471_s26 }
  0x78   : > { %4984 = vmatprep.subr.bf16.mxu0 %v4983_v5  ;;  %v309_v9 = vld [vmem:[%s304_s16] sm:$0xff]  ;;  %v310_v10 = vld [vmem:[%s304_s16 + $0x8] sm:$0xff]  ;;  %v4999_v27 = vpack.c.bf16 %v350_v25, %v349_v24  ;;  %v658_v29 = vld [vmem:[#allocation2 + $0x210] sm:$0xff]  ;;  %v5075_v33 = vpack.c.bf16 %v657_v28, %v656_v26 }
  0x79   : > { %v6252_v13 = vrot.slane %v309_v9, 7  ;;  %v6254_v14 = vrot.slane %v310_v10, 7  ;;  %v659_v30 = vld [vmem:[#allocation2 + $0x218] sm:$0xff]  ;;  %v351_v31 = vld [vmem:[#allocation2 + $0xe0] sm:$0xff]  ;;  %v352_v32 = vld [vmem:[#allocation2 + $0xe8] sm:$0xff] }
  0x7a   : > { %v5079_v34 = vpack.c.bf16 %v659_v30, %v658_v29  ;;  %v660_v35 = vld [vmem:[#allocation2 + $0x220] sm:$0xff]  ;;  %v661_v36 = vld [vmem:[#allocation2 + $0x228] sm:$0xff]  ;;  %5076 = vmatprep.subr.bf16.mxu1 %v5075_v33  ;;  %v5003_v37 = vpack.c.bf16 %v352_v32, %v351_v31  ;;  %v353_v38 = vld [vmem:[#allocation2 + $0xf0] sm:$0xff] }
  0x7b   : > { %4986 = vmatpush3.bf16.msra.mxu0 %v4983_v5  ;;  %v6259_v15 = vsel %vm313_vm0, %v6252_v13, %v6254_v14  ;;  %v6263_v16 = vsel %vm313_vm0, 0.0, %v6252_v13  ;;  %5078 = vmatpush3.bf16.msra.mxu1 %v5075_v33  ;;  %v354_v39 = vld [vmem:[#allocation2 + $0xf8] sm:$0xff]  ;;  %v5083_v40 = vpack.c.bf16 %v661_v36, %v660_v35  ;;  %v662_v41 = vld [vmem:[#allocation2 + $0x230] sm:$0xff]  ;;  %v6270_v44 = vsel %vm313_vm0, %v6254_v14, 0.0  ;;  %v322_v45 = vld [vmem:[#allocation2] sm:$0xff] }
  0x7c   : > { %4988 = vmatprep.subr.bf16.mxu0 %v4987_v8  ;;  %v358_v18 = vrot.slane %v6263_v16, 1  ;;  %v359_v19 = vrot.slane %v6259_v15, 1  ;;  %5080 = vmatprep.subr.bf16.mxu1 %v5079_v34  ;;  %v663_v42 = vld [vmem:[#allocation2 + $0x238] sm:$0xff]  ;;  %v5007_v43 = vpack.c.bf16 %v354_v39, %v353_v38  ;;  %v323_v46 = vld [vmem:[#allocation2 + $0x8] sm:$0xff]  ;;  %v664_v48 = vld [vmem:[#allocation2 + $0x240] sm:$0xff]  ;;  %v361_v50 = vrot.slane %v6270_v44, 1 }
  0x7d   : > { %v5087_v47 = vpack.c.bf16 %v663_v42, %v662_v41  ;;  %v665_v49 = vld [vmem:[#allocation2 + $0x248] sm:$0xff]  ;;  %v5011_v51 = vpack.c.bf16 %v323_v46, %v322_v45  ;;  %v324_v52 = vld [vmem:[#allocation2 + $0x10] sm:$0xff]  ;;  %v325_v53 = vld [vmem:[#allocation2 + $0x18] sm:$0xff]  ;;  %v534_v20 = vrot.slane %v6259_v15, 2 }
  0x7e   : > { %v360_v22 = vsel %vm357_vm1, %v358_v18, %v359_v19  ;;  %v5091_v54 = vpack.c.bf16 %v665_v49, %v664_v48  ;;  %v362_v55 = vsel %vm357_vm1, %v359_v19, %v361_v50  ;;  %v5015_v56 = vpack.c.bf16 %v325_v53, %v324_v52  ;;  %vm6275_vm2 = vmneg %vm313_vm0  ;;  %v326_v58 = vld [vmem:[#allocation2 + $0x20] sm:$0xff]  ;;  %v327_v59 = vld [vmem:[#allocation2 + $0x28] sm:$0xff] }
  0x7f   : > { %4990 = vmatpush3.bf16.msra.mxu0 %v4987_v8  ;;  %4039 = vmatprep.mubr.f32.mxu0 %v360_v22  ;;  %v5019_v60 = vpack.c.bf16 %v327_v59, %v326_v58  ;;  %v328_v61 = vld [vmem:[#allocation2 + $0x30] sm:$0xff]  ;;  %v329_v62 = vld [vmem:[#allocation2 + $0x38] sm:$0xff]  ;;  %v330_v0 = vld [vmem:[#allocation2 + $0x40] sm:$0xff]  ;;  %v533_v19 = vrot.slane %v6263_v16, 2 }
  0x80   : > { %4992 = vmatprep.subr.bf16.mxu0 %v4991_v17  ;;  %5082 = vmatpush3.bf16.msra.mxu1 %v5079_v34  ;;  %v5023_v63 = vpack.c.bf16 %v329_v62, %v328_v61  ;;  %v331_v1 = vld [vmem:[#allocation2 + $0x48] sm:$0xff]  ;;  %v332_v3 = vld [vmem:[#allocation2 + $0x50] sm:$0xff]  ;;  %v333_v4 = vld [vmem:[#allocation2 + $0x58] sm:$0xff] }
  0x81   : > { %5084 = vmatprep.subr.bf16.mxu1 %v5083_v40  ;;  %v5027_v2 = vpack.c.bf16 %v331_v1, %v330_v0  ;;  %v5031_v5 = vpack.c.bf16 %v333_v4, %v332_v3  ;;  %v334_v6 = vld [vmem:[#allocation2 + $0x60] sm:$0xff]  ;;  %v335_v7 = vld [vmem:[#allocation2 + $0x68] sm:$0xff]  ;;  %v336_v9 = vld [vmem:[#allocation2 + $0x70] sm:$0xff]  ;;  %v535_v24 = vsel %vm532_vm3, %v533_v19, %v534_v20 }
  0x82   : > { %v5035_v8 = vpack.c.bf16 %v335_v7, %v334_v6  ;;  %v337_v10 = vld [vmem:[#allocation2 + $0x78] sm:$0xff]  ;;  %v516_v12 = vld [vmem:[#allocation2 + $0x100] sm:$0xff]  ;;  %v518_v21 = vld [vmem:[#allocation2 + $0x110] sm:$0xff] }
  0x83   : > { %4994 = vmatpush3.bf16.msra.mxu0 %v4991_v17  ;;  %v5039_v11 = vpack.c.bf16 %v337_v10, %v336_v9  ;;  %v517_v17 = vld [vmem:[#allocation2 + $0x108] sm:$0xff]  ;;  %v519_v22 = vld [vmem:[#allocation2 + $0x118] sm:$0xff]  ;;  %v520_v25 = vld [vmem:[#allocation2 + $0x120] sm:$0xff] }
  0x84   : > { %4996 = vmatprep.subr.bf16.mxu0 %v4995_v23  ;;  %5086 = vmatpush3.bf16.msra.mxu1 %v5083_v40  ;;  %v5043_v18 = vpack.c.bf16 %v517_v17, %v516_v12  ;;  %v521_v26 = vld [vmem:[#allocation2 + $0x128] sm:$0xff]  ;;  %v522_v28 = vld [vmem:[#allocation2 + $0x130] sm:$0xff]  ;;  %v523_v29 = vld [vmem:[#allocation2 + $0x138] sm:$0xff] }
  0x85   : > { %5088 = vmatprep.subr.bf16.mxu1 %v5087_v47  ;;  %v5055_v30 = vpack.c.bf16 %v523_v29, %v522_v28  ;;  %v524_v31 = vld [vmem:[#allocation2 + $0x140] sm:$0xff]  ;;  %v525_v32 = vld [vmem:[#allocation2 + $0x148] sm:$0xff]  ;;  %v526_v34 = vld [vmem:[#allocation2 + $0x150] sm:$0xff] }
  0x86   : > { %v5059_v33 = vpack.c.bf16 %v525_v32, %v524_v31  ;;  %v527_v35 = vld [vmem:[#allocation2 + $0x158] sm:$0xff]  ;;  %v529_v38 = vld [vmem:[#allocation2 + $0x168] sm:$0xff]  ;;  %v530_v40 = vld [vmem:[#allocation2 + $0x170] sm:$0xff] }
  0x87   : > { %4998 = vmatpush3.bf16.msra.mxu0 %v4995_v23  ;;  %v5047_v23 = vpack.c.bf16 %v519_v22, %v518_v21  ;;  %v5063_v36 = vpack.c.bf16 %v527_v35, %v526_v34  ;;  %v531_v41 = vld [vmem:[#allocation2 + $0x178] sm:$0xff]  ;;  %v666_v46 = vld [vmem:[#allocation2 + $0x250] sm:$0xff]  ;;  %v668_v49 = vld [vmem:[#allocation2 + $0x260] sm:$0xff] }
  0x88   : > { %5000 = vmatprep.subr.bf16.mxu0 %v4999_v27  ;;  %5090 = vmatpush3.bf16.msra.mxu1 %v5087_v47  ;;  %v5071_v42 = vpack.c.bf16 %v531_v41, %v530_v40  ;;  %v667_v47 = vld [vmem:[#allocation2 + $0x258] sm:$0xff]  ;;  %v669_v50 = vld [vmem:[#allocation2 + $0x268] sm:$0xff]  ;;  %v670_v52 = vld [vmem:[#allocation2 + $0x270] sm:$0xff] }
  0x89   : > { %5092 = vmatprep.subr.bf16.mxu1 %v5091_v54  ;;  %v5095_v48 = vpack.c.bf16 %v667_v47, %v666_v46  ;;  %v671_v53 = vld [vmem:[#allocation2 + $0x278] sm:$0xff]  ;;  %v973_v59 = vld [vmem:[#allocation2 + $0x380] sm:$0xff]  ;;  %v975_v61 = vld [vmem:[#allocation2 + $0x390] sm:$0xff] }
  0x8a   : > { %v977_v1 = vld [vmem:[#allocation2 + $0x3a0] sm:$0xff]  ;;  %v979_v4 = vld [vmem:[#allocation2 + $0x3b0] sm:$0xff]  ;;  %v644_v40 = vld [vmem:[#allocation2 + $0x1a8] sm:$0xff] }
  0x8b   : > { %5002 = vmatpush3.bf16.msra.mxu0 %v4999_v27  ;;  %v5051_v27 = vpack.c.bf16 %v521_v26, %v520_v25  ;;  %v981_v7 = vld [vmem:[#allocation2 + $0x3c0] sm:$0xff]  ;;  %v642_v25 = vld [vmem:[#allocation2 + $0x198] sm:$0xff]  ;;  %v648_v47 = vld [vmem:[#allocation2 + $0x1c8] sm:$0xff] }
  0x8c   : > { %5004 = vmatprep.subr.bf16.mxu0 %v5003_v37  ;;  %5094 = vmatpush3.bf16.msra.mxu1 %v5091_v54  ;;  %v5103_v54 = vpack.c.bf16 %v671_v53, %v670_v52  ;;  %v3474_v10 = vld [vmem:[#allocation6] ss:$0 sm:$0xff]  ;;  %v652_v53 = vld [vmem:[#allocation2 + $0x1e8] sm:$0xff]  ;;  %vm6435_vm6 = vmpackc.low %vm6063_vm5, %vm6275_vm2 }
  0x8d   : > { %5096 = vmatprep.subr.bf16.mxu1 %v5095_v48  ;;  %v647_v46 = vld [vmem:[#allocation2 + $0x1c0] sm:$0xff]  ;;  %v3034_v57 = vld [vmem:[#allocation4 + $0x88] sm:$0xff] }
  0x8e   : > { %v651_v52 = vld [vmem:[#allocation2 + $0x1e0] sm:$0xff] }
  0x8f   : > { %5006 = vmatpush3.bf16.msra.mxu0 %v5003_v37  ;;  %v528_v37 = vld [vmem:[#allocation2 + $0x160] sm:$0xff] }
  0x90   : > { %5008 = vmatprep.subr.bf16.mxu0 %v5007_v43  ;;  %v5067_v39 = vpack.c.bf16 %v529_v38, %v528_v37  ;;  %5098 = vmatpush3.bf16.msra.mxu1 %v5095_v48  ;;  %v5123_v48 = vpack.c.bf16 %v648_v47, %v647_v46  ;;  %v1297_v46 = vld [vmem:[#allocation2 + $0x538] sm:$0xff] }
  0x93   : > { %5010 = vmatpush3.bf16.msra.mxu0 %v5007_v43  ;;  %v536_v43 = vrot.slane %v6270_v44, 2 }
  0x94   : > { %5012 = vmatprep.subr.bf16.mxu0 %v5011_v51 }
  0x95   : > { %v537_v45 = vsel %vm532_vm3, %v534_v20, %v536_v43  ;;  %v646_v43 = vld [vmem:[#allocation2 + $0x1b8] sm:$0xff] }
  0x96   : > { %4040 = vmatmul.mubr.f32.vlgmr.msra.gmra.mrb[0].mxu0 %v362_v55  ;;  %v639_v55 = vld [vmem:[#allocation2 + $0x180] sm:$0xff] }
  0x97   : > { %5014 = vmatpush3.bf16.msra.mxu0 %v5011_v51  ;;  %4074 = vmatprep.mubr.msk.f32.mxu0 %vm6275_vm2, %v6252_v13  ;;  %v5099_v51 = vpack.c.bf16 %v669_v50, %v668_v49  ;;  %v649_v49 = vld [vmem:[#allocation2 + $0x1d0] sm:$0xff]  ;;  %v650_v50 = vld [vmem:[#allocation2 + $0x1d8] sm:$0xff] }
  0x98   : > { %5016 = vmatprep.subr.bf16.mxu0 %v5015_v56 }
  0x99   : > { %5100 = vmatprep.subr.bf16.mxu1 %v5099_v51 }
  0x9a   : > { %5102 = vmatpush3.bf16.msra.mxu1 %v5099_v51  ;;  %v5127_v51 = vpack.c.bf16 %v650_v50, %v649_v49  ;;  %v1299_v49 = vld [vmem:[#allocation2 + $0x548] sm:$0xff] }
  0x9b   : > { %5018 = vmatpush3.bf16.msra.mxu0 %v5015_v56  ;;  %5104 = vmatprep.subr.bf16.mxu1 %v5103_v54  ;;  %v640_v56 = vld [vmem:[#allocation2 + $0x188] sm:$0xff] }
  0x9c   : > { %5020 = vmatprep.subr.bf16.mxu0 %v5019_v60  ;;  %v5107_v58 = vpack.c.bf16 %v640_v56, %v639_v55  ;;  %v653_v55 = vld [vmem:[#allocation2 + $0x1f0] sm:$0xff]  ;;  %v654_v56 = vld [vmem:[#allocation2 + $0x1f8] sm:$0xff] }
  0x9e   : > { %5106 = vmatpush3.bf16.msra.mxu1 %v5103_v54  ;;  %v5131_v54 = vpack.c.bf16 %v652_v53, %v651_v52 }
  0x9f   : > { %5022 = vmatpush3.bf16.msra.mxu0 %v5019_v60  ;;  %5108 = vmatprep.subr.bf16.mxu1 %v5107_v58  ;;  %v974_v60 = vld [vmem:[#allocation2 + $0x388] sm:$0xff] }
  0xa0   : > { %5024 = vmatprep.subr.bf16.mxu0 %v5023_v63  ;;  %v5171_v62 = vpack.c.bf16 %v974_v60, %v973_v59  ;;  %v832_v59 = vld [vmem:[#allocation2 + $0x280] sm:$0xff]  ;;  %v833_v60 = vld [vmem:[#allocation2 + $0x288] sm:$0xff] }
  0xa3   : > { %5026 = vmatpush3.bf16.msra.mxu0 %v5023_v63  ;;  %v976_v63 = vld [vmem:[#allocation2 + $0x398] sm:$0xff] }
  0xa4   : > { %5028 = vmatprep.subr.bf16.mxu0 %v5027_v2  ;;  %v5175_v0 = vpack.c.bf16 %v976_v63, %v975_v61  ;;  %v5139_v61 = vpack.c.bf16 %v833_v60, %v832_v59  ;;  %v835_v63 = vld [vmem:[#allocation2 + $0x298] sm:$0xff] }
  0xa7   : > { %5030 = vmatpush3.bf16.msra.mxu0 %v5027_v2  ;;  %v978_v2 = vld [vmem:[#allocation2 + $0x3a8] sm:$0xff] }
  0xa8   : > { %5032 = vmatprep.subr.bf16.mxu0 %v5031_v5  ;;  %v5179_v3 = vpack.c.bf16 %v978_v2, %v977_v1  ;;  %v836_v1 = vld [vmem:[#allocation2 + $0x2a0] sm:$0xff]  ;;  %v837_v2 = vld [vmem:[#allocation2 + $0x2a8] sm:$0xff] }
  0xab   : > { %5034 = vmatpush3.bf16.msra.mxu0 %v5031_v5  ;;  %v980_v5 = vld [vmem:[#allocation2 + $0x3b8] sm:$0xff] }
  0xac   : > { %5036 = vmatprep.subr.bf16.mxu0 %v5035_v8  ;;  %v5183_v6 = vpack.c.bf16 %v980_v5, %v979_v4  ;;  %v838_v4 = vld [vmem:[#allocation2 + $0x2b0] sm:$0xff]  ;;  %v839_v5 = vld [vmem:[#allocation2 + $0x2b8] sm:$0xff] }
  0xaf   : > { %5038 = vmatpush3.bf16.msra.mxu0 %v5035_v8  ;;  %v982_v8 = vld [vmem:[#allocation2 + $0x3c8] sm:$0xff] }
  0xb0   : > { %5040 = vmatprep.subr.bf16.mxu0 %v5039_v11  ;;  %v5187_v9 = vpack.c.bf16 %v982_v8, %v981_v7  ;;  %v840_v7 = vld [vmem:[#allocation2 + $0x2c0] sm:$0xff]  ;;  %v841_v8 = vld [vmem:[#allocation2 + $0x2c8] sm:$0xff] }
  0xb3   : > { %5042 = vmatpush3.bf16.msra.mxu0 %v5039_v11 }
  0xb4   : > { %5044 = vmatprep.subr.bf16.mxu0 %v5043_v18 }
  0xb6   : > { %4075 = vmatmul.mubr.f32.vlgmr.msra.gmra.mrb[0].mxu0 %v6259_v15 }
  0xb7   : > { %5046 = vmatpush3.bf16.msra.mxu0 %v5043_v18  ;;  %4109 = vmatprep.mubr.f32.mxu0 %v535_v24  ;;  %v641_v24 = vld [vmem:[#allocation2 + $0x190] sm:$0xff] }
  0xb8   : > { %5048 = vmatprep.subr.bf16.mxu0 %v5047_v23  ;;  %v5111_v34 = vpack.c.bf16 %v642_v25, %v641_v24  ;;  %v984_v24 = vld [vmem:[#allocation2 + $0x3d8] sm:$0xff] }
  0xbb   : > { %5050 = vmatpush3.bf16.msra.mxu0 %v5047_v23 }
  0xbc   : > { %5052 = vmatprep.subr.bf16.mxu0 %v5051_v27 }
  0xbf   : > { %5054 = vmatpush3.bf16.msra.mxu0 %v5051_v27 }
  0xc0   : > { %5056 = vmatprep.subr.bf16.mxu0 %v5055_v30 }
  0xc3   : > { %5058 = vmatpush3.bf16.msra.mxu0 %v5055_v30 }
  0xc4   : > { %5060 = vmatprep.subr.bf16.mxu0 %v5059_v33 }
  0xc7   : > { %5062 = vmatpush3.bf16.msra.mxu0 %v5059_v33 }
  0xc8   : > { %5064 = vmatprep.subr.bf16.mxu0 %v5063_v36 }
  0xcb   : > { %5066 = vmatpush3.bf16.msra.mxu0 %v5063_v36 }
  0xcc   : > { %5068 = vmatprep.subr.bf16.mxu0 %v5067_v39 }
  0xcf   : > { %5070 = vmatpush3.bf16.msra.mxu0 %v5067_v39  ;;  %v643_v39 = vld [vmem:[#allocation2 + $0x1a0] sm:$0xff] }
  0xd0   : > { %5072 = vmatprep.subr.bf16.mxu0 %v5071_v42  ;;  %v5115_v41 = vpack.c.bf16 %v644_v40, %v643_v39  ;;  %v1293_v39 = vld [vmem:[#allocation2 + $0x518] sm:$0xff] }
  0xd3   : > { %5074 = vmatpush3.bf16.msra.mxu0 %v5071_v42  ;;  %v645_v42 = vld [vmem:[#allocation2 + $0x1b0] sm:$0xff] }
  0xd4   : > { %5172 = vmatprep.subr.bf16.mxu0 %v5171_v62 }
  0xd6   : > { %4110 = vmatmul.mubr.f32.vlgmr.msra.gmra.mrb[0].mxu0 %v537_v45  ;;  %v5119_v45 = vpack.c.bf16 %v646_v43, %v645_v42  ;;  %v1295_v42 = vld [vmem:[#allocation2 + $0x528] sm:$0xff] }
  0xd7   : > { %5174 = vmatpush3.bf16.msra.mxu0 %v5171_v62  ;;  %v834_v62 = vld [vmem:[#allocation2 + $0x290] sm:$0xff] }
  0xd8   : > { %5176 = vmatprep.subr.bf16.mxu0 %v5175_v0 }
  0xdb   : > { %5178 = vmatpush3.bf16.msra.mxu0 %v5175_v0  ;;  %v5143_v0 = vpack.c.bf16 %v835_v63, %v834_v62 }
  0xdc   : > { %5180 = vmatprep.subr.bf16.mxu0 %v5179_v3 }
  0xdf   : > { %5182 = vmatpush3.bf16.msra.mxu0 %v5179_v3  ;;  %v5147_v3 = vpack.c.bf16 %v837_v2, %v836_v1  ;;  %v958_v2 = vld [vmem:[#allocation2 + $0x310] sm:$0xff] }
  0xe0   : > { %5184 = vmatprep.subr.bf16.mxu0 %v5183_v6 }
  0xe3   : > { %5186 = vmatpush3.bf16.msra.mxu0 %v5183_v6  ;;  %v5151_v6 = vpack.c.bf16 %v839_v5, %v838_v4 }
  0xe4   : > { %5188 = vmatprep.subr.bf16.mxu0 %v5187_v9 }
  0xe7   : > { %5190 = vmatpush3.bf16.msra.mxu0 %v5187_v9  ;;  %v5155_v9 = vpack.c.bf16 %v841_v8, %v840_v7  ;;  %v960_v7 = vld [vmem:[#allocation2 + $0x320] sm:$0xff]  ;;  %v961_v8 = vld [vmem:[#allocation2 + $0x328] sm:$0xff] }
 0x1a9   : > { %v4111_v11 = vpop.f32.mrb[0].mxu0 }
 0x1aa   : > { %v625_v12 = vadd.f32 %v4111_v11, %v3474_v10  ;;  %v606_v17 = vpop.f32.mrb[1].mxu0  ;;  %v843_v11 = vld [vmem:[#allocation2 + $0x2d8] sm:$0xff] }
 0x1ab   : > { %v624_v18 = vadd.f32 %v3474_v10, %v606_v17  ;;  %v842_v10 = vld [vmem:[#allocation2 + $0x2d0] sm:$0xff]  ;;  %v844_v17 = vld [vmem:[#allocation2 + $0x2e0] sm:$0xff] }
 0x1ac   : > { %v627_v19 = vmax.f32 %v625_v12, 0.0  ;;  %v5159_v12 = vpack.c.bf16 %v843_v11, %v842_v10  ;;  %v962_v10 = vld [vmem:[#allocation2 + $0x330] sm:$0xff]  ;;  %v963_v11 = vld [vmem:[#allocation2 + $0x338] sm:$0xff] }
 0x1ad   : > { %v626_v20 = vmax.f32 %v624_v18, 0.0  ;;  %v845_v18 = vld [vmem:[#allocation2 + $0x2e8] sm:$0xff] }
 0x1ae   : > { %v631_v21 = vrot.slane %v627_v19, 7  ;;  %v5163_v19 = vpack.c.bf16 %v845_v18, %v844_v17  ;;  %v964_v17 = vld [vmem:[#allocation2 + $0x340] sm:$0xff]  ;;  %v965_v18 = vld [vmem:[#allocation2 + $0x348] sm:$0xff] }
 0x1af   : > { %v630_v22 = vrot.slane %v626_v20, 7  ;;  %v846_v20 = vld [vmem:[#allocation2 + $0x2f0] sm:$0xff] }
 0x1b0   : > { %v637_v23 = vsel %vm313_vm0, %v631_v21, 0.0 }
 0x1b1   : > { %v677_v26 = vrot.slane %v637_v23, 1  ;;  %v851_v27 = vrot.slane %v637_v23, 2  ;;  %v632_v28 = vsel %vm313_vm0, %v630_v22, %v631_v21  ;;  %v636_v29 = vsel %vm313_vm0, 0.0, %v630_v22  ;;  %v847_v21 = vld [vmem:[#allocation2 + $0x2f8] sm:$0xff]  ;;  %v983_v23 = vld [vmem:[#allocation2 + $0x3d0] sm:$0xff] }
 0x1b2   : > { %v674_v30 = vrot.slane %v636_v29, 1  ;;  %v675_v31 = vrot.slane %v632_v28, 1  ;;  %v848_v32 = vrot.slane %v636_v29, 2  ;;  %v849_v33 = vrot.slane %v632_v28, 2  ;;  %v987_v29 = vld [vmem:[#allocation2 + $0x3f0] sm:$0xff] }
 0x1b3   : > { %v5191_v25 = vpack.c.bf16 %v984_v24, %v983_v23  ;;  %v968_v23 = vld [vmem:[#allocation2 + $0x360] sm:$0xff]  ;;  %v969_v24 = vld [vmem:[#allocation2 + $0x368] sm:$0xff] }
 0x1b4   : > { %v676_v35 = vsel %vm357_vm1, %v674_v30, %v675_v31  ;;  %v678_v36 = vsel %vm357_vm1, %v675_v31, %v677_v26  ;;  %v850_v37 = vsel %vm532_vm3, %v848_v32, %v849_v33  ;;  %v6295_v38 = vsel %vm532_vm3, %v849_v33, %v851_v27  ;;  %v985_v26 = vld [vmem:[#allocation2 + $0x3e0] sm:$0xff]  ;;  %v986_v27 = vld [vmem:[#allocation2 + $0x3e8] sm:$0xff]  ;;  %v988_v30 = vld [vmem:[#allocation2 + $0x3f8] sm:$0xff] }
 0x1b5   : > { %4144 = vmatprep.mubr.f32.mxu1 %v676_v35  ;;  %5192 = vmatprep.subr.bf16.mxu0 %v5191_v25  ;;  %v5199_v31 = vpack.c.bf16 %v988_v30, %v987_v29  ;;  %v956_v32 = vld [vmem:[#allocation2 + $0x300] sm:$0xff]  ;;  %v957_v33 = vld [vmem:[#allocation2 + $0x308] sm:$0xff] }
 0x1b6   : > { %4145 = vmatmul.mubr.f32.vlgmr.msra.gmra.mrb[0].mxu1 %v678_v36  ;;  %5194 = vmatpush3.bf16.msra.mxu0 %v5191_v25  ;;  %v1290_v35 = vld [vmem:[#allocation2 + $0x500] sm:$0xff]  ;;  %v1291_v36 = vld [vmem:[#allocation2 + $0x508] sm:$0xff]  ;;  %v5227_v25 = vpack.c.bf16 %v969_v24, %v968_v23  ;;  %v1614_v23 = vld [vmem:[#allocation2 + $0x6b8] sm:$0xff] }
 0x1b7   : > { %5110 = vmatpush3.bf16.msra.mxu1 %v5107_v58  ;;  %4179 = vmatprep.mubr.msk.f32.mxu1 %vm6275_vm2, %v630_v22  ;;  %v5135_v58 = vpack.c.bf16 %v654_v56, %v653_v55  ;;  %v5167_v22 = vpack.c.bf16 %v847_v21, %v846_v20  ;;  %v966_v20 = vld [vmem:[#allocation2 + $0x350] sm:$0xff]  ;;  %v967_v21 = vld [vmem:[#allocation2 + $0x358] sm:$0xff]  ;;  %v1150_v29 = vld [vmem:[#allocation2 + $0x400] sm:$0xff] }
 0x1b8   : > { %5112 = vmatprep.subr.bf16.mxu1 %v5111_v34  ;;  %v1151_v30 = vld [vmem:[#allocation2 + $0x408] sm:$0xff] }
 0x1bb   : > { %5114 = vmatpush3.bf16.msra.mxu1 %v5111_v34  ;;  %v5203_v34 = vpack.c.bf16 %v957_v33, %v956_v32  ;;  %v1152_v32 = vld [vmem:[#allocation2 + $0x410] sm:$0xff]  ;;  %v1153_v33 = vld [vmem:[#allocation2 + $0x418] sm:$0xff] }
 0x1bc   : > { %5116 = vmatprep.subr.bf16.mxu1 %v5115_v41 }
 0x1bf   : > { %5118 = vmatpush3.bf16.msra.mxu1 %v5115_v41  ;;  %v1294_v41 = vld [vmem:[#allocation2 + $0x520] sm:$0xff] }
 0x1c0   : > { %5120 = vmatprep.subr.bf16.mxu1 %v5119_v45  ;;  %v5275_v43 = vpack.c.bf16 %v1295_v42, %v1294_v41  ;;  %v1156_v41 = vld [vmem:[#allocation2 + $0x430] sm:$0xff]  ;;  %v1157_v42 = vld [vmem:[#allocation2 + $0x438] sm:$0xff] }
 0x1c3   : > { %5122 = vmatpush3.bf16.msra.mxu1 %v5119_v45  ;;  %v1296_v45 = vld [vmem:[#allocation2 + $0x530] sm:$0xff] }
 0x1c4   : > { %5124 = vmatprep.subr.bf16.mxu1 %v5123_v48  ;;  %v5279_v47 = vpack.c.bf16 %v1297_v46, %v1296_v45  ;;  %v1158_v45 = vld [vmem:[#allocation2 + $0x440] sm:$0xff]  ;;  %v1159_v46 = vld [vmem:[#allocation2 + $0x448] sm:$0xff] }
 0x1c7   : > { %5126 = vmatpush3.bf16.msra.mxu1 %v5123_v48  ;;  %v1298_v48 = vld [vmem:[#allocation2 + $0x540] sm:$0xff] }
 0x1c8   : > { %5128 = vmatprep.subr.bf16.mxu1 %v5127_v51  ;;  %v5283_v50 = vpack.c.bf16 %v1299_v49, %v1298_v48  ;;  %v1160_v48 = vld [vmem:[#allocation2 + $0x450] sm:$0xff]  ;;  %v1161_v49 = vld [vmem:[#allocation2 + $0x458] sm:$0xff] }
 0x1cb   : > { %5130 = vmatpush3.bf16.msra.mxu1 %v5127_v51  ;;  %v3477_v51 = vld [vmem:[#allocation6 + $0x1] ss:$0 sm:$0xff] }
 0x1cc   : > { %5132 = vmatprep.subr.bf16.mxu1 %v5131_v54 }
 0x1cf   : > { %5134 = vmatpush3.bf16.msra.mxu1 %v5131_v54 }
 0x1d0   : > { %5136 = vmatprep.subr.bf16.mxu1 %v5135_v58 }
 0x1d3   : > { %5138 = vmatpush3.bf16.msra.mxu1 %v5135_v58 }
 0x1d4   : > { %5140 = vmatprep.subr.bf16.mxu1 %v5139_v61 }
 0x1d6   : > { %4180 = vmatmul.mubr.f32.vlgmr.msra.gmra.mrb[0].mxu1 %v632_v28  ;;  %v5195_v28 = vpack.c.bf16 %v986_v27, %v985_v26  ;;  %v970_v26 = vld [vmem:[#allocation2 + $0x370] sm:$0xff]  ;;  %v971_v27 = vld [vmem:[#allocation2 + $0x378] sm:$0xff] }
 0x1d7   : > { %5142 = vmatpush3.bf16.msra.mxu1 %v5139_v61  ;;  %4214 = vmatprep.mubr.f32.mxu1 %v850_v37  ;;  %v1292_v37 = vld [vmem:[#allocation2 + $0x510] sm:$0xff] }
 0x1d8   : > { %5144 = vmatprep.subr.bf16.mxu1 %v5143_v0  ;;  %5196 = vmatprep.subr.bf16.mxu0 %v5195_v28  ;;  %v5271_v40 = vpack.c.bf16 %v1293_v39, %v1292_v37  ;;  %v1154_v37 = vld [vmem:[#allocation2 + $0x420] sm:$0xff] }
 0x1d9   : > { %5198 = vmatpush3.bf16.msra.mxu0 %v5195_v28  ;;  %v5231_v28 = vpack.c.bf16 %v971_v27, %v970_v26  ;;  %v1616_v26 = vld [vmem:[#allocation2 + $0x6c8] sm:$0xff] }
 0x1da   : > { %5200 = vmatprep.subr.bf16.mxu0 %v5199_v31 }
 0x1db   : > { %5146 = vmatpush3.bf16.msra.mxu1 %v5143_v0 }
 0x1dc   : > { %5148 = vmatprep.subr.bf16.mxu1 %v5147_v3 }
 0x1dd   : > { %5202 = vmatpush3.bf16.msra.mxu0 %v5199_v31  ;;  %v5235_v31 = vpack.c.bf16 %v1151_v30, %v1150_v29 }
 0x1de   : > { %5204 = vmatprep.subr.bf16.mxu0 %v5203_v34 }
 0x1df   : > { %5150 = vmatpush3.bf16.msra.mxu1 %v5147_v3  ;;  %v959_v3 = vld [vmem:[#allocation2 + $0x318] sm:$0xff] }
 0x1e0   : > { %5152 = vmatprep.subr.bf16.mxu1 %v5151_v6 }
 0x1e3   : > { %5154 = vmatpush3.bf16.msra.mxu1 %v5151_v6  ;;  %v5207_v6 = vpack.c.bf16 %v959_v3, %v958_v2  ;;  %v1302_v2 = vld [vmem:[#allocation2 + $0x560] sm:$0xff]  ;;  %v1303_v3 = vld [vmem:[#allocation2 + $0x568] sm:$0xff] }
 0x1e4   : > { %5156 = vmatprep.subr.bf16.mxu1 %v5155_v9 }
 0x1e7   : > { %5158 = vmatpush3.bf16.msra.mxu1 %v5155_v9  ;;  %v5211_v9 = vpack.c.bf16 %v961_v8, %v960_v7  ;;  %v1274_v7 = vld [vmem:[#allocation2 + $0x488] sm:$0xff] }
 0x1e8   : > { %5160 = vmatprep.subr.bf16.mxu1 %v5159_v12 }
 0x1eb   : > { %5162 = vmatpush3.bf16.msra.mxu1 %v5159_v12  ;;  %v5215_v12 = vpack.c.bf16 %v963_v11, %v962_v10  ;;  %v1608_v10 = vld [vmem:[#allocation2 + $0x688] sm:$0xff]  ;;  %v1609_v11 = vld [vmem:[#allocation2 + $0x690] sm:$0xff] }
 0x1ec   : > { %5164 = vmatprep.subr.bf16.mxu1 %v5163_v19 }
 0x1ef   : > { %5166 = vmatpush3.bf16.msra.mxu1 %v5163_v19  ;;  %v5219_v19 = vpack.c.bf16 %v965_v18, %v964_v17  ;;  %v1610_v17 = vld [vmem:[#allocation2 + $0x698] sm:$0xff] }
 0x1f0   : > { %5168 = vmatprep.subr.bf16.mxu1 %v5167_v22  ;;  %v5367_v18 = vpack.c.bf16 %v1610_v17, %v1609_v11  ;;  %v1467_v11 = vld [vmem:[#allocation2 + $0x588] sm:$0xff]  ;;  %v1468_v17 = vld [vmem:[#allocation2 + $0x590] sm:$0xff] }
 0x1f3   : > { %5170 = vmatpush3.bf16.msra.mxu1 %v5167_v22  ;;  %v5223_v22 = vpack.c.bf16 %v967_v21, %v966_v20  ;;  %v1612_v20 = vld [vmem:[#allocation2 + $0x6a8] sm:$0xff] }
 0x1f6   : > { %4215 = vmatmul.mubr.f32.vlgmr.msra.gmra.mrb[0].mxu1 %v6295_v38  ;;  %v5267_v38 = vpack.c.bf16 %v1291_v36, %v1290_v35  ;;  %v5239_v36 = vpack.c.bf16 %v1153_v33, %v1152_v32 }
 0x1f8   : > { %5268 = vmatprep.subr.bf16.mxu1 %v5267_v38 }
 0x1f9   : > { %5270 = vmatpush3.bf16.msra.mxu1 %v5267_v38  ;;  %v1155_v38 = vld [vmem:[#allocation2 + $0x428] sm:$0xff] }
 0x1fa   : > { %5272 = vmatprep.subr.bf16.mxu1 %v5271_v40 }
 0x1fd   : > { %5274 = vmatpush3.bf16.msra.mxu1 %v5271_v40  ;;  %v5243_v40 = vpack.c.bf16 %v1155_v38, %v1154_v37  ;;  %v1275_v38 = vld [vmem:[#allocation2 + $0x490] sm:$0xff] }
 0x1fe   : > { %5276 = vmatprep.subr.bf16.mxu1 %v5275_v43 }
 0x201   : > { %5278 = vmatpush3.bf16.msra.mxu1 %v5275_v43  ;;  %v5247_v43 = vpack.c.bf16 %v1157_v42, %v1156_v41 }
 0x202   : > { %5280 = vmatprep.subr.bf16.mxu1 %v5279_v47 }
 0x205   : > { %5282 = vmatpush3.bf16.msra.mxu1 %v5279_v47  ;;  %v5251_v47 = vpack.c.bf16 %v1159_v46, %v1158_v45 }
 0x206   : > { %5284 = vmatprep.subr.bf16.mxu1 %v5283_v50 }
 0x209   : > { %5286 = vmatpush3.bf16.msra.mxu1 %v5283_v50  ;;  %v5255_v50 = vpack.c.bf16 %v1161_v49, %v1160_v48 }
 0x2c9   : > { %v4216_v52 = vpop.f32.mrb[0].mxu1 }
 0x2ca   : > { %v941_v53 = vadd.f32 %v4216_v52, %v3477_v51  ;;  %v921_v54 = vpop.f32.mrb[1].mxu1  ;;  %v1163_v52 = vld [vmem:[#allocation2 + $0x468] sm:$0xff] }
 0x2cb   : > { %v940_v55 = vadd.f32 %v3477_v51, %v921_v54  ;;  %v1162_v51 = vld [vmem:[#allocation2 + $0x460] sm:$0xff]  ;;  %v1164_v54 = vld [vmem:[#allocation2 + $0x470] sm:$0xff] }
 0x2cc   : > { %v945_v56 = vrot.slane %v941_v53, 7  ;;  %v5259_v53 = vpack.c.bf16 %v1163_v52, %v1162_v51 }
 0x2cd   : > { %v944_v58 = vrot.slane %v940_v55, 7  ;;  %v1165_v55 = vld [vmem:[#allocation2 + $0x478] sm:$0xff] }
 0x2ce   : > { %v952_v59 = vadd.f32 %v945_v56, %v6270_v44 }
 0x2cf   : > { %v946_v60 = vsel %vm313_vm0, %v944_v58, %v945_v56  ;;  %v950_v61 = vadd.f32 %v944_v58, %v6263_v16  ;;  %v5263_v56 = vpack.c.bf16 %v1165_v55, %v1164_v54  ;;  %v1277_v54 = vld [vmem:[#allocation2 + $0x4a0] sm:$0xff]  ;;  %v1278_v55 = vld [vmem:[#allocation2 + $0x4a8] sm:$0xff] }
 0x2d0   : > { %v6304_v62 = vsel %vm313_vm0, %v952_v59, 0.0  ;;  %v6307_v63 = vadd.f32 %v946_v60, %v6259_v15  ;;  %v1300_v60 = vld [vmem:[#allocation2 + $0x550] sm:$0xff] }
 0x2d1   : > { %v995_v0 = vrot.slane %v6304_v62, 1  ;;  %v6311_v1 = vsel %vm313_vm0, 0.0, %v950_v61  ;;  %v1169_v58 = vrot.slane %v6304_v62, 2 }
 0x2d2   : > { %v992_v4 = vrot.slane %v6311_v1, 1  ;;  %v993_v44 = vrot.slane %v6307_v63, 1  ;;  %v1167_v35 = vrot.slane %v6307_v63, 2 }
 0x2d4   : > { %v994_v5 = vsel %vm357_vm1, %v992_v4, %v993_v44  ;;  %v996_v16 = vsel %vm357_vm1, %v993_v44, %v995_v0  ;;  %v1170_v59 = vsel %vm532_vm3, %v1167_v35, %v1169_v58  ;;  %v5291_v4 = vpack.c.bf16 %v1303_v3, %v1302_v2  ;;  %v1304_v44 = vld [vmem:[#allocation2 + $0x570] sm:$0xff] }
 0x2d5   : > { %4249 = vmatprep.mubr.f32.mxu0 %v994_v5  ;;  %v1305_v5 = vld [vmem:[#allocation2 + $0x578] sm:$0xff]  ;;  %v1279_v58 = vld [vmem:[#allocation2 + $0x4b0] sm:$0xff] }
 0x2d6   : > { %4250 = vmatmul.mubr.f32.vlgmr.msra.gmra.mrb[2].mxu0 %v996_v16  ;;  %v5295_v16 = vpack.c.bf16 %v1305_v5, %v1304_v44  ;;  %v1283_v3 = vld [vmem:[#allocation2 + $0x4d0] sm:$0xff]  ;;  %v1285_v5 = vld [vmem:[#allocation2 + $0x4e0] sm:$0xff] }
 0x2d7   : > { %5206 = vmatpush3.bf16.msra.mxu0 %v5203_v34  ;;  %4284 = vmatprep.mubr.msk.f32.mxu0 %vm6275_vm2, %v950_v61  ;;  %v1166_v34 = vrot.slane %v6311_v1, 2  ;;  %v1301_v61 = vld [vmem:[#allocation2 + $0x558] sm:$0xff] }
 0x2d8   : > { %5208 = vmatprep.subr.bf16.mxu0 %v5207_v6  ;;  %v5287_v0 = vpack.c.bf16 %v1301_v61, %v1300_v60  ;;  %v1281_v61 = vld [vmem:[#allocation2 + $0x4c0] sm:$0xff] }
 0x2d9   : > { %v1168_v39 = vsel %vm532_vm3, %v1166_v34, %v1167_v35 }
 0x2da   : > { %5288 = vmatprep.subr.bf16.mxu1 %v5287_v0 }
 0x2db   : > { %5210 = vmatpush3.bf16.msra.mxu0 %v5207_v6  ;;  %5290 = vmatpush3.bf16.msra.mxu1 %v5287_v0  ;;  %v1273_v6 = vld [vmem:[#allocation2 + $0x480] sm:$0xff]  ;;  %v1282_v0 = vld [vmem:[#allocation2 + $0x4c8] sm:$0xff] }
 0x2dc   : > { %5212 = vmatprep.subr.bf16.mxu0 %v5211_v9  ;;  %5292 = vmatprep.subr.bf16.mxu1 %v5291_v4  ;;  %v5299_v8 = vpack.c.bf16 %v1274_v7, %v1273_v6  ;;  %v5315_v2 = vpack.c.bf16 %v1282_v0, %v1281_v61  ;;  %v1287_v7 = vld [vmem:[#allocation2 + $0x4f0] sm:$0xff]  ;;  %v1931_v0 = vld [vmem:[#allocation2 + $0x838] sm:$0xff] }
 0x2dd   : > { %v1930_v61 = vld [vmem:[#allocation2 + $0x830] sm:$0xff] }
 0x2df   : > { %5214 = vmatpush3.bf16.msra.mxu0 %v5211_v9  ;;  %5294 = vmatpush3.bf16.msra.mxu1 %v5291_v4  ;;  %v1607_v9 = vld [vmem:[#allocation2 + $0x680] sm:$0xff]  ;;  %v1284_v4 = vld [vmem:[#allocation2 + $0x4d8] sm:$0xff] }
 0x2e0   : > { %5216 = vmatprep.subr.bf16.mxu0 %v5215_v12  ;;  %5296 = vmatprep.subr.bf16.mxu1 %v5295_v16  ;;  %v5319_v44 = vpack.c.bf16 %v1284_v4, %v1283_v3  ;;  %v1932_v3 = vld [vmem:[#allocation2 + $0x840] sm:$0xff]  ;;  %v1933_v4 = vld [vmem:[#allocation2 + $0x848] sm:$0xff] }
 0x2e3   : > { %5218 = vmatpush3.bf16.msra.mxu0 %v5215_v12  ;;  %5298 = vmatpush3.bf16.msra.mxu1 %v5295_v16  ;;  %v5363_v12 = vpack.c.bf16 %v1608_v10, %v1607_v9  ;;  %v1286_v16 = vld [vmem:[#allocation2 + $0x4e8] sm:$0xff]  ;;  %v1466_v10 = vld [vmem:[#allocation2 + $0x580] sm:$0xff] }
 0x2e4   : > { %5220 = vmatprep.subr.bf16.mxu0 %v5219_v19  ;;  %5300 = vmatprep.subr.bf16.mxu1 %v5299_v8  ;;  %v5323_v6 = vpack.c.bf16 %v1286_v16, %v1285_v5  ;;  %v3483_v5 = vld [vmem:[#allocation6 + $0x3] ss:$0 sm:$0xff] }
 0x2e7   : > { %5222 = vmatpush3.bf16.msra.mxu0 %v5219_v19  ;;  %v1611_v19 = vld [vmem:[#allocation2 + $0x6a0] sm:$0xff] }
 0x2e8   : > { %5224 = vmatprep.subr.bf16.mxu0 %v5223_v22  ;;  %v5371_v21 = vpack.c.bf16 %v1612_v20, %v1611_v19  ;;  %v1470_v20 = vld [vmem:[#allocation2 + $0x5a0] sm:$0xff] }
 0x2eb   : > { %5226 = vmatpush3.bf16.msra.mxu0 %v5223_v22  ;;  %v1613_v22 = vld [vmem:[#allocation2 + $0x6b0] sm:$0xff] }
 0x2ec   : > { %5228 = vmatprep.subr.bf16.mxu0 %v5227_v25  ;;  %v5375_v24 = vpack.c.bf16 %v1614_v23, %v1613_v22  ;;  %v1472_v23 = vld [vmem:[#allocation2 + $0x5b0] sm:$0xff] }
 0x2ef   : > { %5230 = vmatpush3.bf16.msra.mxu0 %v5227_v25  ;;  %v1615_v25 = vld [vmem:[#allocation2 + $0x6c0] sm:$0xff] }
 0x2f0   : > { %5232 = vmatprep.subr.bf16.mxu0 %v5231_v28  ;;  %v5379_v27 = vpack.c.bf16 %v1616_v26, %v1615_v25  ;;  %v1474_v26 = vld [vmem:[#allocation2 + $0x5c0] sm:$0xff] }
 0x2f3   : > { %5234 = vmatpush3.bf16.msra.mxu0 %v5231_v28  ;;  %v3480_v28 = vld [vmem:[#allocation6 + $0x2] ss:$0 sm:$0xff] }
 0x2f4   : > { %5236 = vmatprep.subr.bf16.mxu0 %v5235_v31 }
 0x2f6   : > { %4285 = vmatmul.mubr.f32.vlgmr.msra.gmra.mrb[2].mxu0 %v6307_v63 }
 0x2f7   : > { %5238 = vmatpush3.bf16.msra.mxu0 %v5235_v31  ;;  %4319 = vmatprep.mubr.f32.mxu0 %v1168_v39  ;;  %v1276_v39 = vld [vmem:[#allocation2 + $0x498] sm:$0xff] }
 0x2f8   : > { %5240 = vmatprep.subr.bf16.mxu0 %v5239_v36  ;;  %v5303_v49 = vpack.c.bf16 %v1276_v39, %v1275_v38  ;;  %v1617_v38 = vld [vmem:[#allocation2 + $0x6d0] sm:$0xff]  ;;  %v1618_v39 = vld [vmem:[#allocation2 + $0x6d8] sm:$0xff] }
 0x2fb   : > { %5242 = vmatpush3.bf16.msra.mxu0 %v5239_v36 }
 0x2fc   : > { %5244 = vmatprep.subr.bf16.mxu0 %v5243_v40 }
 0x2ff   : > { %5246 = vmatpush3.bf16.msra.mxu0 %v5243_v40 }
 0x300   : > { %5248 = vmatprep.subr.bf16.mxu0 %v5247_v43 }
 0x303   : > { %5250 = vmatpush3.bf16.msra.mxu0 %v5247_v43 }
 0x304   : > { %5252 = vmatprep.subr.bf16.mxu0 %v5251_v47 }
 0x307   : > { %5254 = vmatpush3.bf16.msra.mxu0 %v5251_v47 }
 0x308   : > { %5256 = vmatprep.subr.bf16.mxu0 %v5255_v50 }
 0x30b   : > { %5258 = vmatpush3.bf16.msra.mxu0 %v5255_v50 }
 0x30c   : > { %5260 = vmatprep.subr.bf16.mxu0 %v5259_v53 }
 0x30f   : > { %5262 = vmatpush3.bf16.msra.mxu0 %v5259_v53 }
 0x310   : > { %5264 = vmatprep.subr.bf16.mxu0 %v5263_v56 }
 0x313   : > { %5266 = vmatpush3.bf16.msra.mxu0 %v5263_v56  ;;  %v5307_v56 = vpack.c.bf16 %v1278_v55, %v1277_v54  ;;  %v1927_v55 = vld [vmem:[#allocation2 + $0x818] sm:$0xff] }
 0x314   : > { %5364 = vmatprep.subr.bf16.mxu0 %v5363_v12 }
 0x316   : > { %4320 = vmatmul.mubr.f32.vlgmr.msra.gmra.mrb[2].mxu0 %v1170_v59  ;;  %v1280_v59 = vld [vmem:[#allocation2 + $0x4b8] sm:$0xff] }
 0x317   : > { %5366 = vmatpush3.bf16.msra.mxu0 %v5363_v12  ;;  %v5311_v60 = vpack.c.bf16 %v1280_v59, %v1279_v58  ;;  %v5331_v12 = vpack.c.bf16 %v1467_v11, %v1466_v10  ;;  %v1928_v58 = vld [vmem:[#allocation2 + $0x820] sm:$0xff]  ;;  %v1929_v59 = vld [vmem:[#allocation2 + $0x828] sm:$0xff] }
 0x318   : > { %5368 = vmatprep.subr.bf16.mxu0 %v5367_v18 }
 0x31b   : > { %5370 = vmatpush3.bf16.msra.mxu0 %v5367_v18  ;;  %v1469_v18 = vld [vmem:[#allocation2 + $0x598] sm:$0xff] }
 0x31c   : > { %5372 = vmatprep.subr.bf16.mxu0 %v5371_v21  ;;  %v5335_v19 = vpack.c.bf16 %v1469_v18, %v1468_v17 }
 0x31f   : > { %5374 = vmatpush3.bf16.msra.mxu0 %v5371_v21  ;;  %v1471_v21 = vld [vmem:[#allocation2 + $0x5a8] sm:$0xff] }
 0x320   : > { %5376 = vmatprep.subr.bf16.mxu0 %v5375_v24  ;;  %v5339_v22 = vpack.c.bf16 %v1471_v21, %v1470_v20 }
 0x323   : > { %5378 = vmatpush3.bf16.msra.mxu0 %v5375_v24  ;;  %v1473_v24 = vld [vmem:[#allocation2 + $0x5b8] sm:$0xff] }
 0x324   : > { %5380 = vmatprep.subr.bf16.mxu0 %v5379_v27  ;;  %v5343_v25 = vpack.c.bf16 %v1473_v24, %v1472_v23  ;;  %v1593_v23 = vld [vmem:[#allocation2 + $0x618] sm:$0xff] }
 0x327   : > { %5382 = vmatpush3.bf16.msra.mxu0 %v5379_v27  ;;  %v1475_v27 = vld [vmem:[#allocation2 + $0x5c8] sm:$0xff] }
 0x3e9   : > { %v4321_v29 = vpop.f32.mrb[2].mxu0 }
 0x3ea   : > { %v1259_v30 = vadd.f32 %v4321_v29, %v3480_v28  ;;  %v1239_v31 = vpop.f32.mrb[3].mxu0  ;;  %v1476_v29 = vld [vmem:[#allocation2 + $0x5d0] sm:$0xff] }
 0x3eb   : > { %v1258_v32 = vadd.f32 %v3480_v28, %v1239_v31  ;;  %v5347_v28 = vpack.c.bf16 %v1475_v27, %v1474_v26  ;;  %v1594_v27 = vld [vmem:[#allocation2 + $0x620] sm:$0xff] }
 0x3ec   : > { %v1261_v33 = vmax.f32 %v1259_v30, 0.0  ;;  %v1477_v30 = vld [vmem:[#allocation2 + $0x5d8] sm:$0xff] }
 0x3ed   : > { %v1260_v34 = vmax.f32 %v1258_v32, 0.0  ;;  %v5351_v31 = vpack.c.bf16 %v1477_v30, %v1476_v29  ;;  %v1478_v32 = vld [vmem:[#allocation2 + $0x5e0] sm:$0xff]  ;;  %v1596_v29 = vld [vmem:[#allocation2 + $0x630] sm:$0xff]  ;;  %v1597_v30 = vld [vmem:[#allocation2 + $0x638] sm:$0xff] }
 0x3ee   : > { %v1265_v35 = vrot.slane %v1261_v33, 7  ;;  %v1479_v33 = vld [vmem:[#allocation2 + $0x5e8] sm:$0xff] }
 0x3ef   : > { %v1264_v36 = vrot.slane %v1260_v34, 7  ;;  %v5355_v34 = vpack.c.bf16 %v1479_v33, %v1478_v32  ;;  %v1598_v32 = vld [vmem:[#allocation2 + $0x640] sm:$0xff]  ;;  %v1599_v33 = vld [vmem:[#allocation2 + $0x648] sm:$0xff] }
 0x3f0   : > { %v1271_v37 = vsel %vm313_vm0, %v1265_v35, 0.0 }
 0x3f1   : > { %v1311_v40 = vrot.slane %v1271_v37, 1  ;;  %v1485_v41 = vrot.slane %v1271_v37, 2  ;;  %v1266_v42 = vsel %vm313_vm0, %v1264_v36, %v1265_v35  ;;  %v1270_v43 = vsel %vm313_vm0, 0.0, %v1264_v36  ;;  %v1480_v35 = vld [vmem:[#allocation2 + $0x5f0] sm:$0xff] }
 0x3f2   : > { %v1308_v45 = vrot.slane %v1270_v43, 1  ;;  %v1309_v46 = vrot.slane %v1266_v42, 1  ;;  %v1482_v47 = vrot.slane %v1270_v43, 2  ;;  %v1483_v48 = vrot.slane %v1266_v42, 2 }
 0x3f4   : > { %v1310_v50 = vsel %vm357_vm1, %v1308_v45, %v1309_v46  ;;  %v1312_v51 = vsel %vm357_vm1, %v1309_v46, %v1311_v40  ;;  %v1484_v52 = vsel %vm532_vm3, %v1482_v47, %v1483_v48  ;;  %v6332_v53 = vsel %vm532_vm3, %v1483_v48, %v1485_v41  ;;  %v1619_v41 = vld [vmem:[#allocation2 + $0x6e0] sm:$0xff]  ;;  %v1621_v45 = vld [vmem:[#allocation2 + $0x6f0] sm:$0xff]  ;;  %v1622_v46 = vld [vmem:[#allocation2 + $0x6f8] sm:$0xff] }
 0x3f5   : > { %4354 = vmatprep.mubr.f32.mxu1 %v1310_v50  ;;  %v5383_v40 = vpack.c.bf16 %v1618_v39, %v1617_v38  ;;  %v5391_v47 = vpack.c.bf16 %v1622_v46, %v1621_v45  ;;  %v1590_v48 = vld [vmem:[#allocation2 + $0x600] sm:$0xff]  ;;  %v1603_v39 = vld [vmem:[#allocation2 + $0x668] sm:$0xff] }
 0x3f6   : > { %4355 = vmatmul.mubr.f32.vlgmr.msra.gmra.mrb[2].mxu1 %v1312_v51  ;;  %v1924_v51 = vld [vmem:[#allocation2 + $0x800] sm:$0xff]  ;;  %v1785_v46 = vld [vmem:[#allocation2 + $0x708] sm:$0xff] }
 0x3f7   : > { %5302 = vmatpush3.bf16.msra.mxu1 %v5299_v8  ;;  %4389 = vmatprep.mubr.msk.f32.mxu1 %vm6275_vm2, %v1264_v36  ;;  %v1288_v8 = vld [vmem:[#allocation2 + $0x4f8] sm:$0xff]  ;;  %v1602_v38 = vld [vmem:[#allocation2 + $0x660] sm:$0xff] }
 0x3f8   : > { %5304 = vmatprep.subr.bf16.mxu1 %v5303_v49  ;;  %v5327_v9 = vpack.c.bf16 %v1288_v8, %v1287_v7  ;;  %v1481_v36 = vld [vmem:[#allocation2 + $0x5f8] sm:$0xff]  ;;  %5384 = vmatprep.subr.bf16.mxu0 %v5383_v40  ;;  %v1784_v45 = vld [vmem:[#allocation2 + $0x700] sm:$0xff] }
 0x3f9   : > { %v5359_v37 = vpack.c.bf16 %v1481_v36, %v1480_v35  ;;  %5386 = vmatpush3.bf16.msra.mxu0 %v5383_v40  ;;  %v1600_v35 = vld [vmem:[#allocation2 + $0x650] sm:$0xff]  ;;  %v1601_v36 = vld [vmem:[#allocation2 + $0x658] sm:$0xff]  ;;  %v5419_v40 = vpack.c.bf16 %v1603_v39, %v1602_v38 }
 0x3fa   : > { %v2248_v38 = vld [vmem:[#allocation2 + $0x9b8] sm:$0xff] }
 0x3fb   : > { %5306 = vmatpush3.bf16.msra.mxu1 %v5303_v49  ;;  %v1591_v49 = vld [vmem:[#allocation2 + $0x608] sm:$0xff] }
 0x3fc   : > { %5308 = vmatprep.subr.bf16.mxu1 %v5307_v56  ;;  %v5395_v50 = vpack.c.bf16 %v1591_v49, %v1590_v48  ;;  %v1786_v48 = vld [vmem:[#allocation2 + $0x710] sm:$0xff]  ;;  %v1787_v49 = vld [vmem:[#allocation2 + $0x718] sm:$0xff] }
 0x3ff   : > { %5310 = vmatpush3.bf16.msra.mxu1 %v5307_v56 }
 0x400   : > { %5312 = vmatprep.subr.bf16.mxu1 %v5311_v60 }
 0x403   : > { %5314 = vmatpush3.bf16.msra.mxu1 %v5311_v60  ;;  %v5467_v60 = vpack.c.bf16 %v1929_v59, %v1928_v58  ;;  %v1790_v58 = vld [vmem:[#allocation2 + $0x730] sm:$0xff]  ;;  %v1791_v59 = vld [vmem:[#allocation2 + $0x738] sm:$0xff] }
 0x404   : > { %5316 = vmatprep.subr.bf16.mxu1 %v5315_v2 }
 0x407   : > { %5318 = vmatpush3.bf16.msra.mxu1 %v5315_v2  ;;  %v5471_v2 = vpack.c.bf16 %v1931_v0, %v1930_v61  ;;  %v1792_v61 = vld [vmem:[#allocation2 + $0x740] sm:$0xff]  ;;  %v1793_v0 = vld [vmem:[#allocation2 + $0x748] sm:$0xff] }
 0x408   : > { %5320 = vmatprep.subr.bf16.mxu1 %v5319_v44 }
 0x40b   : > { %5322 = vmatpush3.bf16.msra.mxu1 %v5319_v44  ;;  %v5475_v44 = vpack.c.bf16 %v1933_v4, %v1932_v3  ;;  %v1794_v3 = vld [vmem:[#allocation2 + $0x750] sm:$0xff]  ;;  %v1795_v4 = vld [vmem:[#allocation2 + $0x758] sm:$0xff] }
 0x40c   : > { %5324 = vmatprep.subr.bf16.mxu1 %v5323_v6 }
 0x40f   : > { %5326 = vmatpush3.bf16.msra.mxu1 %v5323_v6 }
 0x410   : > { %5328 = vmatprep.subr.bf16.mxu1 %v5327_v9 }
 0x413   : > { %5330 = vmatpush3.bf16.msra.mxu1 %v5327_v9 }
 0x414   : > { %5332 = vmatprep.subr.bf16.mxu1 %v5331_v12 }
 0x416   : > { %4390 = vmatmul.mubr.f32.vlgmr.msra.gmra.mrb[2].mxu1 %v1266_v42  ;;  %v1620_v42 = vld [vmem:[#allocation2 + $0x6e8] sm:$0xff] }
 0x417   : > { %5334 = vmatpush3.bf16.msra.mxu1 %v5331_v12  ;;  %4424 = vmatprep.mubr.f32.mxu1 %v1484_v52  ;;  %v5387_v43 = vpack.c.bf16 %v1620_v42, %v1619_v41  ;;  %v1925_v52 = vld [vmem:[#allocation2 + $0x808] sm:$0xff]  ;;  %v1604_v41 = vld [vmem:[#allocation2 + $0x670] sm:$0xff]  ;;  %v1605_v42 = vld [vmem:[#allocation2 + $0x678] sm:$0xff] }
 0x418   : > { %5336 = vmatprep.subr.bf16.mxu1 %v5335_v19  ;;  %v5459_v54 = vpack.c.bf16 %v1925_v52, %v1924_v51  ;;  %v5431_v52 = vpack.c.bf16 %v1787_v49, %v1786_v48 }
 0x419   : > { %5388 = vmatprep.subr.bf16.mxu0 %v5387_v43 }
 0x41a   : > { %5390 = vmatpush3.bf16.msra.mxu0 %v5387_v43  ;;  %v5423_v43 = vpack.c.bf16 %v1605_v42, %v1604_v41  ;;  %v2250_v41 = vld [vmem:[#allocation2 + $0x9c8] sm:$0xff] }
 0x41b   : > { %5338 = vmatpush3.bf16.msra.mxu1 %v5335_v19  ;;  %5392 = vmatprep.subr.bf16.mxu0 %v5391_v47 }
 0x41c   : > { %5340 = vmatprep.subr.bf16.mxu1 %v5339_v22 }
 0x41e   : > { %5394 = vmatpush3.bf16.msra.mxu0 %v5391_v47  ;;  %v5427_v47 = vpack.c.bf16 %v1785_v46, %v1784_v45 }
 0x41f   : > { %5342 = vmatpush3.bf16.msra.mxu1 %v5339_v22  ;;  %5396 = vmatprep.subr.bf16.mxu0 %v5395_v50  ;;  %v1592_v22 = vld [vmem:[#allocation2 + $0x610] sm:$0xff] }
 0x420   : > { %5344 = vmatprep.subr.bf16.mxu1 %v5343_v25  ;;  %v5399_v26 = vpack.c.bf16 %v1593_v23, %v1592_v22  ;;  %v1936_v22 = vld [vmem:[#allocation2 + $0x860] sm:$0xff]  ;;  %v1937_v23 = vld [vmem:[#allocation2 + $0x868] sm:$0xff] }
 0x423   : > { %5346 = vmatpush3.bf16.msra.mxu1 %v5343_v25 }
 0x424   : > { %5348 = vmatprep.subr.bf16.mxu1 %v5347_v28 }
 0x427   : > { %5350 = vmatpush3.bf16.msra.mxu1 %v5347_v28 }
 0x428   : > { %5352 = vmatprep.subr.bf16.mxu1 %v5351_v31 }
 0x42b   : > { %5354 = vmatpush3.bf16.msra.mxu1 %v5351_v31  ;;  %v5407_v31 = vpack.c.bf16 %v1597_v30, %v1596_v29  ;;  %v2242_v29 = vld [vmem:[#allocation2 + $0x988] sm:$0xff]  ;;  %v2243_v30 = vld [vmem:[#allocation2 + $0x990] sm:$0xff] }
 0x42c   : > { %5356 = vmatprep.subr.bf16.mxu1 %v5355_v34 }
 0x42f   : > { %5358 = vmatpush3.bf16.msra.mxu1 %v5355_v34  ;;  %v5411_v34 = vpack.c.bf16 %v1599_v33, %v1598_v32  ;;  %v2244_v32 = vld [vmem:[#allocation2 + $0x998] sm:$0xff] }
 0x430   : > { %5360 = vmatprep.subr.bf16.mxu1 %v5359_v37  ;;  %v5559_v33 = vpack.c.bf16 %v2244_v32, %v2243_v30  ;;  %v2101_v30 = vld [vmem:[#allocation2 + $0x888] sm:$0xff]  ;;  %v2102_v32 = vld [vmem:[#allocation2 + $0x890] sm:$0xff] }
 0x433   : > { %5362 = vmatpush3.bf16.msra.mxu1 %v5359_v37  ;;  %v5415_v37 = vpack.c.bf16 %v1601_v36, %v1600_v35  ;;  %v2246_v35 = vld [vmem:[#allocation2 + $0x9a8] sm:$0xff] }
 0x434   : > { %5460 = vmatprep.subr.bf16.mxu1 %v5459_v54 }
 0x436   : > { %4425 = vmatmul.mubr.f32.vlgmr.msra.gmra.mrb[2].mxu1 %v6332_v53  ;;  %v1926_v53 = vld [vmem:[#allocation2 + $0x810] sm:$0xff] }
 0x437   : > { %v5463_v56 = vpack.c.bf16 %v1927_v55, %v1926_v53  ;;  %5462 = vmatpush3.bf16.msra.mxu1 %v5459_v54  ;;  %v1788_v53 = vld [vmem:[#allocation2 + $0x720] sm:$0xff]  ;;  %v1789_v54 = vld [vmem:[#allocation2 + $0x728] sm:$0xff] }
 0x439   : > { %5464 = vmatprep.subr.bf16.mxu1 %v5463_v56 }
 0x43b   : > { %5466 = vmatpush3.bf16.msra.mxu1 %v5463_v56  ;;  %v5435_v56 = vpack.c.bf16 %v1789_v54, %v1788_v53  ;;  %v1909_v54 = vld [vmem:[#allocation2 + $0x790] sm:$0xff] }
 0x43c   : > { %5468 = vmatprep.subr.bf16.mxu1 %v5467_v60 }
 0x43f   : > { %5470 = vmatpush3.bf16.msra.mxu1 %v5467_v60  ;;  %v5439_v60 = vpack.c.bf16 %v1791_v59, %v1790_v58 }
 0x440   : > { %5472 = vmatprep.subr.bf16.mxu1 %v5471_v2 }
 0x443   : > { %5474 = vmatpush3.bf16.msra.mxu1 %v5471_v2  ;;  %v5443_v2 = vpack.c.bf16 %v1793_v0, %v1792_v61 }
 0x444   : > { %5476 = vmatprep.subr.bf16.mxu1 %v5475_v44 }
 0x447   : > { %5478 = vmatpush3.bf16.msra.mxu1 %v5475_v44  ;;  %v5447_v44 = vpack.c.bf16 %v1795_v4, %v1794_v3 }
 0x509   : > { %v4426_v16 = vpop.f32.mrb[2].mxu1 }
 0x50a   : > { %v1575_v6 = vadd.f32 %v4426_v16, %v3483_v5  ;;  %v1555_v7 = vpop.f32.mrb[3].mxu1  ;;  %v1797_v16 = vld [vmem:[#allocation2 + $0x768] sm:$0xff] }
 0x50b   : > { %v1574_v8 = vadd.f32 %v3483_v5, %v1555_v7  ;;  %v1796_v5 = vld [vmem:[#allocation2 + $0x760] sm:$0xff]  ;;  %v1798_v7 = vld [vmem:[#allocation2 + $0x770] sm:$0xff] }
 0x50c   : > { %v1579_v9 = vrot.slane %v1575_v6, 7  ;;  %v5451_v6 = vpack.c.bf16 %v1797_v16, %v1796_v5 }
 0x50d   : > { %v1578_v10 = vrot.slane %v1574_v8, 7  ;;  %v1799_v8 = vld [vmem:[#allocation2 + $0x778] sm:$0xff] }
 0x50e   : > { %v1586_v11 = vadd.f32 %v1579_v9, %v6304_v62 }
 0x50f   : > { %v1580_v12 = vsel %vm313_vm0, %v1578_v10, %v1579_v9  ;;  %v1584_v17 = vadd.f32 %v1578_v10, %v6311_v1  ;;  %v5455_v9 = vpack.c.bf16 %v1799_v8, %v1798_v7  ;;  %v1911_v7 = vld [vmem:[#allocation2 + $0x7a0] sm:$0xff]  ;;  %v1912_v8 = vld [vmem:[#allocation2 + $0x7a8] sm:$0xff] }
 0x510   : > { %v6341_v18 = vsel %vm313_vm0, %v1586_v11, 0.0  ;;  %v6344_v19 = vadd.f32 %v1580_v12, %v6307_v63  ;;  %v1595_v63 = vld [vmem:[#allocation2 + $0x628] sm:$0xff]  ;;  %v1934_v12 = vld [vmem:[#allocation2 + $0x850] sm:$0xff] }
 0x511   : > { %v1629_v20 = vrot.slane %v6341_v18, 1  ;;  %v6348_v21 = vsel %vm313_vm0, 0.0, %v1584_v17  ;;  %v5403_v28 = vpack.c.bf16 %v1595_v63, %v1594_v27  ;;  %v1803_v10 = vrot.slane %v6341_v18, 2  ;;  %v1908_v27 = vld [vmem:[#allocation2 + $0x788] sm:$0xff] }
 0x512   : > { %v1626_v24 = vrot.slane %v6348_v21, 1  ;;  %v1627_v62 = vrot.slane %v6344_v19, 1  ;;  %v1801_v51 = vrot.slane %v6344_v19, 2 }
 0x514   : > { %v1628_v25 = vsel %vm357_vm1, %v1626_v24, %v1627_v62  ;;  %v1630_v1 = vsel %vm357_vm1, %v1627_v62, %v1629_v20  ;;  %v1804_v11 = vsel %vm532_vm3, %v1801_v51, %v1803_v10  ;;  %v5483_v24 = vpack.c.bf16 %v1937_v23, %v1936_v22  ;;  %v1938_v62 = vld [vmem:[#allocation2 + $0x870] sm:$0xff] }
 0x515   : > { %4459 = vmatprep.mubr.f32.mxu0 %v1628_v25  ;;  %v1939_v25 = vld [vmem:[#allocation2 + $0x878] sm:$0xff]  ;;  %v1913_v10 = vld [vmem:[#allocation2 + $0x7b0] sm:$0xff] }
 0x516   : > { %4460 = vmatmul.mubr.f32.vlgmr.msra.gmra.mrb[4].mxu0 %v1630_v1  ;;  %v5487_v1 = vpack.c.bf16 %v1939_v25, %v1938_v62  ;;  %v1917_v23 = vld [vmem:[#allocation2 + $0x7d0] sm:$0xff]  ;;  %v1919_v25 = vld [vmem:[#allocation2 + $0x7e0] sm:$0xff] }
 0x517   : > { %5398 = vmatpush3.bf16.msra.mxu0 %v5395_v50  ;;  %4494 = vmatprep.mubr.msk.f32.mxu0 %vm6275_vm2, %v1584_v17  ;;  %v1800_v50 = vrot.slane %v6348_v21, 2  ;;  %v1935_v17 = vld [vmem:[#allocation2 + $0x858] sm:$0xff] }
 0x518   : > { %5400 = vmatprep.subr.bf16.mxu0 %v5399_v26  ;;  %v5479_v20 = vpack.c.bf16 %v1935_v17, %v1934_v12  ;;  %v1915_v17 = vld [vmem:[#allocation2 + $0x7c0] sm:$0xff] }
 0x519   : > { %v1802_v55 = vsel %vm532_vm3, %v1800_v50, %v1801_v51 }
 0x51a   : > { %5480 = vmatprep.subr.bf16.mxu1 %v5479_v20 }
 0x51b   : > { %5402 = vmatpush3.bf16.msra.mxu0 %v5399_v26  ;;  %5482 = vmatpush3.bf16.msra.mxu1 %v5479_v20  ;;  %v1907_v26 = vld [vmem:[#allocation2 + $0x780] sm:$0xff]  ;;  %v1916_v20 = vld [vmem:[#allocation2 + $0x7c8] sm:$0xff] }
 0x51c   : > { %5404 = vmatprep.subr.bf16.mxu0 %v5403_v28  ;;  %5484 = vmatprep.subr.bf16.mxu1 %v5483_v24  ;;  %v5491_v63 = vpack.c.bf16 %v1908_v27, %v1907_v26  ;;  %v5507_v22 = vpack.c.bf16 %v1916_v20, %v1915_v17  ;;  %v1921_v27 = vld [vmem:[#allocation2 + $0x7f0] sm:$0xff]  ;;  %v2565_v20 = vld [vmem:[#allocation2 + $0xb38] sm:$0xff] }
 0x51d   : > { %v2564_v17 = vld [vmem:[#allocation2 + $0xb30] sm:$0xff] }
 0x51f   : > { %5406 = vmatpush3.bf16.msra.mxu0 %v5403_v28  ;;  %5486 = vmatpush3.bf16.msra.mxu1 %v5483_v24  ;;  %v2241_v28 = vld [vmem:[#allocation2 + $0x980] sm:$0xff]  ;;  %v1918_v24 = vld [vmem:[#allocation2 + $0x7d8] sm:$0xff] }
 0x520   : > { %5408 = vmatprep.subr.bf16.mxu0 %v5407_v31  ;;  %5488 = vmatprep.subr.bf16.mxu1 %v5487_v1  ;;  %v5511_v62 = vpack.c.bf16 %v1918_v24, %v1917_v23  ;;  %v2566_v23 = vld [vmem:[#allocation2 + $0xb40] sm:$0xff]  ;;  %v2567_v24 = vld [vmem:[#allocation2 + $0xb48] sm:$0xff] }
 0x523   : > { %5410 = vmatpush3.bf16.msra.mxu0 %v5407_v31  ;;  %5490 = vmatpush3.bf16.msra.mxu1 %v5487_v1  ;;  %v5555_v31 = vpack.c.bf16 %v2242_v29, %v2241_v28  ;;  %v1920_v1 = vld [vmem:[#allocation2 + $0x7e8] sm:$0xff]  ;;  %v2100_v29 = vld [vmem:[#allocation2 + $0x880] sm:$0xff] }
 0x524   : > { %5412 = vmatprep.subr.bf16.mxu0 %v5411_v34  ;;  %5492 = vmatprep.subr.bf16.mxu1 %v5491_v63  ;;  %v5515_v26 = vpack.c.bf16 %v1920_v1, %v1919_v25  ;;  %v3489_v25 = vld [vmem:[#allocation6 + $0x5] ss:$0 sm:$0xff] }
 0x527   : > { %5414 = vmatpush3.bf16.msra.mxu0 %v5411_v34  ;;  %v2245_v34 = vld [vmem:[#allocation2 + $0x9a0] sm:$0xff] }
 0x528   : > { %5416 = vmatprep.subr.bf16.mxu0 %v5415_v37  ;;  %v5563_v36 = vpack.c.bf16 %v2246_v35, %v2245_v34  ;;  %v2104_v35 = vld [vmem:[#allocation2 + $0x8a0] sm:$0xff] }
 0x52b   : > { %5418 = vmatpush3.bf16.msra.mxu0 %v5415_v37  ;;  %v2247_v37 = vld [vmem:[#allocation2 + $0x9b0] sm:$0xff] }
 0x52c   : > { %5420 = vmatprep.subr.bf16.mxu0 %v5419_v40  ;;  %v5567_v39 = vpack.c.bf16 %v2248_v38, %v2247_v37  ;;  %v2106_v38 = vld [vmem:[#allocation2 + $0x8b0] sm:$0xff] }
 0x52f   : > { %5422 = vmatpush3.bf16.msra.mxu0 %v5419_v40  ;;  %v2249_v40 = vld [vmem:[#allocation2 + $0x9c0] sm:$0xff] }
 0x530   : > { %5424 = vmatprep.subr.bf16.mxu0 %v5423_v43  ;;  %v5571_v42 = vpack.c.bf16 %v2250_v41, %v2249_v40  ;;  %v2108_v41 = vld [vmem:[#allocation2 + $0x8c0] sm:$0xff] }
 0x533   : > { %5426 = vmatpush3.bf16.msra.mxu0 %v5423_v43  ;;  %v3486_v43 = vld [vmem:[#allocation6 + $0x4] ss:$0 sm:$0xff] }
 0x534   : > { %5428 = vmatprep.subr.bf16.mxu0 %v5427_v47 }
 0x536   : > { %4495 = vmatmul.mubr.f32.vlgmr.msra.gmra.mrb[4].mxu0 %v6344_v19 }
 0x537   : > { %5430 = vmatpush3.bf16.msra.mxu0 %v5427_v47  ;;  %4529 = vmatprep.mubr.f32.mxu0 %v1802_v55  ;;  %v1910_v55 = vld [vmem:[#allocation2 + $0x798] sm:$0xff] }
 0x538   : > { %5432 = vmatprep.subr.bf16.mxu0 %v5431_v52  ;;  %v5495_v4 = vpack.c.bf16 %v1910_v55, %v1909_v54  ;;  %v2251_v54 = vld [vmem:[#allocation2 + $0x9d0] sm:$0xff]  ;;  %v2252_v55 = vld [vmem:[#allocation2 + $0x9d8] sm:$0xff] }
 0x53b   : > { %5434 = vmatpush3.bf16.msra.mxu0 %v5431_v52 }
 0x53c   : > { %5436 = vmatprep.subr.bf16.mxu0 %v5435_v56 }
 0x53f   : > { %5438 = vmatpush3.bf16.msra.mxu0 %v5435_v56 }
 0x540   : > { %5440 = vmatprep.subr.bf16.mxu0 %v5439_v60 }
 0x543   : > { %5442 = vmatpush3.bf16.msra.mxu0 %v5439_v60 }
 0x544   : > { %5444 = vmatprep.subr.bf16.mxu0 %v5443_v2 }
 0x547   : > { %5446 = vmatpush3.bf16.msra.mxu0 %v5443_v2 }
 0x548   : > { %5448 = vmatprep.subr.bf16.mxu0 %v5447_v44 }
 0x54b   : > { %5450 = vmatpush3.bf16.msra.mxu0 %v5447_v44 }
 0x54c   : > { %5452 = vmatprep.subr.bf16.mxu0 %v5451_v6 }
 0x54f   : > { %5454 = vmatpush3.bf16.msra.mxu0 %v5451_v6 }
 0x550   : > { %5456 = vmatprep.subr.bf16.mxu0 %v5455_v9 }
 0x553   : > { %5458 = vmatpush3.bf16.msra.mxu0 %v5455_v9  ;;  %v5499_v9 = vpack.c.bf16 %v1912_v8, %v1911_v7  ;;  %v2561_v8 = vld [vmem:[#allocation2 + $0xb18] sm:$0xff] }
 0x554   : > { %5556 = vmatprep.subr.bf16.mxu0 %v5555_v31 }
 0x556   : > { %4530 = vmatmul.mubr.f32.vlgmr.msra.gmra.mrb[4].mxu0 %v1804_v11  ;;  %v1914_v11 = vld [vmem:[#allocation2 + $0x7b8] sm:$0xff] }
 0x557   : > { %5558 = vmatpush3.bf16.msra.mxu0 %v5555_v31  ;;  %v5503_v12 = vpack.c.bf16 %v1914_v11, %v1913_v10  ;;  %v5523_v31 = vpack.c.bf16 %v2101_v30, %v2100_v29  ;;  %v2562_v10 = vld [vmem:[#allocation2 + $0xb20] sm:$0xff]  ;;  %v2563_v11 = vld [vmem:[#allocation2 + $0xb28] sm:$0xff] }
 0x558   : > { %5560 = vmatprep.subr.bf16.mxu0 %v5559_v33 }
 0x55b   : > { %5562 = vmatpush3.bf16.msra.mxu0 %v5559_v33  ;;  %v2103_v33 = vld [vmem:[#allocation2 + $0x898] sm:$0xff] }
 0x55c   : > { %5564 = vmatprep.subr.bf16.mxu0 %v5563_v36  ;;  %v5527_v34 = vpack.c.bf16 %v2103_v33, %v2102_v32 }
 0x55f   : > { %5566 = vmatpush3.bf16.msra.mxu0 %v5563_v36  ;;  %v2105_v36 = vld [vmem:[#allocation2 + $0x8a8] sm:$0xff] }
 0x560   : > { %5568 = vmatprep.subr.bf16.mxu0 %v5567_v39  ;;  %v5531_v37 = vpack.c.bf16 %v2105_v36, %v2104_v35 }
 0x563   : > { %5570 = vmatpush3.bf16.msra.mxu0 %v5567_v39  ;;  %v2107_v39 = vld [vmem:[#allocation2 + $0x8b8] sm:$0xff] }
 0x564   : > { %5572 = vmatprep.subr.bf16.mxu0 %v5571_v42  ;;  %v5535_v40 = vpack.c.bf16 %v2107_v39, %v2106_v38  ;;  %v2227_v38 = vld [vmem:[#allocation2 + $0x918] sm:$0xff] }
 0x567   : > { %5574 = vmatpush3.bf16.msra.mxu0 %v5571_v42  ;;  %v2109_v42 = vld [vmem:[#allocation2 + $0x8c8] sm:$0xff] }
 0x629   : > { %v4531_v45 = vpop.f32.mrb[4].mxu0 }
 0x62a   : > { %v1893_v46 = vadd.f32 %v4531_v45, %v3486_v43  ;;  %v1873_v47 = vpop.f32.mrb[5].mxu0  ;;  %v2110_v45 = vld [vmem:[#allocation2 + $0x8d0] sm:$0xff] }
 0x62b   : > { %v1892_v48 = vadd.f32 %v3486_v43, %v1873_v47  ;;  %v5539_v43 = vpack.c.bf16 %v2109_v42, %v2108_v41  ;;  %v2228_v42 = vld [vmem:[#allocation2 + $0x920] sm:$0xff] }
 0x62c   : > { %v1895_v49 = vmax.f32 %v1893_v46, 0.0  ;;  %v2111_v46 = vld [vmem:[#allocation2 + $0x8d8] sm:$0xff] }
 0x62d   : > { %v1894_v50 = vmax.f32 %v1892_v48, 0.0  ;;  %v5543_v47 = vpack.c.bf16 %v2111_v46, %v2110_v45  ;;  %v2112_v48 = vld [vmem:[#allocation2 + $0x8e0] sm:$0xff]  ;;  %v2230_v45 = vld [vmem:[#allocation2 + $0x930] sm:$0xff]  ;;  %v2231_v46 = vld [vmem:[#allocation2 + $0x938] sm:$0xff] }
 0x62e   : > { %v1899_v51 = vrot.slane %v1895_v49, 7  ;;  %v2113_v49 = vld [vmem:[#allocation2 + $0x8e8] sm:$0xff] }
 0x62f   : > { %v1898_v52 = vrot.slane %v1894_v50, 7  ;;  %v5547_v50 = vpack.c.bf16 %v2113_v49, %v2112_v48  ;;  %v2232_v48 = vld [vmem:[#allocation2 + $0x940] sm:$0xff]  ;;  %v2233_v49 = vld [vmem:[#allocation2 + $0x948] sm:$0xff] }
 0x630   : > { %v1905_v53 = vsel %vm313_vm0, %v1899_v51, 0.0 }
 0x631   : > { %v1945_v56 = vrot.slane %v1905_v53, 1  ;;  %v2119_v58 = vrot.slane %v1905_v53, 2  ;;  %v1900_v59 = vsel %vm313_vm0, %v1898_v52, %v1899_v51  ;;  %v1904_v60 = vsel %vm313_vm0, 0.0, %v1898_v52  ;;  %v2114_v51 = vld [vmem:[#allocation2 + $0x8f0] sm:$0xff] }
 0x632   : > { %v1942_v61 = vrot.slane %v1904_v60, 1  ;;  %v1943_v0 = vrot.slane %v1900_v59, 1  ;;  %v2116_v2 = vrot.slane %v1904_v60, 2  ;;  %v2117_v3 = vrot.slane %v1900_v59, 2 }
 0x634   : > { %v1944_v44 = vsel %vm357_vm1, %v1942_v61, %v1943_v0  ;;  %v1946_v5 = vsel %vm357_vm1, %v1943_v0, %v1945_v56  ;;  %v2118_v16 = vsel %vm532_vm3, %v2116_v2, %v2117_v3  ;;  %v6369_v6 = vsel %vm532_vm3, %v2117_v3, %v2119_v58  ;;  %v2253_v58 = vld [vmem:[#allocation2 + $0x9e0] sm:$0xff]  ;;  %v2255_v61 = vld [vmem:[#allocation2 + $0x9f0] sm:$0xff]  ;;  %v2256_v0 = vld [vmem:[#allocation2 + $0x9f8] sm:$0xff] }
 0x635   : > { %4564 = vmatprep.mubr.f32.mxu1 %v1944_v44  ;;  %v5575_v56 = vpack.c.bf16 %v2252_v55, %v2251_v54  ;;  %v5583_v2 = vpack.c.bf16 %v2256_v0, %v2255_v61  ;;  %v2224_v3 = vld [vmem:[#allocation2 + $0x900] sm:$0xff]  ;;  %v2237_v55 = vld [vmem:[#allocation2 + $0x968] sm:$0xff] }
 0x636   : > { %4565 = vmatmul.mubr.f32.vlgmr.msra.gmra.mrb[4].mxu1 %v1946_v5  ;;  %v2558_v5 = vld [vmem:[#allocation2 + $0xb00] sm:$0xff]  ;;  %v2419_v0 = vld [vmem:[#allocation2 + $0xa08] sm:$0xff] }
 0x637   : > { %5494 = vmatpush3.bf16.msra.mxu1 %v5491_v63  ;;  %4599 = vmatprep.mubr.msk.f32.mxu1 %vm6275_vm2, %v1898_v52  ;;  %v1922_v63 = vld [vmem:[#allocation2 + $0x7f8] sm:$0xff]  ;;  %v2236_v54 = vld [vmem:[#allocation2 + $0x960] sm:$0xff] }
 0x638   : > { %5496 = vmatprep.subr.bf16.mxu1 %v5495_v4  ;;  %v5519_v28 = vpack.c.bf16 %v1922_v63, %v1921_v27  ;;  %v2115_v52 = vld [vmem:[#allocation2 + $0x8f8] sm:$0xff]  ;;  %5576 = vmatprep.subr.bf16.mxu0 %v5575_v56  ;;  %v2418_v61 = vld [vmem:[#allocation2 + $0xa00] sm:$0xff] }
 0x639   : > { %v5551_v53 = vpack.c.bf16 %v2115_v52, %v2114_v51  ;;  %5578 = vmatpush3.bf16.msra.mxu0 %v5575_v56  ;;  %v2234_v51 = vld [vmem:[#allocation2 + $0x950] sm:$0xff]  ;;  %v2235_v52 = vld [vmem:[#allocation2 + $0x958] sm:$0xff]  ;;  %v5611_v56 = vpack.c.bf16 %v2237_v55, %v2236_v54 }
 0x63a   : > { %v2543_v54 = vld [vmem:[#allocation2 + $0xa90] sm:$0xff]  ;;  %v2544_v55 = vld [vmem:[#allocation2 + $0xa98] sm:$0xff] }
 0x63b   : > { %5498 = vmatpush3.bf16.msra.mxu1 %v5495_v4  ;;  %v2225_v4 = vld [vmem:[#allocation2 + $0x908] sm:$0xff] }
 0x63c   : > { %5500 = vmatprep.subr.bf16.mxu1 %v5499_v9  ;;  %v5587_v44 = vpack.c.bf16 %v2225_v4, %v2224_v3  ;;  %v2420_v3 = vld [vmem:[#allocation2 + $0xa10] sm:$0xff]  ;;  %v2421_v4 = vld [vmem:[#allocation2 + $0xa18] sm:$0xff] }
 0x63f   : > { %5502 = vmatpush3.bf16.msra.mxu1 %v5499_v9 }
 0x640   : > { %5504 = vmatprep.subr.bf16.mxu1 %v5503_v12 }
 0x643   : > { %5506 = vmatpush3.bf16.msra.mxu1 %v5503_v12  ;;  %v5659_v12 = vpack.c.bf16 %v2563_v11, %v2562_v10  ;;  %v2424_v10 = vld [vmem:[#allocation2 + $0xa30] sm:$0xff]  ;;  %v2425_v11 = vld [vmem:[#allocation2 + $0xa38] sm:$0xff] }
 0x644   : > { %5508 = vmatprep.subr.bf16.mxu1 %v5507_v22 }
 0x647   : > { %5510 = vmatpush3.bf16.msra.mxu1 %v5507_v22  ;;  %v5663_v22 = vpack.c.bf16 %v2565_v20, %v2564_v17  ;;  %v2426_v17 = vld [vmem:[#allocation2 + $0xa40] sm:$0xff]  ;;  %v2427_v20 = vld [vmem:[#allocation2 + $0xa48] sm:$0xff] }
 0x648   : > { %5512 = vmatprep.subr.bf16.mxu1 %v5511_v62 }
 0x64b   : > { %5514 = vmatpush3.bf16.msra.mxu1 %v5511_v62  ;;  %v5667_v62 = vpack.c.bf16 %v2567_v24, %v2566_v23  ;;  %v2428_v23 = vld [vmem:[#allocation2 + $0xa50] sm:$0xff]  ;;  %v2429_v24 = vld [vmem:[#allocation2 + $0xa58] sm:$0xff] }
 0x64c   : > { %5516 = vmatprep.subr.bf16.mxu1 %v5515_v26 }
 0x64f   : > { %5518 = vmatpush3.bf16.msra.mxu1 %v5515_v26 }
 0x650   : > { %5520 = vmatprep.subr.bf16.mxu1 %v5519_v28 }
 0x653   : > { %5522 = vmatpush3.bf16.msra.mxu1 %v5519_v28 }
 0x654   : > { %5524 = vmatprep.subr.bf16.mxu1 %v5523_v31 }
 0x656   : > { %4600 = vmatmul.mubr.f32.vlgmr.msra.gmra.mrb[4].mxu1 %v1900_v59  ;;  %v2254_v59 = vld [vmem:[#allocation2 + $0x9e8] sm:$0xff] }
 0x657   : > { %5526 = vmatpush3.bf16.msra.mxu1 %v5523_v31  ;;  %4634 = vmatprep.mubr.f32.mxu1 %v2118_v16  ;;  %v5579_v60 = vpack.c.bf16 %v2254_v59, %v2253_v58  ;;  %v2559_v16 = vld [vmem:[#allocation2 + $0xb08] sm:$0xff]  ;;  %v2238_v58 = vld [vmem:[#allocation2 + $0x970] sm:$0xff]  ;;  %v2239_v59 = vld [vmem:[#allocation2 + $0x978] sm:$0xff] }
 0x658   : > { %5528 = vmatprep.subr.bf16.mxu1 %v5527_v34  ;;  %v5651_v7 = vpack.c.bf16 %v2559_v16, %v2558_v5  ;;  %v5623_v16 = vpack.c.bf16 %v2421_v4, %v2420_v3  ;;  %v5687_v4 = vpack.c.bf16 %v2544_v55, %v2543_v54  ;;  %v6060_v54 = vmov 0.0|0.0  }
 0x659   : > { %5580 = vmatprep.subr.bf16.mxu0 %v5579_v60  ;;  %v6062_v55 = vmov 0.0  }
 0x65a   : > { %5582 = vmatpush3.bf16.msra.mxu0 %v5579_v60  ;;  %v5615_v60 = vpack.c.bf16 %v2239_v59, %v2238_v58 }
 0x65b   : > { %5530 = vmatpush3.bf16.msra.mxu1 %v5527_v34  ;;  %5584 = vmatprep.subr.bf16.mxu0 %v5583_v2 }
 0x65c   : > { %5532 = vmatprep.subr.bf16.mxu1 %v5531_v37 }
 0x65e   : > { %5586 = vmatpush3.bf16.msra.mxu0 %v5583_v2  ;;  %v5619_v2 = vpack.c.bf16 %v2419_v0, %v2418_v61 }
 0x65f   : > { %5534 = vmatpush3.bf16.msra.mxu1 %v5531_v37  ;;  %5588 = vmatprep.subr.bf16.mxu0 %v5587_v44  ;;  %v2226_v37 = vld [vmem:[#allocation2 + $0x910] sm:$0xff] }
 0x660   : > { %5536 = vmatprep.subr.bf16.mxu1 %v5535_v40  ;;  %v5591_v41 = vpack.c.bf16 %v2227_v38, %v2226_v37  ;;  %v2570_v37 = vld [vmem:[#allocation2 + $0xb60] sm:$0xff]  ;;  %v2571_v38 = vld [vmem:[#allocation2 + $0xb68] sm:$0xff] }
 0x663   : > { %5538 = vmatpush3.bf16.msra.mxu1 %v5535_v40 }
 0x664   : > { %5540 = vmatprep.subr.bf16.mxu1 %v5539_v43 }
 0x667   : > { %5542 = vmatpush3.bf16.msra.mxu1 %v5539_v43 }
 0x668   : > { %5544 = vmatprep.subr.bf16.mxu1 %v5543_v47 }
 0x66b   : > { %5546 = vmatpush3.bf16.msra.mxu1 %v5543_v47  ;;  %v5599_v47 = vpack.c.bf16 %v2231_v46, %v2230_v45 }
 0x66c   : > { %5548 = vmatprep.subr.bf16.mxu1 %v5547_v50 }
 0x66f   : > { %5550 = vmatpush3.bf16.msra.mxu1 %v5547_v50  ;;  %v5603_v50 = vpack.c.bf16 %v2233_v49, %v2232_v48 }
 0x670   : > { %5552 = vmatprep.subr.bf16.mxu1 %v5551_v53 }
 0x673   : > { %5554 = vmatpush3.bf16.msra.mxu1 %v5551_v53  ;;  %v5607_v53 = vpack.c.bf16 %v2235_v52, %v2234_v51 }
 0x674   : > { %5652 = vmatprep.subr.bf16.mxu1 %v5651_v7 }
 0x676   : > { %4635 = vmatmul.mubr.f32.vlgmr.msra.gmra.mrb[4].mxu1 %v6369_v6  ;;  %v2560_v6 = vld [vmem:[#allocation2 + $0xb10] sm:$0xff] }
 0x677   : > { %v5655_v9 = vpack.c.bf16 %v2561_v8, %v2560_v6  ;;  %5654 = vmatpush3.bf16.msra.mxu1 %v5651_v7  ;;  %v2422_v6 = vld [vmem:[#allocation2 + $0xa20] sm:$0xff]  ;;  %v2423_v7 = vld [vmem:[#allocation2 + $0xa28] sm:$0xff] }
 0x679   : > { %5656 = vmatprep.subr.bf16.mxu1 %v5655_v9 }
 0x67b   : > { %5658 = vmatpush3.bf16.msra.mxu1 %v5655_v9  ;;  %v5627_v9 = vpack.c.bf16 %v2423_v7, %v2422_v6  ;;  %v2545_v7 = vld [vmem:[#allocation2 + $0xaa0] sm:$0xff] }
 0x67c   : > { %5660 = vmatprep.subr.bf16.mxu1 %v5659_v12 }
 0x67f   : > { %5662 = vmatpush3.bf16.msra.mxu1 %v5659_v12  ;;  %v5631_v12 = vpack.c.bf16 %v2425_v11, %v2424_v10  ;;  %v2547_v10 = vld [vmem:[#allocation2 + $0xab0] sm:$0xff]  ;;  %v2548_v11 = vld [vmem:[#allocation2 + $0xab8] sm:$0xff] }
 0x680   : > { %5664 = vmatprep.subr.bf16.mxu1 %v5663_v22 }
 0x683   : > { %5666 = vmatpush3.bf16.msra.mxu1 %v5663_v22  ;;  %v5635_v22 = vpack.c.bf16 %v2427_v20, %v2426_v17  ;;  %v2549_v17 = vld [vmem:[#allocation2 + $0xac0] sm:$0xff]  ;;  %v2550_v20 = vld [vmem:[#allocation2 + $0xac8] sm:$0xff] }
 0x684   : > { %5668 = vmatprep.subr.bf16.mxu1 %v5667_v62 }
 0x687   : > { %5670 = vmatpush3.bf16.msra.mxu1 %v5667_v62  ;;  %v5639_v62 = vpack.c.bf16 %v2429_v24, %v2428_v23  ;;  %v2551_v23 = vld [vmem:[#allocation2 + $0xad0] sm:$0xff]  ;;  %v2552_v24 = vld [vmem:[#allocation2 + $0xad8] sm:$0xff] }
 0x749   : > { %v4636_v1 = vpop.f32.mrb[4].mxu1 }
 0x74a   : > { %v2209_v26 = vadd.f32 %v4636_v1, %v3489_v25  ;;  %v2189_v27 = vpop.f32.mrb[5].mxu1  ;;  %v2431_v1 = vld [vmem:[#allocation2 + $0xa68] sm:$0xff] }
 0x74b   : > { %v2208_v63 = vadd.f32 %v3489_v25, %v2189_v27  ;;  %v2430_v25 = vld [vmem:[#allocation2 + $0xa60] sm:$0xff]  ;;  %v2432_v27 = vld [vmem:[#allocation2 + $0xa70] sm:$0xff] }
 0x74c   : > { %v2213_v28 = vrot.slane %v2209_v26, 7  ;;  %v5643_v26 = vpack.c.bf16 %v2431_v1, %v2430_v25  ;;  %v2553_v25 = vld [vmem:[#allocation2 + $0xae0] sm:$0xff]  ;;  %v2554_v1 = vld [vmem:[#allocation2 + $0xae8] sm:$0xff] }
 0x74d   : > { %v2212_v29 = vrot.slane %v2208_v63, 7  ;;  %v2433_v63 = vld [vmem:[#allocation2 + $0xa78] sm:$0xff] }
 0x74e   : > { %v2220_v30 = vadd.f32 %v2213_v28, %v6341_v18 }
 0x74f   : > { %v2214_v31 = vsel %vm313_vm0, %v2212_v29, %v2213_v28  ;;  %v2218_v32 = vadd.f32 %v2212_v29, %v6348_v21  ;;  %v5647_v28 = vpack.c.bf16 %v2433_v63, %v2432_v27  ;;  %v2555_v27 = vld [vmem:[#allocation2 + $0xaf0] sm:$0xff]  ;;  %v2556_v63 = vld [vmem:[#allocation2 + $0xaf8] sm:$0xff] }
 0x750   : > { %v6378_v33 = vsel %vm313_vm0, %v2220_v30, 0.0  ;;  %v6381_v34 = vadd.f32 %v2214_v31, %v6344_v19  ;;  %v2229_v19 = vld [vmem:[#allocation2 + $0x928] sm:$0xff]  ;;  %v2568_v31 = vld [vmem:[#allocation2 + $0xb50] sm:$0xff] }
 0x751   : > { %v2263_v35 = vrot.slane %v6378_v33, 1  ;;  %v6385_v36 = vsel %vm313_vm0, 0.0, %v2218_v32  ;;  %v5595_v43 = vpack.c.bf16 %v2229_v19, %v2228_v42  ;;  %v2437_v29 = vrot.slane %v6378_v33, 2  ;;  %v2542_v42 = vld [vmem:[#allocation2 + $0xa88] sm:$0xff] }
 0x752   : > { %v2260_v39 = vrot.slane %v6385_v36, 1  ;;  %v2261_v18 = vrot.slane %v6381_v34, 1  ;;  %v2435_v5 = vrot.slane %v6381_v34, 2 }
 0x754   : > { %v2262_v40 = vsel %vm357_vm1, %v2260_v39, %v2261_v18  ;;  %v2264_v21 = vsel %vm357_vm1, %v2261_v18, %v2263_v35  ;;  %v2438_v30 = vsel %vm532_vm3, %v2435_v5, %v2437_v29  ;;  %v5675_v39 = vpack.c.bf16 %v2571_v38, %v2570_v37  ;;  %v2572_v18 = vld [vmem:[#allocation2 + $0xb70] sm:$0xff]  ;;  %v2734_v29 = vld [vmem:[#allocation2 + $0xb80] sm:$0xff] }
 0x755   : > { %4669 = vmatprep.mubr.f32.mxu0 %v2262_v40  ;;  %v2573_v40 = vld [vmem:[#allocation2 + $0xb78] sm:$0xff]  ;;  %v2738_v38 = vld [vmem:[#allocation2 + $0xba0] sm:$0xff] }
 0x756   : > { %4670 = vmatmul.mubr.f32.vlgmr.msra.gmra.mrb[6].mxu0 %v2264_v21  ;;  %v5679_v21 = vpack.c.bf16 %v2573_v40, %v2572_v18  ;;  %v2740_v40 = vld [vmem:[#allocation2 + $0xbb0] sm:$0xff] }
 0x757   : > { %5590 = vmatpush3.bf16.msra.mxu0 %v5587_v44  ;;  %4704 = vmatprep.mubr.msk.f32.mxu0 %vm6275_vm2, %v2218_v32  ;;  %v2434_v44 = vrot.slane %v6385_v36, 2  ;;  %v2569_v32 = vld [vmem:[#allocation2 + $0xb58] sm:$0xff] }
 0x758   : > { %5592 = vmatprep.subr.bf16.mxu0 %v5591_v41  ;;  %v5671_v35 = vpack.c.bf16 %v2569_v32, %v2568_v31  ;;  %v2736_v32 = vld [vmem:[#allocation2 + $0xb90] sm:$0xff] }
 0x759   : > { %v2436_v8 = vsel %vm532_vm3, %v2434_v44, %v2435_v5 }
 0x75a   : > { %5672 = vmatprep.subr.bf16.mxu1 %v5671_v35 }
 0x75b   : > { %5594 = vmatpush3.bf16.msra.mxu0 %v5591_v41  ;;  %5674 = vmatpush3.bf16.msra.mxu1 %v5671_v35  ;;  %v2541_v41 = vld [vmem:[#allocation2 + $0xa80] sm:$0xff]  ;;  %v2737_v35 = vld [vmem:[#allocation2 + $0xb98] sm:$0xff] }
 0x75c   : > { %5596 = vmatprep.subr.bf16.mxu0 %v5595_v43  ;;  %5676 = vmatprep.subr.bf16.mxu1 %v5675_v39  ;;  %v5683_v19 = vpack.c.bf16 %v2542_v42, %v2541_v41  ;;  %v5719_v37 = vpack.c.bf16 %v2737_v35, %v2736_v32  ;;  %v2742_v42 = vld [vmem:[#allocation2 + $0xbc0] sm:$0xff] }
 0x75f   : > { %5598 = vmatpush3.bf16.msra.mxu0 %v5595_v43  ;;  %5678 = vmatpush3.bf16.msra.mxu1 %v5675_v39  ;;  %v3492_v43 = vld [vmem:[#allocation6 + $0x6] ss:$0 sm:$0xff]  ;;  %v2739_v39 = vld [vmem:[#allocation2 + $0xba8] sm:$0xff] }
 0x760   : > { %5600 = vmatprep.subr.bf16.mxu0 %v5599_v47  ;;  %5680 = vmatprep.subr.bf16.mxu1 %v5679_v21  ;;  %v5723_v18 = vpack.c.bf16 %v2739_v39, %v2738_v38 }
 0x763   : > { %5602 = vmatpush3.bf16.msra.mxu0 %v5599_v47  ;;  %5682 = vmatpush3.bf16.msra.mxu1 %v5679_v21  ;;  %v2741_v21 = vld [vmem:[#allocation2 + $0xbb8] sm:$0xff] }
 0x764   : > { %5604 = vmatprep.subr.bf16.mxu0 %v5603_v50  ;;  %5684 = vmatprep.subr.bf16.mxu1 %v5683_v19  ;;  %v5727_v41 = vpack.c.bf16 %v2741_v21, %v2740_v40  ;;  %v3035_v21 = vld [vmem:[#allocation4 + $0x90] sm:$0xff] }
 0x767   : > { %5606 = vmatpush3.bf16.msra.mxu0 %v5603_v50 }
 0x768   : > { %5608 = vmatprep.subr.bf16.mxu0 %v5607_v53 }
 0x76b   : > { %5610 = vmatpush3.bf16.msra.mxu0 %v5607_v53 }
 0x76c   : > { %5612 = vmatprep.subr.bf16.mxu0 %v5611_v56 }
 0x76f   : > { %5614 = vmatpush3.bf16.msra.mxu0 %v5611_v56 }
 0x770   : > { %5616 = vmatprep.subr.bf16.mxu0 %v5615_v60 }
 0x773   : > { %5618 = vmatpush3.bf16.msra.mxu0 %v5615_v60 }
 0x774   : > { %5620 = vmatprep.subr.bf16.mxu0 %v5619_v2 }
 0x776   : > { %4705 = vmatmul.mubr.f32.vlgmr.msra.gmra.mrb[6].mxu0 %v6381_v34 }
 0x777   : > { %5622 = vmatpush3.bf16.msra.mxu0 %v5619_v2  ;;  %4739 = vmatprep.mubr.f32.mxu0 %v2436_v8  ;;  %v2546_v8 = vld [vmem:[#allocation2 + $0xaa8] sm:$0xff] }
 0x778   : > { %5624 = vmatprep.subr.bf16.mxu0 %v5623_v16 }
 0x77b   : > { %5626 = vmatpush3.bf16.msra.mxu0 %v5623_v16 }
 0x77c   : > { %5628 = vmatprep.subr.bf16.mxu0 %v5627_v9 }
 0x77f   : > { %5630 = vmatpush3.bf16.msra.mxu0 %v5627_v9  ;;  %v5691_v9 = vpack.c.bf16 %v2546_v8, %v2545_v7  ;;  %v2950_v7 = vld [vmem:[#allocation4 + $0x48] sm:$0xff] }
 0x780   : > { %5632 = vmatprep.subr.bf16.mxu0 %v5631_v12 }
 0x783   : > { %5634 = vmatpush3.bf16.msra.mxu0 %v5631_v12  ;;  %v5695_v12 = vpack.c.bf16 %v2548_v11, %v2547_v10  ;;  %v2952_v10 = vld [vmem:[#allocation4 + $0x58] sm:$0xff] }
 0x784   : > { %5636 = vmatprep.subr.bf16.mxu0 %v5635_v22 }
 0x787   : > { %5638 = vmatpush3.bf16.msra.mxu0 %v5635_v22  ;;  %v5699_v22 = vpack.c.bf16 %v2550_v20, %v2549_v17  ;;  %v2954_v17 = vld [vmem:[#allocation4 + $0x68] sm:$0xff] }
 0x788   : > { %5640 = vmatprep.subr.bf16.mxu0 %v5639_v62 }
 0x78b   : > { %5642 = vmatpush3.bf16.msra.mxu0 %v5639_v62  ;;  %v5703_v62 = vpack.c.bf16 %v2552_v24, %v2551_v23  ;;  %v2956_v23 = vld [vmem:[#allocation4 + $0x78] sm:$0xff] }
 0x78c   : > { %5644 = vmatprep.subr.bf16.mxu0 %v5643_v26 }
 0x78f   : > { %5646 = vmatpush3.bf16.msra.mxu0 %v5643_v26  ;;  %v5707_v26 = vpack.c.bf16 %v2554_v1, %v2553_v25 }
 0x790   : > { %5648 = vmatprep.subr.bf16.mxu0 %v5647_v28 }
 0x793   : > { %5650 = vmatpush3.bf16.msra.mxu0 %v5647_v28  ;;  %v5711_v28 = vpack.c.bf16 %v2556_v63, %v2555_v27 }
 0x794   : > { %5747 = vmatprep.subr.bf16.mxu0 %v6060_v54 }
 0x796   : > { %4740 = vmatmul.mubr.f32.vlgmr.msra.gmra.mrb[6].mxu0 %v2438_v30  ;;  %v2735_v30 = vld [vmem:[#allocation2 + $0xb88] sm:$0xff] }
 0x797   : > { %v5715_v31 = vpack.c.bf16 %v2735_v30, %v2734_v29  ;;  %4853 = vmatprep.mubr.msk.f32.mxu0 %vm6061_vm4, %v6062_v55 }
 0x869   : > { %v4741_v45 = vpop.f32.mrb[6].mxu0 }
 0x86a   : > { %v2527_v46 = vadd.f32 %v4741_v45, %v3492_v43  ;;  %v2507_v47 = vpop.f32.mrb[7].mxu0  ;;  %v2744_v45 = vld [vmem:[#allocation2 + $0xbd0] sm:$0xff] }
 0x86b   : > { %v2526_v48 = vadd.f32 %v3492_v43, %v2507_v47 }
 0x86c   : > { %v2529_v49 = vmax.f32 %v2527_v46, 0.0  ;;  %v2745_v46 = vld [vmem:[#allocation2 + $0xbd8] sm:$0xff] }
 0x86d   : > { %v2528_v50 = vmax.f32 %v2526_v48, 0.0  ;;  %v5735_v47 = vpack.c.bf16 %v2745_v46, %v2744_v45  ;;  %v2746_v48 = vld [vmem:[#allocation2 + $0xbe0] sm:$0xff]  ;;  %v3039_v46 = vld [vmem:[#allocation4 + $0xb0] sm:$0xff] }
 0x86e   : > { %v2533_v51 = vrot.slane %v2529_v49, 7  ;;  %v2747_v49 = vld [vmem:[#allocation2 + $0xbe8] sm:$0xff] }
 0x86f   : > { %v2532_v52 = vrot.slane %v2528_v50, 7  ;;  %v5739_v50 = vpack.c.bf16 %v2747_v49, %v2746_v48  ;;  %v3041_v49 = vld [vmem:[#allocation4 + $0xc0] sm:$0xff] }
 0x870   : > { %v2539_v53 = vsel %vm313_vm0, %v2533_v51, 0.0 }
 0x871   : > { %v2579_v56 = vrot.slane %v2539_v53, 1  ;;  %v2753_v58 = vrot.slane %v2539_v53, 2  ;;  %v2534_v59 = vsel %vm313_vm0, %v2532_v52, %v2533_v51  ;;  %v2538_v60 = vsel %vm313_vm0, 0.0, %v2532_v52  ;;  %v2748_v51 = vld [vmem:[#allocation2 + $0xbf0] sm:$0xff] }
 0x872   : > { %v2576_v61 = vrot.slane %v2538_v60, 1  ;;  %v2577_v0 = vrot.slane %v2534_v59, 1  ;;  %v2750_v2 = vrot.slane %v2538_v60, 2  ;;  %v2751_v3 = vrot.slane %v2534_v59, 2 }
 0x874   : > { %v2578_v44 = vsel %vm357_vm1, %v2576_v61, %v2577_v0  ;;  %v2580_v5 = vsel %vm357_vm1, %v2577_v0, %v2579_v56  ;;  %v2752_v16 = vsel %vm532_vm3, %v2750_v2, %v2751_v3  ;;  %v6406_v6 = vsel %vm532_vm3, %v2751_v3, %v2753_v58  ;;  %v2941_v56 = vld [vmem:[#allocation4] sm:$0xff]  ;;  %v2942_v58 = vld [vmem:[#allocation4 + $0x8] sm:$0xff]  ;;  %v2944_v61 = vld [vmem:[#allocation4 + $0x18] sm:$0xff] }
 0x875   : > { %4774 = vmatprep.mubr.f32.mxu1 %v2578_v44  ;;  %v5780_v60 = vpack.c.bf16 %v2942_v58, %v2941_v56  ;;  %v2945_v2 = vld [vmem:[#allocation4 + $0x20] sm:$0xff]  ;;  %v2946_v3 = vld [vmem:[#allocation4 + $0x28] sm:$0xff]  ;;  %v2947_v44 = vld [vmem:[#allocation4 + $0x30] sm:$0xff] }
 0x876   : > { %4775 = vmatmul.mubr.f32.vlgmr.msra.gmra.mrb[6].mxu1 %v2580_v5  ;;  %v2948_v5 = vld [vmem:[#allocation4 + $0x38] sm:$0xff]  ;;  %v3045_v58 = vld [vmem:[#allocation4 + $0xe0] sm:$0xff] }
 0x877   : > { %5686 = vmatpush3.bf16.msra.mxu1 %v5683_v19  ;;  %4809 = vmatprep.mubr.msk.f32.mxu1 %vm6275_vm2, %v2532_v52  ;;  %v2743_v19 = vld [vmem:[#allocation2 + $0xbc8] sm:$0xff]  ;;  %v2749_v52 = vld [vmem:[#allocation2 + $0xbf8] sm:$0xff] }
 0x878   : > { %5688 = vmatprep.subr.bf16.mxu1 %v5687_v4  ;;  %v5731_v43 = vpack.c.bf16 %v2743_v19, %v2742_v42  ;;  %v5743_v53 = vpack.c.bf16 %v2749_v52, %v2748_v51  ;;  %v3037_v19 = vld [vmem:[#allocation4 + $0xa0] sm:$0xff]  ;;  %v3043_v52 = vld [vmem:[#allocation4 + $0xd0] sm:$0xff] }
 0x87b   : > { %5690 = vmatpush3.bf16.msra.mxu1 %v5687_v4  ;;  %v5786_v4 = vpack.c.bf16 %v2946_v3, %v2945_v2  ;;  %v3265_v3 = vld [vmem:[#allocation4 + $0x100] sm:$0xff] }
 0x87c   : > { %5692 = vmatprep.subr.bf16.mxu1 %v5691_v9 }
 0x87f   : > { %5694 = vmatpush3.bf16.msra.mxu1 %v5691_v9  ;;  %v2951_v9 = vld [vmem:[#allocation4 + $0x50] sm:$0xff] }
 0x880   : > { %5696 = vmatprep.subr.bf16.mxu1 %v5695_v12  ;;  %v5795_v11 = vpack.c.bf16 %v2952_v10, %v2951_v9  ;;  %v3269_v9 = vld [vmem:[#allocation4 + $0x120] sm:$0xff]  ;;  %v3270_v10 = vld [vmem:[#allocation4 + $0x128] sm:$0xff] }
 0x883   : > { %5698 = vmatpush3.bf16.msra.mxu1 %v5695_v12  ;;  %v2953_v12 = vld [vmem:[#allocation4 + $0x60] sm:$0xff] }
 0x884   : > { %5700 = vmatprep.subr.bf16.mxu1 %v5699_v22  ;;  %v5798_v20 = vpack.c.bf16 %v2954_v17, %v2953_v12  ;;  %v5814_v12 = vpack.c.bf16 %v3270_v10, %v3269_v9 }
 0x887   : > { %5702 = vmatpush3.bf16.msra.mxu1 %v5699_v22  ;;  %v2955_v22 = vld [vmem:[#allocation4 + $0x70] sm:$0xff] }
 0x888   : > { %5704 = vmatprep.subr.bf16.mxu1 %v5703_v62  ;;  %v5801_v24 = vpack.c.bf16 %v2956_v23, %v2955_v22  ;;  %v3272_v22 = vld [vmem:[#allocation4 + $0x138] sm:$0xff] }
 0x889   : > { %v3190_v23 = vld [vmem:[#allocation7 + $0x10] sm:$0xff] }
 0x88b   : > { %5706 = vmatpush3.bf16.msra.mxu1 %v5703_v62  ;;  %v3495_v62 = vld [vmem:[#allocation6 + $0x7] ss:$0 sm:$0xff] }
 0x88c   : > { %5708 = vmatprep.subr.bf16.mxu1 %v5707_v26 }
 0x88f   : > { %5710 = vmatpush3.bf16.msra.mxu1 %v5707_v26 }
 0x890   : > { %5712 = vmatprep.subr.bf16.mxu1 %v5711_v28 }
 0x893   : > { %5714 = vmatpush3.bf16.msra.mxu1 %v5711_v28 }
 0x894   : > { %5716 = vmatprep.subr.bf16.mxu1 %v5715_v31 }
 0x896   : > { %4810 = vmatmul.mubr.f32.vlgmr.msra.gmra.mrb[6].mxu1 %v2534_v59  ;;  %v2943_v59 = vld [vmem:[#allocation4 + $0x10] sm:$0xff] }
 0x897   : > { %5718 = vmatpush3.bf16.msra.mxu1 %v5715_v31  ;;  %4844 = vmatprep.mubr.f32.mxu1 %v2752_v16  ;;  %v5783_v0 = vpack.c.bf16 %v2944_v61, %v2943_v59  ;;  %v5789_v16 = vpack.c.bf16 %v2948_v5, %v2947_v44  ;;  %v3046_v59 = vld [vmem:[#allocation4 + $0xe8] sm:$0xff]  ;;  %v3047_v61 = vld [vmem:[#allocation4 + $0xf0] sm:$0xff] }
 0x898   : > { %5720 = vmatprep.subr.bf16.mxu1 %v5719_v37  ;;  %v3267_v5 = vld [vmem:[#allocation4 + $0x110] sm:$0xff] }
 0x89b   : > { %5722 = vmatpush3.bf16.msra.mxu1 %v5719_v37 }
 0x89c   : > { %5724 = vmatprep.subr.bf16.mxu1 %v5723_v18 }
 0x89f   : > { %5726 = vmatpush3.bf16.msra.mxu1 %v5723_v18 }
 0x8a0   : > { %5728 = vmatprep.subr.bf16.mxu1 %v5727_v41 }
 0x8a3   : > { %5730 = vmatpush3.bf16.msra.mxu1 %v5727_v41  ;;  %v3036_v41 = vld [vmem:[#allocation4 + $0x98] sm:$0xff] }
 0x8a4   : > { %5732 = vmatprep.subr.bf16.mxu1 %v5731_v43  ;;  %v5759_v42 = vpack.c.bf16 %v3036_v41, %v3035_v21 }
 0x8a7   : > { %5734 = vmatpush3.bf16.msra.mxu1 %v5731_v43  ;;  %v3038_v43 = vld [vmem:[#allocation4 + $0xa8] sm:$0xff] }
 0x8a8   : > { %5736 = vmatprep.subr.bf16.mxu1 %v5735_v47  ;;  %v5762_v45 = vpack.c.bf16 %v3038_v43, %v3037_v19 }
 0x8ab   : > { %5738 = vmatpush3.bf16.msra.mxu1 %v5735_v47  ;;  %v3040_v47 = vld [vmem:[#allocation4 + $0xb8] sm:$0xff] }
 0x8ac   : > { %5740 = vmatprep.subr.bf16.mxu1 %v5739_v50  ;;  %v5765_v48 = vpack.c.bf16 %v3040_v47, %v3039_v46 }
 0x8af   : > { %5742 = vmatpush3.bf16.msra.mxu1 %v5739_v50  ;;  %v3042_v50 = vld [vmem:[#allocation4 + $0xc8] sm:$0xff] }
 0x8b0   : > { %5744 = vmatprep.subr.bf16.mxu1 %v5743_v53  ;;  %v5768_v51 = vpack.c.bf16 %v3042_v50, %v3041_v49 }
 0x8b3   : > { %5746 = vmatpush3.bf16.msra.mxu1 %v5743_v53  ;;  %v3044_v53 = vld [vmem:[#allocation4 + $0xd8] sm:$0xff] }
 0x8b4   : > { %5779 = vmatprep.subr.bf16.mxu1 %v6060_v54  ;;  %v5771_v56 = vpack.c.bf16 %v3044_v53, %v3043_v52 }
 0x8b6   : > { %4845 = vmatmul.mubr.f32.vlgmr.msra.gmra.mrb[6].mxu1 %v6406_v6  ;;  %v2949_v6 = vld [vmem:[#allocation4 + $0x40] sm:$0xff] }
 0x8b7   : > { %4932 = vmatprep.mubr.msk.f32.mxu1 %vm6061_vm4, %v6062_v55  ;;  %5781 = vmatpush3.bf16.msra.mxu1 %v5780_v60  ;;  %v5792_v8 = vpack.c.bf16 %v2950_v7, %v2949_v6  ;;  %v5774_v60 = vpack.c.bf16 %v3046_v59, %v3045_v58 }
 0x8b8   : > { %5782 = vmatprep.subr.bf16.mxu1 %v6060_v54 }
 0x8bb   : > { %5784 = vmatpush3.bf16.msra.mxu1 %v5783_v0  ;;  %v3048_v0 = vld [vmem:[#allocation4 + $0xf8] sm:$0xff] }
 0x8bc   : > { %5785 = vmatprep.subr.bf16.mxu1 %v6060_v54  ;;  %v5777_v2 = vpack.c.bf16 %v3048_v0, %v3047_v61 }
 0x8bf   : > { %5787 = vmatpush3.bf16.msra.mxu1 %v5786_v4  ;;  %v3266_v4 = vld [vmem:[#allocation4 + $0x108] sm:$0xff] }
 0x8c0   : > { %5788 = vmatprep.subr.bf16.mxu1 %v6060_v54  ;;  %v5808_v44 = vpack.c.bf16 %v3266_v4, %v3265_v3 }
 0x8c3   : > { %5790 = vmatpush3.bf16.msra.mxu1 %v5789_v16  ;;  %v3268_v16 = vld [vmem:[#allocation4 + $0x118] sm:$0xff] }
 0x8c4   : > { %5791 = vmatprep.subr.bf16.mxu1 %v6060_v54 }
 0x8c7   : > { %5793 = vmatpush3.bf16.msra.mxu1 %v5792_v8  ;;  %v5811_v8 = vpack.c.bf16 %v3268_v16, %v3267_v5 }
 0x8c8   : > { %5794 = vmatprep.subr.bf16.mxu1 %v6060_v54 }
 0x8cb   : > { %5796 = vmatpush3.bf16.msra.mxu1 %v5795_v11 }
 0x8cc   : > { %5797 = vmatprep.subr.bf16.mxu1 %v6060_v54 }
 0x8cf   : > { %5799 = vmatpush3.bf16.msra.mxu1 %v5798_v20  ;;  %v3271_v20 = vld [vmem:[#allocation4 + $0x130] sm:$0xff] }
 0x8d0   : > { %5800 = vmatprep.subr.bf16.mxu1 %v6060_v54 }
 0x8d3   : > { %5802 = vmatpush3.bf16.msra.mxu1 %v5801_v24  ;;  %v5817_v24 = vpack.c.bf16 %v3272_v22, %v3271_v20 }
 0x8d4   : > { %5807 = vmatprep.subr.bf16.mxu1 %v6060_v54 }
 0x989   : > { %v4846_v25 = vpop.f32.mrb[6].mxu1 }
 0x98a   : > { %v2843_v1 = vadd.f32 %v4846_v25, %v3495_v62  ;;  %v2823_v26 = vpop.f32.mrb[7].mxu1  ;;  %v3274_v25 = vld [vmem:[#allocation4 + $0x148] sm:$0xff] }
 0x98b   : > { %v2842_v27 = vadd.f32 %v3495_v62, %v2823_v26  ;;  %v3273_v62 = vld [vmem:[#allocation4 + $0x140] sm:$0xff]  ;;  %v3276_v26 = vld [vmem:[#allocation4 + $0x158] sm:$0xff] }
 0x98c   : > { %v2847_v63 = vrot.slane %v2843_v1, 7  ;;  %v5820_v1 = vpack.c.bf16 %v3274_v25, %v3273_v62 }
 0x98d   : > { %v2846_v28 = vrot.slane %v2842_v27, 7 }
 0x98e   : > { %v2854_v29 = vadd.f32 %v2847_v63, %v6378_v33 }
 0x98f   : > { %v2848_v30 = vsel %vm313_vm0, %v2846_v28, %v2847_v63  ;;  %v2852_v31 = vadd.f32 %v2846_v28, %v6385_v36  ;;  %v3277_v63 = vld [vmem:[#allocation4 + $0x160] sm:$0xff]  ;;  %v3278_v28 = vld [vmem:[#allocation4 + $0x168] sm:$0xff] }
 0x990   : > { %v2853_v32 = vadd.f32 %v2848_v30, %v6381_v34  ;;  %v2856_v37 = vsel %vm313_vm0, %v2854_v29, 0.0  ;;  %v2958_v34 = vld [vmem:[#allocation7 + $0x8] sm:$0xff]  ;;  %v5826_v29 = vpack.c.bf16 %v3278_v28, %v3277_v63 }
 0x991   : > { %v2855_v35 = vsel %vm313_vm0, 0.0, %v2852_v31  ;;  %v2859_v36 = vadd.f32 %v2856_v37, %v6254_v14  ;;  %v3033_v14 = vld [vmem:[#allocation4 + $0x80] sm:$0xff]  ;;  %v3279_v30 = vld [vmem:[#allocation4 + $0x170] sm:$0xff]  ;;  %v3280_v31 = vld [vmem:[#allocation4 + $0x178] sm:$0xff] }
 0x992   : > { %v2857_v38 = vadd.f32 %v2855_v35, %v6252_v13  ;;  %v2858_v39 = vadd.f32 %v2853_v32, %v6259_v15  ;;  %v2862_v13 = vld [vmem:[#allocation7] sm:$0xff]  ;;  %v5756_v40 = vpack.c.bf16 %v3034_v57, %v3033_v14  ;;  %v5829_v32 = vpack.c.bf16 %v3280_v31, %v3279_v30 }
 0x993   : > { %v6447_v15 = vsel %vm313_vm0, %v2859_v36, 0.0 }
 0x994   : > { %v6439_v33 = vpack.c.bf16 %v2858_v39, %v2857_v38 }
 0x996   : > { %5750 = vmatpush3.bf16.msk.msra.mxu0 %vm6435_vm6, %v6439_v33 }
 0x997   : > { %4851 = vmatprep.subr.mxu0 %v6062_v55 }
 0x99a   : > { %4852 = vmatpush3.msk.msra.mxu0 %vm2867_vm7, %v6447_v15 }
 0x99b   : > { %4854 = vmatmul.mubr.msk.f32.vlgmr.msra.gmra.mrb[8].mxu0 %vm2863_vm8, %v2862_v13  ;;  %5751 = vmatprep.subr.bf16.mxu0 %v6060_v54 }
 0x99c   : > { %5754 = vmatpush3.bf16.msk.msra.mxu0 %vm6435_vm6, %v6439_v33  ;;  %4862 = vmatprep.mubr.msk.f32.mxu0 %vm6061_vm4, %v6062_v55 }
 0x99d   : > { %4860 = vmatprep.subr.mxu0 %v6062_v55 }
 0x9a0   : > { %4861 = vmatpush3.msk.msra.mxu0 %vm2867_vm7, %v6447_v15 }
 0x9a1   : > { %4863 = vmatmul.mubr.msk.f32.vlgmr.msra.gmra.mrb[10].mxu0 %vm2863_vm8, %v2958_v34  ;;  %5755 = vmatprep.subr.bf16.mxu0 %v6060_v54 }
 0x9a2   : > { %5757 = vmatpush3.bf16.msra.mxu0 %v5756_v40  ;;  %4897 = vmatprep.mubr.msk.f32.mxu0 %vm6061_vm4, %v6062_v55 }
 0x9a3   : > { %5758 = vmatprep.subr.bf16.mxu0 %v6060_v54 }
 0x9a6   : > { %5760 = vmatpush3.bf16.msra.mxu0 %v5759_v42 }
 0x9a7   : > { %5761 = vmatprep.subr.bf16.mxu0 %v6060_v54 }
 0x9aa   : > { %5763 = vmatpush3.bf16.msra.mxu0 %v5762_v45 }
 0x9ab   : > { %5764 = vmatprep.subr.bf16.mxu0 %v6060_v54 }
 0x9ae   : > { %5766 = vmatpush3.bf16.msra.mxu0 %v5765_v48 }
 0x9af   : > { %5767 = vmatprep.subr.bf16.mxu0 %v6060_v54 }
 0x9b2   : > { %5769 = vmatpush3.bf16.msra.mxu0 %v5768_v51 }
 0x9b3   : > { %5770 = vmatprep.subr.bf16.mxu0 %v6060_v54 }
 0x9b6   : > { %5772 = vmatpush3.bf16.msra.mxu0 %v5771_v56 }
 0x9b7   : > { %5773 = vmatprep.subr.bf16.mxu0 %v6060_v54 }
 0x9ba   : > { %5775 = vmatpush3.bf16.msra.mxu0 %v5774_v60 }
 0x9bb   : > { %5776 = vmatprep.subr.bf16.mxu0 %v6060_v54 }
 0x9be   : > { %5778 = vmatpush3.bf16.msra.mxu0 %v5777_v2 }
 0x9bf   : > { %5803 = vmatprep.subr.bf16.mxu0 %v6060_v54 }
 0xa6e   : > { %v2937_v6 = vpop.f32.mrb[8].mxu0 }
 0xa6f   : > { %v4855_v7 = vpop.f32.mrb[9].mxu0  ;;  %4933 = vmatmul.mubr.f32.vlgmr.msra.gmra.mrb[8].mxu1 %v2937_v6 }
 0xa70   : > { %5809 = vmatpush3.bf16.msra.mxu1 %v5808_v44  ;;  %4976 = vmatprep.mubr.msk.f32.mxu1 %vm6061_vm4, %v6062_v55 }
 0xa71   : > { %5810 = vmatprep.subr.bf16.mxu1 %v6060_v54 }
 0xa74   : > { %v3028_v11 = vpop.f32.mrb[10].mxu0  ;;  %5812 = vmatpush3.bf16.msra.mxu1 %v5811_v8 }
 0xa75   : > { %v4864_v17 = vpop.f32.mrb[11].mxu0  ;;  %4898 = vmatmul.mubr.f32.vlgmr.msra.gmra.mrb[12].mxu0 %v3028_v11  ;;  %5813 = vmatprep.subr.bf16.mxu1 %v6060_v54 }
 0xa76   : > { %5806 = vmatpush3.bf16.msk.msra.mxu0 %vm6435_vm6, %v6439_v33  ;;  %4941 = vmatprep.mubr.msk.f32.mxu0 %vm6061_vm4, %v6062_v55 }
 0xa77   : > { %4939 = vmatprep.subr.mxu0 %v6062_v55  ;;  %v3275_v55 = vld [vmem:[#allocation4 + $0x150] sm:$0xff] }
 0xa78   : > { %5815 = vmatpush3.bf16.msra.mxu1 %v5814_v12  ;;  %v5823_v27 = vpack.c.bf16 %v3276_v26, %v3275_v55 }
 0xa79   : > { %5816 = vmatprep.subr.bf16.mxu1 %v6060_v54 }
 0xa7a   : > { %4940 = vmatpush3.msk.msra.mxu0 %vm2867_vm7, %v6447_v15  ;;  %v3508_v15 = vld [vmem:[%s6505_s4] ss:$0 sm:$0xff] }
 0xa7b   : > { %4942 = vmatmul.mubr.msk.f32.vlgmr.msra.gmra.mrb[14].mxu0 %vm2863_vm8, %v3190_v23 }
 0xa7c   : > { %5818 = vmatpush3.bf16.msra.mxu1 %v5817_v24 }
 0xa7d   : > { %5819 = vmatprep.subr.bf16.mxu1 %v6060_v54 }
 0xa80   : > { %5821 = vmatpush3.bf16.msra.mxu1 %v5820_v1 }
 0xa81   : > { %5822 = vmatprep.subr.bf16.mxu1 %v6060_v54 }
 0xa84   : > { %5824 = vmatpush3.bf16.msra.mxu1 %v5823_v27 }
 0xa85   : > { %5825 = vmatprep.subr.bf16.mxu1 %v6060_v54 }
 0xa88   : > { %5827 = vmatpush3.bf16.msra.mxu1 %v5826_v29 }
 0xa89   : > { %5828 = vmatprep.subr.bf16.mxu1 %v6060_v54 }
 0xa8c   : > { %5830 = vmatpush3.bf16.msra.mxu1 %v5829_v32 }
 0xb42   : > { %v3185_v35 = vpop.f32.mrb[8].mxu1 }
 0xb43   : > { %v4934_v37 = vpop.f32.mrb[9].mxu1 }
 0xb48   : > { %v3115_v38 = vpop.f32.mrb[12].mxu0 }
 0xb49   : > { %v3186_v39 = vadd.f32 %v3185_v35, %v3115_v38  ;;  %v4899_v18 = vpop.f32.mrb[13].mxu0 }
 0xb4e   : > { %v3260_v33 = vpop.f32.mrb[14].mxu0 }
 0xb4f   : > { %v4943_v36 = vpop.f32.mrb[15].mxu0  ;;  %4977 = vmatmul.mubr.f32.vlgmr.msra.gmra.mrb[10].mxu1 %v3260_v33 }
 0xc22   : > { %v3347_v13 = vpop.f32.mrb[10].mxu1 }
 0xc23   : > { %v3351_v14 = vadd.f32 %v3347_v13, %v3186_v39  ;;  %v4978_v54 = vpop.f32.mrb[11].mxu1 }
 0xc25   : > { %v3359_v57 = vadd.f32 %v3508_v15, %v3351_v14 }
 0xc27   : > { %v3360_v34 = vmax.f32 %v3359_v57, 0.0 }
 0xc29   : > { %3361 = vst [vmem:[%s308_s8] sm:$0xff] %v3360_v34 }
 0xc2a PF: > { %s19_s21 = sadd.s32 1, %s6050_s21  }
 0xc2b   : > { %p16_p6 = scmp.ge.s32.totalorder %s19_s21, 4  }
 0xc2d   :  { %18 = sbr.rel (!%p16_p6) target bundleno = 3 (0x3), region = 125 }
 0xc34   :  { %3381 = vsyncpa [#allocation3], 1 }
 0xc35   :  { %3383 = vsyncpa [#allocation3 + $0x1], 1 }
 0xc36   :  { %3384 = vsyncpa [#allocation5], 1 }
 0xc37   :  { %3385 = vsyncpa [#allocation8], 1 }

</bundles_post_ra>
